<compile_context>
chip_gen: v5e
topology: v5e:2x2
jax: 0.10.0
libtpu: 0.0.40
codegen_flags: <defaults>
</compile_context>

<pallas_src>
import functools
import math

import jax
import jax.numpy as jnp
from jax.experimental import pallas as pl
from jax.experimental.pallas import tpu as pltpu

EPS = 1e-6
_NEG_BIG = -1e30   # finite "minus infinity" for the running softmax max


# ----------------------------- kernels ------------------------------------

def _ln_qkv_kernel(ln_ref, x_ref, wqkv_ref, bqkv_ref, q_ref, k_ref, v_ref,
                   *, d_model, n_heads, inv_sqrt_dk):
    """(b, s-tile) program: n1 = LayerNorm(x); fused QKV GEMM; head-major Q/K/V stores."""
    x = x_ref[0]                                                    # (TS, D) f32
    mean = jnp.mean(x, axis=-1, keepdims=True)
    var = jnp.sum((x - mean) ** 2, axis=-1, keepdims=True) * (1.0 / (d_model - 1))
    inv = pl.reciprocal(jnp.sqrt(var) + EPS, approx=True)           # EUP, off the VALU path
    n1 = ln_ref[0] * ((x - mean) * inv) + ln_ref[1]                 # scalar alpha/bias (SMEM)
    qkv = jnp.dot(n1.astype(jnp.bfloat16), wqkv_ref[...],
                  preferred_element_type=jnp.float32) + bqkv_ref[...]   # (TS, 3D) f32
    dk = d_model // n_heads
    for hh in range(n_heads):                                       # static data-movement loop
        base = hh * dk
        # Q pre-scaled by 1/sqrt(dk) in f32 before the bf16 cast (moves the scale off
        # the (H,TQ,S) score tensor in stage 2).
        q_ref[0, hh] = (qkv[:, base:base + dk] * inv_sqrt_dk).astype(q_ref.dtype)
        k_ref[0, hh] = qkv[:, d_model + base:d_model + base + dk].astype(k_ref.dtype)
        v_ref[0, hh] = qkv[:, 2 * d_model + base:2 * d_model + base + dk].astype(v_ref.dtype)


def _attn_kernel(x_ref, q_ref, k_ref, v_ref, wo_ref, bo_ref, o_ref,
                 m_scr, l_scr, acc_scr, ctx_scr, *, n_heads, d_k):
    """(b, q-tile, kv-tile) program: flash-style online softmax + Wo projection + residual.

    NOTE: src_mask intentionally ignored (the PyTorch reference discards masked_fill's
    result, so the mask has no effect).
    """
    ki = pl.program_id(2)

    @pl.when(ki == 0)
    def _():
        m_scr[...] = jnp.full(m_scr.shape, _NEG_BIG, m_scr.dtype)
        l_scr[...] = jnp.zeros(l_scr.shape, l_scr.dtype)
        acc_scr[...] = jnp.zeros(acc_scr.shape, acc_scr.dtype)

    q = q_ref[0]                                                    # (H, TQ, dk) bf16, pre-scaled
    k = k_ref[0]                                                    # (H, TKV, dk) bf16
    v = v_ref[0]                                                    # (H, TKV, dk) bf16
    s = jnp.einsum("hqd,hkd->hqk", q, k,
                   preferred_element_type=jnp.float32)              # (H, TQ, TKV) f32
    m_prev = m_scr[...]
    m_new = jnp.maximum(m_prev, jnp.max(s, axis=-1, keepdims=True))
    alpha = jnp.exp(m_prev - m_new)                                 # (H, TQ, 1)
    p = jnp.exp(s - m_new)                                          # unnormalized, in (0, 1]
    # TODO(synk): on v6e/v7x a bf16 exp (f32 max/sum kept) would ~halve the EUP cost; kept
    # f32 here for portability (v5e has no bf16 EUP) and numerical headroom.
    l_scr[...] = alpha * l_scr[...] + jnp.sum(p, axis=-1, keepdims=True)
    acc_scr[...] = alpha * acc_scr[...] + jnp.einsum(
        "hqk,hkd->hqd", p.astype(jnp.bfloat16), v, preferred_element_type=jnp.float32)
    m_scr[...] = m_new

    @pl.when(ki == pl.num_programs(2) - 1)
    def _():
        # Deferred softmax normalization: one reciprocal-mul on (H,TQ,dk) instead of (H,TQ,S).
        ctx = acc_scr[...] * pl.reciprocal(l_scr[...], approx=True)
        ctx = ctx.astype(ctx_scr.dtype)                             # (H, TQ, dk) bf16
        for hh in range(n_heads):                                   # concat(heads) via slice-stores
            ctx_scr[:, hh * d_k:(hh + 1) * d_k] = ctx[hh]
        attn = jnp.dot(ctx_scr[...], wo_ref[...],
                       preferred_element_type=jnp.float32)          # single K=D MXU contraction
        o_ref[0] = (x_ref[0] + attn + bo_ref[...]).astype(o_ref.dtype)   # residual + bias


def _ffn_kernel(ln_ref, x_ref, w1_ref, b1_ref, w2_ref, b2_ref, o_ref,
                n2_scr, acc_scr, *, d_model):
    """(row-tile, dff-tile) program: out = x + relu(LN(x) @ W1 + b1) @ W2 + b2."""
    fj = pl.program_id(1)

    @pl.when(fj == 0)
    def _():
        x = x_ref[...]                                              # (TR, D) f32
        mean = jnp.mean(x, axis=-1, keepdims=True)
        var = jnp.sum((x - mean) ** 2, axis=-1, keepdims=True) * (1.0 / (d_model - 1))
        inv = pl.reciprocal(jnp.sqrt(var) + EPS, approx=True)
        n2_scr[...] = (ln_ref[0] * ((x - mean) * inv) + ln_ref[1]).astype(n2_scr.dtype)
        acc_scr[...] = x + b2_ref[...]                              # residual + final bias

    hdn = jnp.maximum(
        jnp.dot(n2_scr[...], w1_ref[...], preferred_element_type=jnp.float32) + b1_ref[...],
        0.0)                                                        # (TR, TF) f32
    acc_scr[...] += jnp.dot(hdn.astype(jnp.bfloat16), w2_ref[...],
                            preferred_element_type=jnp.float32)

    @pl.when(fj == pl.num_programs(1) - 1)
    def _():
        o_ref[...] = acc_scr[...].astype(o_ref.dtype)


# ----------------------------- sizing helpers ------------------------------

def _vmem_capacity_bytes():
    try:
        info = pltpu.get_tpu_info()
        cap = int(getattr(info, "vmem_capacity_bytes", 0) or 0)
        if cap > 0:
            return cap
    except Exception:
        pass
    return 64 * 1024 * 1024        # conservative fallback (v7x per-core VMEM)


def _divisor_tile(n, target, mult):
    """Largest t <= min(target, n) with t % mult == 0 and n % t == 0; else n itself."""
    t = (min(target, n) // mult) * mult
    while t >= mult:
        if n % t == 0:
            return t
        t -= mult
    return n


def _shrink_to_budget(t, n, mult, bytes_of, budget):
    """Walk t down through divisors of n (multiples of mult) until bytes_of(t) <= budget."""
    while t > mult and bytes_of(t) > budget:
        nt = ((t - 1) // mult) * mult
        while nt >= mult and n % nt != 0:
            nt -= mult
        if nt < mult:
            break
        t = nt
    return t


# ----------------------------- wrapper ------------------------------------

def pack_params(params, h):
    """One-time packing / casting of parameters (hoisted out of the per-call jit)."""
    del h
    bf, f32 = jnp.bfloat16, jnp.float32
    return {
        "wqkv": jnp.concatenate([params["wq"], params["wk"], params["wv"]], 1).astype(bf),
        "bqkv": jnp.concatenate([params["bq"], params["bk"], params["bv"]], 1).astype(f32),
        "wo": params["wo"].astype(bf),            # (D, D); input dim == concat(head, dk)
        "bo": params["bo"].astype(f32),
        "w1": params["w1"].astype(bf), "b1": params["b1"].astype(f32),
        "w2": params["w2"].astype(bf), "b2": params["b2"].astype(f32),
        "ln1": jnp.concatenate([params["alpha1"].reshape(-1),
                                params["bias1"].reshape(-1)]).astype(f32),
        "ln2": jnp.concatenate([params["alpha2"].reshape(-1),
                                params["bias2"].reshape(-1)]).astype(f32),
    }


def encoder_block(x, pp, h, src_mask=None):
    """x: (B, S, D) float32; pp: pack_params(...) output.

    src_mask accepted but (faithfully) unused: the reference discards masked_fill's result.
    Best performance when D, D_FF are multiples of 128 and S (and B*S) multiples of 8.
    """
    del src_mask
    B, S, D = x.shape
    assert D % h == 0, "d_model not divisible by h"
    dk = D // h
    D_FF = pp["w1"].shape[1]
    BS = B * S
    bf16, f32 = jnp.bfloat16, jnp.float32

    # ---- generation-aware VMEM budget and tile selection ----
    cap = _vmem_capacity_bytes()
    vmem_limit = int(cap * 0.80)               # ~104 MiB on v5e/v6e, ~52 MiB on v7x
    budget = int(vmem_limit * 0.85)            # headroom for compiler scratch / semaphores
    big_vmem = cap >= (100 << 20)              # v5e/v6e (128 MiB) vs v7x (64 MiB)

    TS = _divisor_tile(S, 512 if big_vmem else 256, 8)            # stage-1 seq tile
    TS = _shrink_to_budget(TS, S, 8, lambda t: t * D * 20 + 6 * D * D, budget)

    TKV = _divisor_tile(S, 512, 8)                                # stage-2 KV tile
    TQ = _divisor_tile(S, 512 if big_vmem else 256, 8)            # stage-2 query tile
    TQ = _shrink_to_budget(TQ, S, 8,
                           lambda t: t * D * 26 + TKV * D * 8 + 2 * D * D, budget)
    TKV = _shrink_to_budget(TKV, S, 8,
                            lambda t: TQ * D * 26 + t * D * 8 + 2 * D * D, budget)

    TR = _divisor_tile(BS, 512 if big_vmem else 256, 8)           # stage-3 row tile
    if D * D_FF * 8 + TR * D * 22 <= budget:
        TF = D_FF          # W1/W2 resident for the whole call (fetched from HBM once)
    else:
        TF = _divisor_tile(D_FF, 1024 if big_vmem else 512, 128)  # re-streamed per row tile
    TR = _shrink_to_budget(TR, BS, 8, lambda t: t * D * 22 + D * TF * 8, budget)

    def cparams(sem):
        return pltpu.CompilerParams(dimension_semantics=sem,
                                    vmem_limit_bytes=vmem_limit)

    smem_full = pl.BlockSpec(memory_space=pltpu.MemorySpace.SMEM)   # LN scalars
    vmem_full = pl.BlockSpec(memory_space=pltpu.MemorySpace.VMEM)   # resident (single-copy) weights

    # ---- stage 1: LayerNorm + fused QKV projection -> head-major Q/K/V ----
    # TODO(synk): for D >= ~1536 on v7x, add a column grid axis over 3D so the (D,3D)
    # weight does not need to be fully resident in VMEM.
    qkv_shape = jax.ShapeDtypeStruct((B, h, S, dk), bf16)
    q_h, k_h, v_h = pl.pallas_call(
        functools.partial(_ln_qkv_kernel, d_model=D, n_heads=h,
                          inv_sqrt_dk=1.0 / math.sqrt(dk)),
        out_shape=(qkv_shape, qkv_shape, qkv_shape),
        grid_spec=pltpu.PrefetchScalarGridSpec(
            num_scalar_prefetch=0,
            grid=(B, S // TS),
            in_specs=[smem_full,
                      pl.BlockSpec((1, TS, D), lambda b, si: (b, si, 0)),
                      vmem_full,
                      vmem_full],
            out_specs=(pl.BlockSpec((1, h, TS, dk), lambda b, si: (b, 0, si, 0)),
                       pl.BlockSpec((1, h, TS, dk), lambda b, si: (b, 0, si, 0)),
                       pl.BlockSpec((1, h, TS, dk), lambda b, si: (b, 0, si, 0)))),
        compiler_params=cparams(("parallel", "parallel")),
    )(pp["ln1"], x, pp["wqkv"], pp["bqkv"])

    # ---- stage 2: flash-style attention (KV-tiled) + Wo projection + residual ----
    x1 = pl.pallas_call(
        functools.partial(_attn_kernel, n_heads=h, d_k=dk),
        out_shape=jax.ShapeDtypeStruct((B, S, D), f32),
        grid_spec=pltpu.PrefetchScalarGridSpec(
            num_scalar_prefetch=0,
            grid=(B, S // TQ, S // TKV),
            in_specs=[pl.BlockSpec((1, TQ, D), lambda b, qi, ki: (b, qi, 0)),
                      pl.BlockSpec((1, h, TQ, dk), lambda b, qi, ki: (b, 0, qi, 0)),
                      pl.BlockSpec((1, h, TKV, dk), lambda b, qi, ki: (b, 0, ki, 0)),
                      pl.BlockSpec((1, h, TKV, dk), lambda b, qi, ki: (b, 0, ki, 0)),
                      vmem_full,
                      vmem_full],
            out_specs=pl.BlockSpec((1, TQ, D), lambda b, qi, ki: (b, qi, 0)),
            scratch_shapes=[pltpu.VMEM((h, TQ, 1), f32),     # running max
                            pltpu.VMEM((h, TQ, 1), f32),     # running sum
                            pltpu.VMEM((h, TQ, dk), f32),    # unnormalized context
                            pltpu.VMEM((TQ, D), bf16)]),     # lane-dense concat(heads)
        compiler_params=cparams(("parallel", "parallel", "arbitrary")),
    )(x, q_h, k_h, v_h, pp["wo"], pp["bo"])

    # ---- stage 3: LayerNorm + tiled FFN + residual ----
    x1_2d = x1.reshape(BS, D)
    out2d = pl.pallas_call(
        functools.partial(_ffn_kernel, d_model=D),
        out_shape=jax.ShapeDtypeStruct((BS, D), f32),
        grid_spec=pltpu.PrefetchScalarGridSpec(
            num_scalar_prefetch=0,
            grid=(BS // TR, D_FF // TF),
            in_specs=[smem_full,
                      pl.BlockSpec((TR, D), lambda i, j: (i, 0)),
                      pl.BlockSpec((D, TF), lambda i, j: (0, j)),
                      pl.BlockSpec((1, TF), lambda i, j: (0, j)),
                      pl.BlockSpec((TF, D), lambda i, j: (j, 0)),
                      vmem_full],
            out_specs=pl.BlockSpec((TR, D), lambda i, j: (i, 0)),
            scratch_shapes=[pltpu.VMEM((TR, D), bf16),     # LN(x1) tile, computed once per row tile
                            pltpu.VMEM((TR, D), f32)]),    # f32 accumulator
        compiler_params=cparams(("parallel", "arbitrary")),
    )(pp["ln2"], x1_2d, pp["w1"], pp["b1"], pp["w2"], pp["b2"])

    return out2d.reshape(B, S, D)


# ----------------------------- params / reference --------------------------

def init_params(key, d_model, d_ff):
    """Deterministic init. Linear weights stored as (in, out) = W_torch.T, kept in f32."""
    ks = jax.random.split(key, 12)
    s = 1.0 / math.sqrt(d_model)
    sf = 1.0 / math.sqrt(d_ff)
    u = lambda k, shape, b: jax.random.uniform(k, shape, jnp.float32, -b, b)
    return {
        "wq": u(ks[0], (d_model, d_model), s), "bq": u(ks[1], (1, d_model), s),
        "wk": u(ks[2], (d_model, d_model), s), "bk": u(ks[3], (1, d_model), s),
        "wv": u(ks[4], (d_model, d_model), s), "bv": u(ks[5], (1, d_model), s),
        "wo": u(ks[6], (d_model, d_model), s), "bo": u(ks[7], (1, d_model), s),
        "w1": u(ks[8], (d_model, d_ff), s),    "b1": u(ks[9], (1, d_ff), s),
        "w2": u(ks[10], (d_ff, d_model), sf),  "b2": u(ks[11], (1, d_model), sf),
        "alpha1": jnp.ones((1, 1), jnp.float32), "bias1": jnp.zeros((1, 1), jnp.float32),
        "alpha2": jnp.ones((1, 1), jnp.float32), "bias2": jnp.zeros((1, 1), jnp.float32),
    }


def _reference(x, p, h):
    """Pure-JAX mirror of the PyTorch forward using the kernel's precision policy
    (bf16 matmul inputs, f32 accumulation) so the comparison isolates kernel plumbing."""
    B, S, D = x.shape
    dk = D // h
    bf, f32 = jnp.bfloat16, jnp.float32

    def ln(v, a, b):
        mean = jnp.mean(v, -1, keepdims=True)
        std = jnp.sqrt(jnp.sum((v - mean) ** 2, -1, keepdims=True) / (D - 1))
        return a * (v - mean) / (std + EPS) + b

    def mm(a, w, b_):
        return jnp.dot(a.astype(bf), w.astype(bf), preferred_element_type=f32) + b_

    n1 = ln(x, p["alpha1"][0, 0], p["bias1"][0, 0])
    q = mm(n1, p["wq"], p["bq"]).astype(bf)
    k = mm(n1, p["wk"], p["bk"]).astype(bf)
    v = mm(n1, p["wv"], p["bv"]).astype(bf)
    heads = lambda t: t.reshape(B, S, h, dk).transpose(0, 2, 1, 3)      # (B,H,S,dk)
    qh, kh, vh = heads(q), heads(k), heads(v)
    s = jnp.einsum("bhqd,bhkd->bhqk", qh, kh, preferred_element_type=f32) / math.sqrt(dk)
    # mask intentionally ignored (reference discards masked_fill result)
    s = s - jnp.max(s, -1, keepdims=True)
    a = jnp.exp(s)
    a = a / jnp.sum(a, -1, keepdims=True)
    ctx = jnp.einsum("bhqk,bhkd->bhqd", a.astype(bf), vh, preferred_element_type=f32)
    ctx = ctx.transpose(0, 2, 1, 3).reshape(B, S, D)
    attn = mm(ctx, p["wo"], p["bo"])
    x1 = x + attn
    n2 = ln(x1, p["alpha2"][0, 0], p["bias2"][0, 0])
    hid = jnp.maximum(mm(n2, p["w1"], p["b1"]), 0.0)
    ff = mm(hid, p["w2"], p["b2"])
    return x1 + ff


if __name__ == "__main__":
    # Small but lane-aligned shapes: D, D_FF multiples of 128; S multiple of 8.
    B, S, D, H, D_FF = 2, 16, 128, 4, 1024
    key = jax.random.PRNGKey(0)
    kx, kp = jax.random.split(key)
    x = jax.random.normal(kx, (B, S, D), jnp.float32)
    params = init_params(kp, D, D_FF)
    packed = pack_params(params, H)                 # packed ONCE, outside the jitted forward
    src_mask = jnp.ones((B, 1, 1, S), jnp.float32)  # accepted but has no effect (see note)

    fwd = jax.jit(functools.partial(encoder_block, h=H))
    out = jax.block_until_ready(fwd(x, packed, src_mask=src_mask))

    ref = _reference(x, params, H)
    assert out.shape == (B, S, D)
    max_err = float(jnp.max(jnp.abs(out - ref)))
    # Tolerance covers bf16 rounding, flash-softmax recombination order and EUP approx recip.
    assert jnp.allclose(out, ref, atol=1e-2, rtol=1e-2), f"mismatch vs reference, max_err={max_err}"
    print("KERNEL_OK")
</pallas_src>

<mosaic_0001>
module attributes {stable_mosaic.version = 11 : i64} {
  func.func @_ffn_kernel(%arg0: i32, %arg1: i32, %arg2: memref<2xf32, #tpu.memory_space<smem>>, %arg3: memref<32x128xf32, #tpu.memory_space<vmem>>, %arg4: memref<128x1024xbf16, #tpu.memory_space<vmem>>, %arg5: memref<1x1024xf32, #tpu.memory_space<vmem>>, %arg6: memref<1024x128xbf16, #tpu.memory_space<vmem>>, %arg7: memref<1x128xf32, #tpu.memory_space<vmem>>, %arg8: memref<32x128xf32, #tpu.memory_space<vmem>>, %arg9: memref<32x128xbf16, #tpu.memory_space<vmem>>, %arg10: memref<32x128xf32, #tpu.memory_space<vmem>>) attributes {dimension_semantics = [#tpu.dimension_semantics<parallel>, #tpu.dimension_semantics<arbitrary>], iteration_bounds = array<i64: 1, 1>, scalar_prefetch = 0 : i64, scratch_operands = 2 : i64, tpu.core_type = #tpu.core_type<tc>, window_params = [{transform_indices = @transform_0, window_bounds = array<i64: 2>}, {transform_indices = @transform_1, window_bounds = array<i64: 32, 128>}, {transform_indices = @transform_2, window_bounds = array<i64: 128, 1024>}, {transform_indices = @transform_3, window_bounds = array<i64: 1, 1024>}, {transform_indices = @transform_4, window_bounds = array<i64: 1024, 128>}, {pipeline_mode = #tpu.pipeline_mode<synchronous>, transform_indices = @transform_5, window_bounds = array<i64: 1, 128>}, {transform_indices = @transform_6, window_bounds = array<i64: 32, 128>}]} {
    %c0_i32 = arith.constant 0 : i32
    %0 = arith.cmpi eq, %arg1, %c0_i32 : i32
    %1 = arith.extui %0 : i1 to i32
    %c0_i32_0 = arith.constant 0 : i32
    %2 = arith.cmpi ne, %1, %c0_i32_0 : i32
    scf.if %2 {
      %c0_16 = arith.constant 0 : index
      %c0_17 = arith.constant 0 : index
      %20 = vector.load %arg3[%c0_16, %c0_17] : memref<32x128xf32, #tpu.memory_space<vmem>>, vector<32x128xf32>
      %cst_18 = arith.constant dense<0.000000e+00> : vector<32xf32>
      %21 = vector.multi_reduction <add>, %20, %cst_18 [1] : vector<32x128xf32> to vector<32xf32>
      %22 = vector.shape_cast %21 : vector<32xf32> to vector<32x1xf32>
      %cst_19 = arith.constant 1.280000e+02 : f32
      %23 = vector.broadcast %cst_19 : f32 to vector<32x1xf32>
      %24 = arith.divf %22, %23 : vector<32x1xf32>
      %25 = vector.broadcast %24 : vector<32x1xf32> to vector<32x128xf32>
      %26 = arith.subf %20, %25 : vector<32x128xf32>
      %27 = arith.mulf %26, %26 : vector<32x128xf32>
      %cst_20 = arith.constant dense<0.000000e+00> : vector<32xf32>
      %28 = vector.multi_reduction <add>, %27, %cst_20 [1] : vector<32x128xf32> to vector<32xf32>
      %29 = vector.shape_cast %28 : vector<32xf32> to vector<32x1xf32>
      %cst_21 = arith.constant 0.00787401571 : f32
      %30 = vector.broadcast %cst_21 : f32 to vector<32x1xf32>
      %31 = arith.mulf %29, %30 : vector<32x1xf32>
      %32 = math.sqrt %31 : vector<32x1xf32>
      %cst_22 = arith.constant 9.99999997E-7 : f32
      %33 = vector.broadcast %cst_22 : f32 to vector<32x1xf32>
      %34 = arith.addf %32, %33 : vector<32x1xf32>
      %35 = tpu.reciprocal %34 {approx = true} : vector<32x1xf32> -> vector<32x1xf32>
      %c0_23 = arith.constant 0 : index
      %36 = memref.load %arg2[%c0_23] : memref<2xf32, #tpu.memory_space<smem>>
      %37 = vector.broadcast %24 : vector<32x1xf32> to vector<32x128xf32>
      %38 = arith.subf %20, %37 : vector<32x128xf32>
      %39 = vector.broadcast %35 : vector<32x1xf32> to vector<32x128xf32>
      %40 = arith.mulf %38, %39 : vector<32x128xf32>
      %41 = vector.broadcast %36 : f32 to vector<32x128xf32>
      %42 = arith.mulf %41, %40 : vector<32x128xf32>
      %c1 = arith.constant 1 : index
      %43 = memref.load %arg2[%c1] : memref<2xf32, #tpu.memory_space<smem>>
      %44 = vector.broadcast %43 : f32 to vector<32x128xf32>
      %45 = arith.addf %42, %44 : vector<32x128xf32>
      %46 = arith.truncf %45 : vector<32x128xf32> to vector<32x128xbf16>
      %c0_24 = arith.constant 0 : index
      %c0_25 = arith.constant 0 : index
      %47 = vector.load %arg9[%c0_24, %c0_25] : memref<32x128xbf16, #tpu.memory_space<vmem>>, vector<32x128xbf16>
      tpu.vector_store %arg9[%c0_24, %c0_25], %46 {strides = array<i32>} : memref<32x128xbf16, #tpu.memory_space<vmem>>, vector<32x128xbf16>,
      %c0_26 = arith.constant 0 : index
      %c0_27 = arith.constant 0 : index
      %48 = vector.load %arg7[%c0_26, %c0_27] : memref<1x128xf32, #tpu.memory_space<vmem>>, vector<1x128xf32>
      %49 = vector.broadcast %48 : vector<1x128xf32> to vector<32x128xf32>
      %50 = arith.addf %20, %49 : vector<32x128xf32>
      %c0_28 = arith.constant 0 : index
      %c0_29 = arith.constant 0 : index
      %51 = vector.load %arg10[%c0_28, %c0_29] : memref<32x128xf32, #tpu.memory_space<vmem>>, vector<32x128xf32>
      tpu.vector_store %arg10[%c0_28, %c0_29], %50 {strides = array<i32>} : memref<32x128xf32, #tpu.memory_space<vmem>>, vector<32x128xf32>,
    } else {
    }
    %c0 = arith.constant 0 : index
    %c0_1 = arith.constant 0 : index
    %3 = vector.load %arg9[%c0, %c0_1] : memref<32x128xbf16, #tpu.memory_space<vmem>>, vector<32x128xbf16>
    %c0_2 = arith.constant 0 : index
    %c0_3 = arith.constant 0 : index
    %4 = vector.load %arg4[%c0_2, %c0_3] : memref<128x1024xbf16, #tpu.memory_space<vmem>>, vector<128x1024xbf16>
    %cst = arith.constant dense<0.000000e+00> : vector<32x1024xf32>
    %5 = tpu.matmul %3, %4, %cst {dimension_numbers = #tpu.dot_dimension_numbers<[1], [0], [0], [1], [0, 0, 1, 1], [], []>} : vector<32x128xbf16>, vector<128x1024xbf16>, vector<32x1024xf32> -> vector<32x1024xf32>
    %c0_4 = arith.constant 0 : index
    %c0_5 = arith.constant 0 : index
    %6 = vector.load %arg5[%c0_4, %c0_5] : memref<1x1024xf32, #tpu.memory_space<vmem>>, vector<1x1024xf32>
    %7 = vector.broadcast %6 : vector<1x1024xf32> to vector<32x1024xf32>
    %8 = arith.addf %5, %7 : vector<32x1024xf32>
    %cst_6 = arith.constant 0.000000e+00 : f32
    %9 = vector.broadcast %cst_6 : f32 to vector<32x1024xf32>
    %10 = arith.maximumf %8, %9 : vector<32x1024xf32>
    %c0_7 = arith.constant 0 : index
    %c0_8 = arith.constant 0 : index
    %11 = vector.load %arg10[%c0_7, %c0_8] : memref<32x128xf32, #tpu.memory_space<vmem>>, vector<32x128xf32>
    %12 = arith.truncf %10 : vector<32x1024xf32> to vector<32x1024xbf16>
    %c0_9 = arith.constant 0 : index
    %c0_10 = arith.constant 0 : index
    %13 = vector.load %arg6[%c0_9, %c0_10] : memref<1024x128xbf16, #tpu.memory_space<vmem>>, vector<1024x128xbf16>
    %cst_11 = arith.constant dense<0.000000e+00> : vector<32x128xf32>
    %14 = tpu.matmul %12, %13, %cst_11 {dimension_numbers = #tpu.dot_dimension_numbers<[1], [0], [0], [1], [0, 0, 1, 1], [], []>} : vector<32x1024xbf16>, vector<1024x128xbf16>, vector<32x128xf32> -> vector<32x128xf32>
    %15 = arith.addf %11, %14 : vector<32x128xf32>
    %c0_12 = arith.constant 0 : index
    %c0_13 = arith.constant 0 : index
    %16 = vector.load %arg10[%c0_12, %c0_13] : memref<32x128xf32, #tpu.memory_space<vmem>>, vector<32x128xf32>
    tpu.vector_store %arg10[%c0_12, %c0_13], %15 {strides = array<i32>} : memref<32x128xf32, #tpu.memory_space<vmem>>, vector<32x128xf32>,
    %c0_i32_14 = arith.constant 0 : i32
    %17 = arith.cmpi eq, %arg1, %c0_i32_14 : i32
    %18 = arith.extui %17 : i1 to i32
    %c0_i32_15 = arith.constant 0 : i32
    %19 = arith.cmpi ne, %18, %c0_i32_15 : i32
    scf.if %19 {
      %c0_16 = arith.constant 0 : index
      %c0_17 = arith.constant 0 : index
      %20 = vector.load %arg10[%c0_16, %c0_17] : memref<32x128xf32, #tpu.memory_space<vmem>>, vector<32x128xf32>
      %c0_18 = arith.constant 0 : index
      %c0_19 = arith.constant 0 : index
      %21 = vector.load %arg8[%c0_18, %c0_19] : memref<32x128xf32, #tpu.memory_space<vmem>>, vector<32x128xf32>
      tpu.vector_store %arg8[%c0_18, %c0_19], %20 {strides = array<i32>} : memref<32x128xf32, #tpu.memory_space<vmem>>, vector<32x128xf32>,
    } else {
    }
    return
  }
  func.func @transform_0(%arg0: i32, %arg1: i32) -> i32 {
    %c0_i32 = arith.constant 0 : i32
    %c0_i32_0 = arith.constant 0 : i32
    return %c0_i32 : i32
  }
  func.func @transform_1(%arg0: i32, %arg1: i32) -> (i32, i32) {
    %c0_i32 = arith.constant 0 : i32
    %c0_i32_0 = arith.constant 0 : i32
    return %arg0, %c0_i32 : i32, i32
  }
  func.func @transform_2(%arg0: i32, %arg1: i32) -> (i32, i32) {
    %c0_i32 = arith.constant 0 : i32
    %c0_i32_0 = arith.constant 0 : i32
    return %c0_i32, %arg1 : i32, i32
  }
  func.func @transform_3(%arg0: i32, %arg1: i32) -> (i32, i32) {
    %c0_i32 = arith.constant 0 : i32
    %c0_i32_0 = arith.constant 0 : i32
    return %c0_i32, %arg1 : i32, i32
  }
  func.func @transform_4(%arg0: i32, %arg1: i32) -> (i32, i32) {
    %c0_i32 = arith.constant 0 : i32
    %c0_i32_0 = arith.constant 0 : i32
    return %arg1, %c0_i32 : i32, i32
  }
  func.func @transform_5(%arg0: i32, %arg1: i32) -> (i32, i32) {
    %c0_i32 = arith.constant 0 : i32
    %c0_i32_0 = arith.constant 0 : i32
    %c0_i32_1 = arith.constant 0 : i32
    return %c0_i32, %c0_i32_0 : i32, i32
  }
  func.func @transform_6(%arg0: i32, %arg1: i32) -> (i32, i32) {
    %c0_i32 = arith.constant 0 : i32
    %c0_i32_0 = arith.constant 0 : i32
    return %arg0, %c0_i32 : i32, i32
  }
}

module attributes {stable_mosaic.version = 11 : i64} {
  func.func @_attn_kernel(%arg0: i32, %arg1: i32, %arg2: i32, %arg3: memref<1x16x128xf32, #tpu.memory_space<vmem>>, %arg4: memref<1x4x16x32xbf16, #tpu.memory_space<vmem>>, %arg5: memref<1x4x16x32xbf16, #tpu.memory_space<vmem>>, %arg6: memref<1x4x16x32xbf16, #tpu.memory_space<vmem>>, %arg7: memref<128x128xbf16, #tpu.memory_space<vmem>>, %arg8: memref<1x128xf32, #tpu.memory_space<vmem>>, %arg9: memref<1x16x128xf32, #tpu.memory_space<vmem>>, %arg10: memref<4x16x1xf32, #tpu.memory_space<vmem>>, %arg11: memref<4x16x1xf32, #tpu.memory_space<vmem>>, %arg12: memref<4x16x32xf32, #tpu.memory_space<vmem>>, %arg13: memref<16x128xbf16, #tpu.memory_space<vmem>>) attributes {dimension_semantics = [#tpu.dimension_semantics<parallel>, #tpu.dimension_semantics<parallel>, #tpu.dimension_semantics<arbitrary>], iteration_bounds = array<i64: 2, 1, 1>, scalar_prefetch = 0 : i64, scratch_operands = 4 : i64, tpu.core_type = #tpu.core_type<tc>, window_params = [{transform_indices = @transform_0, window_bounds = array<i64: 1, 16, 128>}, {transform_indices = @transform_1, window_bounds = array<i64: 1, 4, 16, 32>}, {transform_indices = @transform_2, window_bounds = array<i64: 1, 4, 16, 32>}, {transform_indices = @transform_3, window_bounds = array<i64: 1, 4, 16, 32>}, {pipeline_mode = #tpu.pipeline_mode<synchronous>, transform_indices = @transform_4, window_bounds = array<i64: 128, 128>}, {pipeline_mode = #tpu.pipeline_mode<synchronous>, transform_indices = @transform_5, window_bounds = array<i64: 1, 128>}, {transform_indices = @transform_6, window_bounds = array<i64: 1, 16, 128>}]} {
    %c0_i32 = arith.constant 0 : i32
    %0 = arith.cmpi eq, %arg2, %c0_i32 : i32
    %1 = arith.extui %0 : i1 to i32
    %c0_i32_0 = arith.constant 0 : i32
    %2 = arith.cmpi ne, %1, %c0_i32_0 : i32
    scf.if %2 {
      %cst_35 = arith.constant -1.000000e+30 : f32
      %36 = vector.broadcast %cst_35 : f32 to vector<4x16x1xf32>
      %c0_36 = arith.constant 0 : index
      %c0_37 = arith.constant 0 : index
      %c0_38 = arith.constant 0 : index
      %37 = vector.load %arg10[%c0_36, %c0_37, %c0_38] : memref<4x16x1xf32, #tpu.memory_space<vmem>>, vector<4x16x1xf32>
      tpu.vector_store %arg10[%c0_36, %c0_37, %c0_38], %36 {strides = array<i32>} : memref<4x16x1xf32, #tpu.memory_space<vmem>>, vector<4x16x1xf32>,
      %cst_39 = arith.constant 0.000000e+00 : f32
      %38 = vector.broadcast %cst_39 : f32 to vector<4x16x1xf32>
      %c0_40 = arith.constant 0 : index
      %c0_41 = arith.constant 0 : index
      %c0_42 = arith.constant 0 : index
      %39 = vector.load %arg11[%c0_40, %c0_41, %c0_42] : memref<4x16x1xf32, #tpu.memory_space<vmem>>, vector<4x16x1xf32>
      tpu.vector_store %arg11[%c0_40, %c0_41, %c0_42], %38 {strides = array<i32>} : memref<4x16x1xf32, #tpu.memory_space<vmem>>, vector<4x16x1xf32>,
      %cst_43 = arith.constant 0.000000e+00 : f32
      %40 = vector.broadcast %cst_43 : f32 to vector<4x16x32xf32>
      %c0_44 = arith.constant 0 : index
      %c0_45 = arith.constant 0 : index
      %c0_46 = arith.constant 0 : index
      %41 = vector.load %arg12[%c0_44, %c0_45, %c0_46] : memref<4x16x32xf32, #tpu.memory_space<vmem>>, vector<4x16x32xf32>
      tpu.vector_store %arg12[%c0_44, %c0_45, %c0_46], %40 {strides = array<i32>} : memref<4x16x32xf32, #tpu.memory_space<vmem>>, vector<4x16x32xf32>,
    } else {
    }
    %c0 = arith.constant 0 : index
    %c0_1 = arith.constant 0 : index
    %c0_2 = arith.constant 0 : index
    %c0_3 = arith.constant 0 : index
    %3 = vector.load %arg4[%c0, %c0_1, %c0_2, %c0_3] : memref<1x4x16x32xbf16, #tpu.memory_space<vmem>>, vector<1x4x16x32xbf16>
    %4 = vector.shape_cast %3 : vector<1x4x16x32xbf16> to vector<4x16x32xbf16>
    %c0_4 = arith.constant 0 : index
    %c0_5 = arith.constant 0 : index
    %c0_6 = arith.constant 0 : index
    %c0_7 = arith.constant 0 : index
    %5 = vector.load %arg5[%c0_4, %c0_5, %c0_6, %c0_7] : memref<1x4x16x32xbf16, #tpu.memory_space<vmem>>, vector<1x4x16x32xbf16>
    %6 = vector.shape_cast %5 : vector<1x4x16x32xbf16> to vector<4x16x32xbf16>
    %c0_8 = arith.constant 0 : index
    %c0_9 = arith.constant 0 : index
    %c0_10 = arith.constant 0 : index
    %c0_11 = arith.constant 0 : index
    %7 = vector.load %arg6[%c0_8, %c0_9, %c0_10, %c0_11] : memref<1x4x16x32xbf16, #tpu.memory_space<vmem>>, vector<1x4x16x32xbf16>
    %8 = vector.shape_cast %7 : vector<1x4x16x32xbf16> to vector<4x16x32xbf16>
    "tpu.trace_start"() <{level = 10 : i32, message = "hqd,hkd->hqk"}> : () -> ()
    %cst = arith.constant dense<0.000000e+00> : vector<4x16x16xf32>
    %9 = tpu.matmul %4, %6, %cst {dimension_numbers = #tpu.dot_dimension_numbers<[2], [2], [1], [1], [0, 0, 0, 1, 1, 1], [0], [0]>} : vector<4x16x32xbf16>, vector<4x16x32xbf16>, vector<4x16x16xf32> -> vector<4x16x16xf32>
    "tpu.trace_stop"() : () -> ()
    %c0_12 = arith.constant 0 : index
    %c0_13 = arith.constant 0 : index
    %c0_14 = arith.constant 0 : index
    %10 = vector.load %arg10[%c0_12, %c0_13, %c0_14] : memref<4x16x1xf32, #tpu.memory_space<vmem>>, vector<4x16x1xf32>
    %cst_15 = arith.constant dense<0xFF800000> : vector<4x16xf32>
    %11 = vector.multi_reduction <maximumf>, %9, %cst_15 [2] : vector<4x16x16xf32> to vector<4x16xf32>
    %12 = vector.shape_cast %11 : vector<4x16xf32> to vector<4x16x1xf32>
    %13 = arith.maximumf %10, %12 : vector<4x16x1xf32>
    %14 = arith.subf %10, %13 : vector<4x16x1xf32>
    %15 = math.exp %14 : vector<4x16x1xf32>
    %16 = vector.broadcast %13 : vector<4x16x1xf32> to vector<4x16x16xf32>
    %17 = arith.subf %9, %16 : vector<4x16x16xf32>
    %18 = math.exp %17 : vector<4x16x16xf32>
    %c0_16 = arith.constant 0 : index
    %c0_17 = arith.constant 0 : index
    %c0_18 = arith.constant 0 : index
    %19 = vector.load %arg11[%c0_16, %c0_17, %c0_18] : memref<4x16x1xf32, #tpu.memory_space<vmem>>, vector<4x16x1xf32>
    %20 = arith.mulf %15, %19 : vector<4x16x1xf32>
    %cst_19 = arith.constant dense<0.000000e+00> : vector<4x16xf32>
    %21 = vector.multi_reduction <add>, %18, %cst_19 [2] : vector<4x16x16xf32> to vector<4x16xf32>
    %22 = vector.shape_cast %21 : vector<4x16xf32> to vector<4x16x1xf32>
    %23 = arith.addf %20, %22 : vector<4x16x1xf32>
    %c0_20 = arith.constant 0 : index
    %c0_21 = arith.constant 0 : index
    %c0_22 = arith.constant 0 : index
    %24 = vector.load %arg11[%c0_20, %c0_21, %c0_22] : memref<4x16x1xf32, #tpu.memory_space<vmem>>, vector<4x16x1xf32>
    tpu.vector_store %arg11[%c0_20, %c0_21, %c0_22], %23 {strides = array<i32>} : memref<4x16x1xf32, #tpu.memory_space<vmem>>, vector<4x16x1xf32>,
    %c0_23 = arith.constant 0 : index
    %c0_24 = arith.constant 0 : index
    %c0_25 = arith.constant 0 : index
    %25 = vector.load %arg12[%c0_23, %c0_24, %c0_25] : memref<4x16x32xf32, #tpu.memory_space<vmem>>, vector<4x16x32xf32>
    %26 = vector.broadcast %15 : vector<4x16x1xf32> to vector<4x16x32xf32>
    %27 = arith.mulf %26, %25 : vector<4x16x32xf32>
    %28 = arith.truncf %18 : vector<4x16x16xf32> to vector<4x16x16xbf16>
    "tpu.trace_start"() <{level = 10 : i32, message = "hqk,hkd->hqd"}> : () -> ()
    %cst_26 = arith.constant dense<0.000000e+00> : vector<4x16x32xf32>
    %29 = tpu.matmul %28, %8, %cst_26 {dimension_numbers = #tpu.dot_dimension_numbers<[2], [1], [1], [2], [0, 0, 0, 1, 1, 2], [0], [0]>} : vector<4x16x16xbf16>, vector<4x16x32xbf16>, vector<4x16x32xf32> -> vector<4x16x32xf32>
    "tpu.trace_stop"() : () -> ()
    %30 = arith.addf %27, %29 : vector<4x16x32xf32>
    %c0_27 = arith.constant 0 : index
    %c0_28 = arith.constant 0 : index
    %c0_29 = arith.constant 0 : index
    %31 = vector.load %arg12[%c0_27, %c0_28, %c0_29] : memref<4x16x32xf32, #tpu.memory_space<vmem>>, vector<4x16x32xf32>
    tpu.vector_store %arg12[%c0_27, %c0_28, %c0_29], %30 {strides = array<i32>} : memref<4x16x32xf32, #tpu.memory_space<vmem>>, vector<4x16x32xf32>,
    %c0_30 = arith.constant 0 : index
    %c0_31 = arith.constant 0 : index
    %c0_32 = arith.constant 0 : index
    %32 = vector.load %arg10[%c0_30, %c0_31, %c0_32] : memref<4x16x1xf32, #tpu.memory_space<vmem>>, vector<4x16x1xf32>
    tpu.vector_store %arg10[%c0_30, %c0_31, %c0_32], %13 {strides = array<i32>} : memref<4x16x1xf32, #tpu.memory_space<vmem>>, vector<4x16x1xf32>,
    %c0_i32_33 = arith.constant 0 : i32
    %33 = arith.cmpi eq, %arg2, %c0_i32_33 : i32
    %34 = arith.extui %33 : i1 to i32
    %c0_i32_34 = arith.constant 0 : i32
    %35 = arith.cmpi ne, %34, %c0_i32_34 : i32
    scf.if %35 {
      %c0_35 = arith.constant 0 : index
      %c0_36 = arith.constant 0 : index
      %c0_37 = arith.constant 0 : index
      %36 = vector.load %arg12[%c0_35, %c0_36, %c0_37] : memref<4x16x32xf32, #tpu.memory_space<vmem>>, vector<4x16x32xf32>
      %c0_38 = arith.constant 0 : index
      %c0_39 = arith.constant 0 : index
      %c0_40 = arith.constant 0 : index
      %37 = vector.load %arg11[%c0_38, %c0_39, %c0_40] : memref<4x16x1xf32, #tpu.memory_space<vmem>>, vector<4x16x1xf32>
      %38 = tpu.reciprocal %37 {approx = true} : vector<4x16x1xf32> -> vector<4x16x1xf32>
      %39 = vector.broadcast %38 : vector<4x16x1xf32> to vector<4x16x32xf32>
      %40 = arith.mulf %36, %39 : vector<4x16x32xf32>
      %41 = arith.truncf %40 : vector<4x16x32xf32> to vector<4x16x32xbf16>
      %42 = vector.extract_strided_slice %41 {offsets = [0, 0, 0], sizes = [1, 16, 32], strides = [1, 1, 1]} : vector<4x16x32xbf16> to vector<1x16x32xbf16>
      %43 = vector.shape_cast %42 : vector<1x16x32xbf16> to vector<16x32xbf16>
      %c0_41 = arith.constant 0 : index
      %c0_42 = arith.constant 0 : index
      %44 = vector.load %arg13[%c0_41, %c0_42] : memref<16x128xbf16, #tpu.memory_space<vmem>>, vector<16x32xbf16>
      tpu.vector_store %arg13[%c0_41, %c0_42], %43 {strides = array<i32>} : memref<16x128xbf16, #tpu.memory_space<vmem>>, vector<16x32xbf16>,
      %45 = vector.extract_strided_slice %41 {offsets = [1, 0, 0], sizes = [1, 16, 32], strides = [1, 1, 1]} : vector<4x16x32xbf16> to vector<1x16x32xbf16>
      %46 = vector.shape_cast %45 : vector<1x16x32xbf16> to vector<16x32xbf16>
      %c0_43 = arith.constant 0 : index
      %c32 = arith.constant 32 : index
      %47 = vector.load %arg13[%c0_43, %c32] : memref<16x128xbf16, #tpu.memory_space<vmem>>, vector<16x32xbf16>
      tpu.vector_store %arg13[%c0_43, %c32], %46 {strides = array<i32>} : memref<16x128xbf16, #tpu.memory_space<vmem>>, vector<16x32xbf16>,
      %48 = vector.extract_strided_slice %41 {offsets = [2, 0, 0], sizes = [1, 16, 32], strides = [1, 1, 1]} : vector<4x16x32xbf16> to vector<1x16x32xbf16>
      %49 = vector.shape_cast %48 : vector<1x16x32xbf16> to vector<16x32xbf16>
      %c0_44 = arith.constant 0 : index
      %c64 = arith.constant 64 : index
      %50 = vector.load %arg13[%c0_44, %c64] : memref<16x128xbf16, #tpu.memory_space<vmem>>, vector<16x32xbf16>
      tpu.vector_store %arg13[%c0_44, %c64], %49 {strides = array<i32>} : memref<16x128xbf16, #tpu.memory_space<vmem>>, vector<16x32xbf16>,
      %51 = vector.extract_strided_slice %41 {offsets = [3, 0, 0], sizes = [1, 16, 32], strides = [1, 1, 1]} : vector<4x16x32xbf16> to vector<1x16x32xbf16>
      %52 = vector.shape_cast %51 : vector<1x16x32xbf16> to vector<16x32xbf16>
      %c0_45 = arith.constant 0 : index
      %c96 = arith.constant 96 : index
      %53 = vector.load %arg13[%c0_45, %c96] : memref<16x128xbf16, #tpu.memory_space<vmem>>, vector<16x32xbf16>
      tpu.vector_store %arg13[%c0_45, %c96], %52 {strides = array<i32>} : memref<16x128xbf16, #tpu.memory_space<vmem>>, vector<16x32xbf16>,
      %c0_46 = arith.constant 0 : index
      %c0_47 = arith.constant 0 : index
      %54 = vector.load %arg13[%c0_46, %c0_47] : memref<16x128xbf16, #tpu.memory_space<vmem>>, vector<16x128xbf16>
      %c0_48 = arith.constant 0 : index
      %c0_49 = arith.constant 0 : index
      %55 = vector.load %arg7[%c0_48, %c0_49] : memref<128x128xbf16, #tpu.memory_space<vmem>>, vector<128x128xbf16>
      %cst_50 = arith.constant dense<0.000000e+00> : vector<16x128xf32>
      %56 = tpu.matmul %54, %55, %cst_50 {dimension_numbers = #tpu.dot_dimension_numbers<[1], [0], [0], [1], [0, 0, 1, 1], [], []>} : vector<16x128xbf16>, vector<128x128xbf16>, vector<16x128xf32> -> vector<16x128xf32>
      %c0_51 = arith.constant 0 : index
      %c0_52 = arith.constant 0 : index
      %c0_53 = arith.constant 0 : index
      %57 = vector.load %arg3[%c0_51, %c0_52, %c0_53] : memref<1x16x128xf32, #tpu.memory_space<vmem>>, vector<1x16x128xf32>
      %58 = vector.shape_cast %57 : vector<1x16x128xf32> to vector<16x128xf32>
      %59 = arith.addf %58, %56 : vector<16x128xf32>
      %c0_54 = arith.constant 0 : index
      %c0_55 = arith.constant 0 : index
      %60 = vector.load %arg8[%c0_54, %c0_55] : memref<1x128xf32, #tpu.memory_space<vmem>>, vector<1x128xf32>
      %61 = vector.broadcast %60 : vector<1x128xf32> to vector<16x128xf32>
      %62 = arith.addf %59, %61 : vector<16x128xf32>
      %c0_56 = arith.constant 0 : index
      %c0_57 = arith.constant 0 : index
      %c0_58 = arith.constant 0 : index
      %63 = vector.load %arg9[%c0_56, %c0_57, %c0_58] : memref<1x16x128xf32, #tpu.memory_space<vmem>>, vector<1x16x128xf32>
      %64 = vector.shape_cast %63 : vector<1x16x128xf32> to vector<16x128xf32>
      %65 = vector.shape_cast %62 : vector<16x128xf32> to vector<1x16x128xf32>
      tpu.vector_store %arg9[%c0_56, %c0_57, %c0_58], %65 {strides = array<i32>} : memref<1x16x128xf32, #tpu.memory_space<vmem>>, vector<1x16x128xf32>,
    } else {
    }
    return
  }
  func.func @transform_0(%arg0: i32, %arg1: i32, %arg2: i32) -> (i32, i32, i32) {
    %c0_i32 = arith.constant 0 : i32
    %c0_i32_0 = arith.constant 0 : i32
    return %arg0, %arg1, %c0_i32 : i32, i32, i32
  }
  func.func @transform_1(%arg0: i32, %arg1: i32, %arg2: i32) -> (i32, i32, i32, i32) {
    %c0_i32 = arith.constant 0 : i32
    %c0_i32_0 = arith.constant 0 : i32
    %c0_i32_1 = arith.constant 0 : i32
    return %arg0, %c0_i32, %arg1, %c0_i32_0 : i32, i32, i32, i32
  }
  func.func @transform_2(%arg0: i32, %arg1: i32, %arg2: i32) -> (i32, i32, i32, i32) {
    %c0_i32 = arith.constant 0 : i32
    %c0_i32_0 = arith.constant 0 : i32
    %c0_i32_1 = arith.constant 0 : i32
    return %arg0, %c0_i32, %arg2, %c0_i32_0 : i32, i32, i32, i32
  }
  func.func @transform_3(%arg0: i32, %arg1: i32, %arg2: i32) -> (i32, i32, i32, i32) {
    %c0_i32 = arith.constant 0 : i32
    %c0_i32_0 = arith.constant 0 : i32
    %c0_i32_1 = arith.constant 0 : i32
    return %arg0, %c0_i32, %arg2, %c0_i32_0 : i32, i32, i32, i32
  }
  func.func @transform_4(%arg0: i32, %arg1: i32, %arg2: i32) -> (i32, i32) {
    %c0_i32 = arith.constant 0 : i32
    %c0_i32_0 = arith.constant 0 : i32
    %c0_i32_1 = arith.constant 0 : i32
    return %c0_i32, %c0_i32_0 : i32, i32
  }
  func.func @transform_5(%arg0: i32, %arg1: i32, %arg2: i32) -> (i32, i32) {
    %c0_i32 = arith.constant 0 : i32
    %c0_i32_0 = arith.constant 0 : i32
    %c0_i32_1 = arith.constant 0 : i32
    return %c0_i32, %c0_i32_0 : i32, i32
  }
  func.func @transform_6(%arg0: i32, %arg1: i32, %arg2: i32) -> (i32, i32, i32) {
    %c0_i32 = arith.constant 0 : i32
    %c0_i32_0 = arith.constant 0 : i32
    return %arg0, %arg1, %c0_i32 : i32, i32, i32
  }
}

module attributes {stable_mosaic.version = 11 : i64} {
  func.func @_ln_qkv_kernel(%arg0: i32, %arg1: i32, %arg2: memref<2xf32, #tpu.memory_space<smem>>, %arg3: memref<1x16x128xf32, #tpu.memory_space<vmem>>, %arg4: memref<128x384xbf16, #tpu.memory_space<vmem>>, %arg5: memref<1x384xf32, #tpu.memory_space<vmem>>, %arg6: memref<1x4x16x32xbf16, #tpu.memory_space<vmem>>, %arg7: memref<1x4x16x32xbf16, #tpu.memory_space<vmem>>, %arg8: memref<1x4x16x32xbf16, #tpu.memory_space<vmem>>) attributes {dimension_semantics = [#tpu.dimension_semantics<parallel>, #tpu.dimension_semantics<parallel>], iteration_bounds = array<i64: 2, 1>, scalar_prefetch = 0 : i64, scratch_operands = 0 : i64, tpu.core_type = #tpu.core_type<tc>, window_params = [{transform_indices = @transform_0, window_bounds = array<i64: 2>}, {transform_indices = @transform_1, window_bounds = array<i64: 1, 16, 128>}, {pipeline_mode = #tpu.pipeline_mode<synchronous>, transform_indices = @transform_2, window_bounds = array<i64: 128, 384>}, {pipeline_mode = #tpu.pipeline_mode<synchronous>, transform_indices = @transform_3, window_bounds = array<i64: 1, 384>}, {transform_indices = @transform_4, window_bounds = array<i64: 1, 4, 16, 32>}, {transform_indices = @transform_5, window_bounds = array<i64: 1, 4, 16, 32>}, {transform_indices = @transform_6, window_bounds = array<i64: 1, 4, 16, 32>}]} {
    %c0 = arith.constant 0 : index
    %c0_0 = arith.constant 0 : index
    %c0_1 = arith.constant 0 : index
    %0 = vector.load %arg3[%c0, %c0_0, %c0_1] : memref<1x16x128xf32, #tpu.memory_space<vmem>>, vector<1x16x128xf32>
    %1 = vector.shape_cast %0 : vector<1x16x128xf32> to vector<16x128xf32>
    %cst = arith.constant dense<0.000000e+00> : vector<16xf32>
    %2 = vector.multi_reduction <add>, %1, %cst [1] : vector<16x128xf32> to vector<16xf32>
    %3 = vector.shape_cast %2 : vector<16xf32> to vector<16x1xf32>
    %cst_2 = arith.constant 1.280000e+02 : f32
    %4 = vector.broadcast %cst_2 : f32 to vector<16x1xf32>
    %5 = arith.divf %3, %4 : vector<16x1xf32>
    %6 = vector.broadcast %5 : vector<16x1xf32> to vector<16x128xf32>
    %7 = arith.subf %1, %6 : vector<16x128xf32>
    %8 = arith.mulf %7, %7 : vector<16x128xf32>
    %cst_3 = arith.constant dense<0.000000e+00> : vector<16xf32>
    %9 = vector.multi_reduction <add>, %8, %cst_3 [1] : vector<16x128xf32> to vector<16xf32>
    %10 = vector.shape_cast %9 : vector<16xf32> to vector<16x1xf32>
    %cst_4 = arith.constant 0.00787401571 : f32
    %11 = vector.broadcast %cst_4 : f32 to vector<16x1xf32>
    %12 = arith.mulf %10, %11 : vector<16x1xf32>
    %13 = math.sqrt %12 : vector<16x1xf32>
    %cst_5 = arith.constant 9.99999997E-7 : f32
    %14 = vector.broadcast %cst_5 : f32 to vector<16x1xf32>
    %15 = arith.addf %13, %14 : vector<16x1xf32>
    %16 = tpu.reciprocal %15 {approx = true} : vector<16x1xf32> -> vector<16x1xf32>
    %c0_6 = arith.constant 0 : index
    %17 = memref.load %arg2[%c0_6] : memref<2xf32, #tpu.memory_space<smem>>
    %18 = vector.broadcast %5 : vector<16x1xf32> to vector<16x128xf32>
    %19 = arith.subf %1, %18 : vector<16x128xf32>
    %20 = vector.broadcast %16 : vector<16x1xf32> to vector<16x128xf32>
    %21 = arith.mulf %19, %20 : vector<16x128xf32>
    %22 = vector.broadcast %17 : f32 to vector<16x128xf32>
    %23 = arith.mulf %22, %21 : vector<16x128xf32>
    %c1 = arith.constant 1 : index
    %24 = memref.load %arg2[%c1] : memref<2xf32, #tpu.memory_space<smem>>
    %25 = vector.broadcast %24 : f32 to vector<16x128xf32>
    %26 = arith.addf %23, %25 : vector<16x128xf32>
    %27 = arith.truncf %26 : vector<16x128xf32> to vector<16x128xbf16>
    %c0_7 = arith.constant 0 : index
    %c0_8 = arith.constant 0 : index
    %28 = vector.load %arg4[%c0_7, %c0_8] : memref<128x384xbf16, #tpu.memory_space<vmem>>, vector<128x384xbf16>
    %cst_9 = arith.constant dense<0.000000e+00> : vector<16x384xf32>
    %29 = tpu.matmul %27, %28, %cst_9 {dimension_numbers = #tpu.dot_dimension_numbers<[1], [0], [0], [1], [0, 0, 1, 1], [], []>} : vector<16x128xbf16>, vector<128x384xbf16>, vector<16x384xf32> -> vector<16x384xf32>
    %c0_10 = arith.constant 0 : index
    %c0_11 = arith.constant 0 : index
    %30 = vector.load %arg5[%c0_10, %c0_11] : memref<1x384xf32, #tpu.memory_space<vmem>>, vector<1x384xf32>
    %31 = vector.broadcast %30 : vector<1x384xf32> to vector<16x384xf32>
    %32 = arith.addf %29, %31 : vector<16x384xf32>
    %33 = vector.extract_strided_slice %32 {offsets = [0, 0], sizes = [16, 32], strides = [1, 1]} : vector<16x384xf32> to vector<16x32xf32>
    %cst_12 = arith.constant 0.176776692 : f32
    %34 = vector.broadcast %cst_12 : f32 to vector<16x32xf32>
    %35 = arith.mulf %33, %34 : vector<16x32xf32>
    %36 = arith.truncf %35 : vector<16x32xf32> to vector<16x32xbf16>
    %c0_13 = arith.constant 0 : index
    %c0_14 = arith.constant 0 : index
    %c0_15 = arith.constant 0 : index
    %c0_16 = arith.constant 0 : index
    %37 = vector.load %arg6[%c0_13, %c0_14, %c0_15, %c0_16] : memref<1x4x16x32xbf16, #tpu.memory_space<vmem>>, vector<1x1x16x32xbf16>
    %38 = vector.shape_cast %37 : vector<1x1x16x32xbf16> to vector<16x32xbf16>
    %39 = vector.shape_cast %36 : vector<16x32xbf16> to vector<1x1x16x32xbf16>
    tpu.vector_store %arg6[%c0_13, %c0_14, %c0_15, %c0_16], %39 {strides = array<i32>} : memref<1x4x16x32xbf16, #tpu.memory_space<vmem>>, vector<1x1x16x32xbf16>,
    %40 = vector.extract_strided_slice %32 {offsets = [0, 128], sizes = [16, 32], strides = [1, 1]} : vector<16x384xf32> to vector<16x32xf32>
    %41 = arith.truncf %40 : vector<16x32xf32> to vector<16x32xbf16>
    %c0_17 = arith.constant 0 : index
    %c0_18 = arith.constant 0 : index
    %c0_19 = arith.constant 0 : index
    %c0_20 = arith.constant 0 : index
    %42 = vector.load %arg7[%c0_17, %c0_18, %c0_19, %c0_20] : memref<1x4x16x32xbf16, #tpu.memory_space<vmem>>, vector<1x1x16x32xbf16>
    %43 = vector.shape_cast %42 : vector<1x1x16x32xbf16> to vector<16x32xbf16>
    %44 = vector.shape_cast %41 : vector<16x32xbf16> to vector<1x1x16x32xbf16>
    tpu.vector_store %arg7[%c0_17, %c0_18, %c0_19, %c0_20], %44 {strides = array<i32>} : memref<1x4x16x32xbf16, #tpu.memory_space<vmem>>, vector<1x1x16x32xbf16>,
    %45 = vector.extract_strided_slice %32 {offsets = [0, 256], sizes = [16, 32], strides = [1, 1]} : vector<16x384xf32> to vector<16x32xf32>
    %46 = arith.truncf %45 : vector<16x32xf32> to vector<16x32xbf16>
    %c0_21 = arith.constant 0 : index
    %c0_22 = arith.constant 0 : index
    %c0_23 = arith.constant 0 : index
    %c0_24 = arith.constant 0 : index
    %47 = vector.load %arg8[%c0_21, %c0_22, %c0_23, %c0_24] : memref<1x4x16x32xbf16, #tpu.memory_space<vmem>>, vector<1x1x16x32xbf16>
    %48 = vector.shape_cast %47 : vector<1x1x16x32xbf16> to vector<16x32xbf16>
    %49 = vector.shape_cast %46 : vector<16x32xbf16> to vector<1x1x16x32xbf16>
    tpu.vector_store %arg8[%c0_21, %c0_22, %c0_23, %c0_24], %49 {strides = array<i32>} : memref<1x4x16x32xbf16, #tpu.memory_space<vmem>>, vector<1x1x16x32xbf16>,
    %50 = vector.extract_strided_slice %32 {offsets = [0, 32], sizes = [16, 32], strides = [1, 1]} : vector<16x384xf32> to vector<16x32xf32>
    %cst_25 = arith.constant 0.176776692 : f32
    %51 = vector.broadcast %cst_25 : f32 to vector<16x32xf32>
    %52 = arith.mulf %50, %51 : vector<16x32xf32>
    %53 = arith.truncf %52 : vector<16x32xf32> to vector<16x32xbf16>
    %c0_26 = arith.constant 0 : index
    %c1_27 = arith.constant 1 : index
    %c0_28 = arith.constant 0 : index
    %c0_29 = arith.constant 0 : index
    %54 = vector.load %arg6[%c0_26, %c1_27, %c0_28, %c0_29] : memref<1x4x16x32xbf16, #tpu.memory_space<vmem>>, vector<1x1x16x32xbf16>
    %55 = vector.shape_cast %54 : vector<1x1x16x32xbf16> to vector<16x32xbf16>
    %56 = vector.shape_cast %53 : vector<16x32xbf16> to vector<1x1x16x32xbf16>
    tpu.vector_store %arg6[%c0_26, %c1_27, %c0_28, %c0_29], %56 {strides = array<i32>} : memref<1x4x16x32xbf16, #tpu.memory_space<vmem>>, vector<1x1x16x32xbf16>,
    %57 = vector.extract_strided_slice %32 {offsets = [0, 160], sizes = [16, 32], strides = [1, 1]} : vector<16x384xf32> to vector<16x32xf32>
    %58 = arith.truncf %57 : vector<16x32xf32> to vector<16x32xbf16>
    %c0_30 = arith.constant 0 : index
    %c1_31 = arith.constant 1 : index
    %c0_32 = arith.constant 0 : index
    %c0_33 = arith.constant 0 : index
    %59 = vector.load %arg7[%c0_30, %c1_31, %c0_32, %c0_33] : memref<1x4x16x32xbf16, #tpu.memory_space<vmem>>, vector<1x1x16x32xbf16>
    %60 = vector.shape_cast %59 : vector<1x1x16x32xbf16> to vector<16x32xbf16>
    %61 = vector.shape_cast %58 : vector<16x32xbf16> to vector<1x1x16x32xbf16>
    tpu.vector_store %arg7[%c0_30, %c1_31, %c0_32, %c0_33], %61 {strides = array<i32>} : memref<1x4x16x32xbf16, #tpu.memory_space<vmem>>, vector<1x1x16x32xbf16>,
    %62 = vector.extract_strided_slice %32 {offsets = [0, 288], sizes = [16, 32], strides = [1, 1]} : vector<16x384xf32> to vector<16x32xf32>
    %63 = arith.truncf %62 : vector<16x32xf32> to vector<16x32xbf16>
    %c0_34 = arith.constant 0 : index
    %c1_35 = arith.constant 1 : index
    %c0_36 = arith.constant 0 : index
    %c0_37 = arith.constant 0 : index
    %64 = vector.load %arg8[%c0_34, %c1_35, %c0_36, %c0_37] : memref<1x4x16x32xbf16, #tpu.memory_space<vmem>>, vector<1x1x16x32xbf16>
    %65 = vector.shape_cast %64 : vector<1x1x16x32xbf16> to vector<16x32xbf16>
    %66 = vector.shape_cast %63 : vector<16x32xbf16> to vector<1x1x16x32xbf16>
    tpu.vector_store %arg8[%c0_34, %c1_35, %c0_36, %c0_37], %66 {strides = array<i32>} : memref<1x4x16x32xbf16, #tpu.memory_space<vmem>>, vector<1x1x16x32xbf16>,
    %67 = vector.extract_strided_slice %32 {offsets = [0, 64], sizes = [16, 32], strides = [1, 1]} : vector<16x384xf32> to vector<16x32xf32>
    %cst_38 = arith.constant 0.176776692 : f32
    %68 = vector.broadcast %cst_38 : f32 to vector<16x32xf32>
    %69 = arith.mulf %67, %68 : vector<16x32xf32>
    %70 = arith.truncf %69 : vector<16x32xf32> to vector<16x32xbf16>
    %c0_39 = arith.constant 0 : index
    %c2 = arith.constant 2 : index
    %c0_40 = arith.constant 0 : index
    %c0_41 = arith.constant 0 : index
    %71 = vector.load %arg6[%c0_39, %c2, %c0_40, %c0_41] : memref<1x4x16x32xbf16, #tpu.memory_space<vmem>>, vector<1x1x16x32xbf16>
    %72 = vector.shape_cast %71 : vector<1x1x16x32xbf16> to vector<16x32xbf16>
    %73 = vector.shape_cast %70 : vector<16x32xbf16> to vector<1x1x16x32xbf16>
    tpu.vector_store %arg6[%c0_39, %c2, %c0_40, %c0_41], %73 {strides = array<i32>} : memref<1x4x16x32xbf16, #tpu.memory_space<vmem>>, vector<1x1x16x32xbf16>,
    %74 = vector.extract_strided_slice %32 {offsets = [0, 192], sizes = [16, 32], strides = [1, 1]} : vector<16x384xf32> to vector<16x32xf32>
    %75 = arith.truncf %74 : vector<16x32xf32> to vector<16x32xbf16>
    %c0_42 = arith.constant 0 : index
    %c2_43 = arith.constant 2 : index
    %c0_44 = arith.constant 0 : index
    %c0_45 = arith.constant 0 : index
    %76 = vector.load %arg7[%c0_42, %c2_43, %c0_44, %c0_45] : memref<1x4x16x32xbf16, #tpu.memory_space<vmem>>, vector<1x1x16x32xbf16>
    %77 = vector.shape_cast %76 : vector<1x1x16x32xbf16> to vector<16x32xbf16>
    %78 = vector.shape_cast %75 : vector<16x32xbf16> to vector<1x1x16x32xbf16>
    tpu.vector_store %arg7[%c0_42, %c2_43, %c0_44, %c0_45], %78 {strides = array<i32>} : memref<1x4x16x32xbf16, #tpu.memory_space<vmem>>, vector<1x1x16x32xbf16>,
    %79 = vector.extract_strided_slice %32 {offsets = [0, 320], sizes = [16, 32], strides = [1, 1]} : vector<16x384xf32> to vector<16x32xf32>
    %80 = arith.truncf %79 : vector<16x32xf32> to vector<16x32xbf16>
    %c0_46 = arith.constant 0 : index
    %c2_47 = arith.constant 2 : index
    %c0_48 = arith.constant 0 : index
    %c0_49 = arith.constant 0 : index
    %81 = vector.load %arg8[%c0_46, %c2_47, %c0_48, %c0_49] : memref<1x4x16x32xbf16, #tpu.memory_space<vmem>>, vector<1x1x16x32xbf16>
    %82 = vector.shape_cast %81 : vector<1x1x16x32xbf16> to vector<16x32xbf16>
    %83 = vector.shape_cast %80 : vector<16x32xbf16> to vector<1x1x16x32xbf16>
    tpu.vector_store %arg8[%c0_46, %c2_47, %c0_48, %c0_49], %83 {strides = array<i32>} : memref<1x4x16x32xbf16, #tpu.memory_space<vmem>>, vector<1x1x16x32xbf16>,
    %84 = vector.extract_strided_slice %32 {offsets = [0, 96], sizes = [16, 32], strides = [1, 1]} : vector<16x384xf32> to vector<16x32xf32>
    %cst_50 = arith.constant 0.176776692 : f32
    %85 = vector.broadcast %cst_50 : f32 to vector<16x32xf32>
    %86 = arith.mulf %84, %85 : vector<16x32xf32>
    %87 = arith.truncf %86 : vector<16x32xf32> to vector<16x32xbf16>
    %c0_51 = arith.constant 0 : index
    %c3 = arith.constant 3 : index
    %c0_52 = arith.constant 0 : index
    %c0_53 = arith.constant 0 : index
    %88 = vector.load %arg6[%c0_51, %c3, %c0_52, %c0_53] : memref<1x4x16x32xbf16, #tpu.memory_space<vmem>>, vector<1x1x16x32xbf16>
    %89 = vector.shape_cast %88 : vector<1x1x16x32xbf16> to vector<16x32xbf16>
    %90 = vector.shape_cast %87 : vector<16x32xbf16> to vector<1x1x16x32xbf16>
    tpu.vector_store %arg6[%c0_51, %c3, %c0_52, %c0_53], %90 {strides = array<i32>} : memref<1x4x16x32xbf16, #tpu.memory_space<vmem>>, vector<1x1x16x32xbf16>,
    %91 = vector.extract_strided_slice %32 {offsets = [0, 224], sizes = [16, 32], strides = [1, 1]} : vector<16x384xf32> to vector<16x32xf32>
    %92 = arith.truncf %91 : vector<16x32xf32> to vector<16x32xbf16>
    %c0_54 = arith.constant 0 : index
    %c3_55 = arith.constant 3 : index
    %c0_56 = arith.constant 0 : index
    %c0_57 = arith.constant 0 : index
    %93 = vector.load %arg7[%c0_54, %c3_55, %c0_56, %c0_57] : memref<1x4x16x32xbf16, #tpu.memory_space<vmem>>, vector<1x1x16x32xbf16>
    %94 = vector.shape_cast %93 : vector<1x1x16x32xbf16> to vector<16x32xbf16>
    %95 = vector.shape_cast %92 : vector<16x32xbf16> to vector<1x1x16x32xbf16>
    tpu.vector_store %arg7[%c0_54, %c3_55, %c0_56, %c0_57], %95 {strides = array<i32>} : memref<1x4x16x32xbf16, #tpu.memory_space<vmem>>, vector<1x1x16x32xbf16>,
    %96 = vector.extract_strided_slice %32 {offsets = [0, 352], sizes = [16, 32], strides = [1, 1]} : vector<16x384xf32> to vector<16x32xf32>
    %97 = arith.truncf %96 : vector<16x32xf32> to vector<16x32xbf16>
    %c0_58 = arith.constant 0 : index
    %c3_59 = arith.constant 3 : index
    %c0_60 = arith.constant 0 : index
    %c0_61 = arith.constant 0 : index
    %98 = vector.load %arg8[%c0_58, %c3_59, %c0_60, %c0_61] : memref<1x4x16x32xbf16, #tpu.memory_space<vmem>>, vector<1x1x16x32xbf16>
    %99 = vector.shape_cast %98 : vector<1x1x16x32xbf16> to vector<16x32xbf16>
    %100 = vector.shape_cast %97 : vector<16x32xbf16> to vector<1x1x16x32xbf16>
    tpu.vector_store %arg8[%c0_58, %c3_59, %c0_60, %c0_61], %100 {strides = array<i32>} : memref<1x4x16x32xbf16, #tpu.memory_space<vmem>>, vector<1x1x16x32xbf16>,
    return
  }
  func.func @transform_0(%arg0: i32, %arg1: i32) -> i32 {
    %c0_i32 = arith.constant 0 : i32
    %c0_i32_0 = arith.constant 0 : i32
    return %c0_i32 : i32
  }
  func.func @transform_1(%arg0: i32, %arg1: i32) -> (i32, i32, i32) {
    %c0_i32 = arith.constant 0 : i32
    %c0_i32_0 = arith.constant 0 : i32
    return %arg0, %arg1, %c0_i32 : i32, i32, i32
  }
  func.func @transform_2(%arg0: i32, %arg1: i32) -> (i32, i32) {
    %c0_i32 = arith.constant 0 : i32
    %c0_i32_0 = arith.constant 0 : i32
    %c0_i32_1 = arith.constant 0 : i32
    return %c0_i32, %c0_i32_0 : i32, i32
  }
  func.func @transform_3(%arg0: i32, %arg1: i32) -> (i32, i32) {
    %c0_i32 = arith.constant 0 : i32
    %c0_i32_0 = arith.constant 0 : i32
    %c0_i32_1 = arith.constant 0 : i32
    return %c0_i32, %c0_i32_0 : i32, i32
  }
  func.func @transform_4(%arg0: i32, %arg1: i32) -> (i32, i32, i32, i32) {
    %c0_i32 = arith.constant 0 : i32
    %c0_i32_0 = arith.constant 0 : i32
    %c0_i32_1 = arith.constant 0 : i32
    return %arg0, %c0_i32, %arg1, %c0_i32_0 : i32, i32, i32, i32
  }
  func.func @transform_5(%arg0: i32, %arg1: i32) -> (i32, i32, i32, i32) {
    %c0_i32 = arith.constant 0 : i32
    %c0_i32_0 = arith.constant 0 : i32
    %c0_i32_1 = arith.constant 0 : i32
    return %arg0, %c0_i32, %arg1, %c0_i32_0 : i32, i32, i32, i32
  }
  func.func @transform_6(%arg0: i32, %arg1: i32) -> (i32, i32, i32, i32) {
    %c0_i32 = arith.constant 0 : i32
    %c0_i32_0 = arith.constant 0 : i32
    %c0_i32_1 = arith.constant 0 : i32
    return %arg0, %c0_i32, %arg1, %c0_i32_0 : i32, i32, i32, i32
  }
}

</mosaic_0001>

<bundles_post_ra>
// kernel: encoder_block.4
= control target key start
LH: loop header
LB: loop body
LE: loop exit
PB: predicated region body
PF: predicated region fallthrough
CT: control target
= control target key end

     0   :  { %s2154_s0 = inlined_call_operand.hbm [shape: f32[2,16,128], index: 0, kind: input, shape index: {}]   ;;  %s2155_s1 = inlined_call_operand.vmem [shape: bf16[2,4,16,32], index: 1, kind: input, shape index: {}]   ;;  %s2156_s2 = inlined_call_operand.vmem [shape: bf16[2,4,16,32], index: 2, kind: input, shape index: {}]   ;;  %s2157_s3 = inlined_call_operand.vmem [shape: bf16[2,4,16,32], index: 3, kind: input, shape index: {}]   ;;  %s2158_s4 = inlined_call_operand.hbm [shape: bf16[128,128], index: 4, kind: input, shape index: {}]   ;;  %s2159_s5 = inlined_call_operand.vmem [shape: f32[1,128], index: 5, kind: input, shape index: {}]   ;;  %s2160_s6 = inlined_call_operand.vmem [shape: f32[2,16,128], index: 6, kind: output, shape index: {}]  }
   0x1   :  { %2161 = sst [smem:[#allocation12_spill]] %s2158_s4 }
   0x2   :  { %11 = vsyncpa [#allocation7], 0 }
   0x3   :  { %13 = vsyncpa [#allocation7 + $0x1], 0 }
   0x4   :  { %14 = vsyncpa [#allocation9], 0  ;;  %s1804_s21 = smov 0   ;;  %s1806_s22 = smov 0  }
   0x5   :  { %s1808_s23 = smov 0   ;;  %s1810_s24 = smov 0  }
   0x6   :  { %s1812_s25 = smov 0   ;;  %s1814_s26 = smov 0  }
   0x7 LB: > { %s1375_s27 = sadd.s32 4294967295, %s1756_s26   ;;  %p61_p0 = scmp.ne.s32.totalorder %s1740_s22, %s1736_s21  ;;  %s1756_s26 = sphi %s1814_s26, %s20_s26   ;;  %s1752_s25 = sphi %s1812_s25, %s2172_s25   ;;  %s1748_s24 = sphi %s1810_s24, %s2171_s24   ;;  %s1744_s23 = sphi %s1808_s23, %s2170_s23   ;;  %s1740_s22 = sphi %s1806_s22, %s2169_s22   ;;  %s1736_s21 = sphi %s1804_s21, %s2168_s21  }
   0x8   : > { %p1834_p1 = scmp.eq.s32.totalorder %s1375_s27, 0  ;;  %p1377_p2 = scmp.ge.s32.totalorder %s1756_s26, 1 }
   0x9   : > { %p226_p3 = scmp.lt.s32.totalorder %s1756_s26, 3  ;;  %s2164_s4 = sld [smem:[#allocation12_spill]] }
   0xa   : > { %p1842_p4 = por %p1834_p1, %p61_p0  ;;  %s1758_s10 = smov [#allocation8]  }
   0xb   : > { %p1849_p5 = pnand %p1377_p2, %p226_p3  ;;  %s239_s11 = sshll.u32 %s1758_s10, 4  ;;  %s240_s11 = int_to_ptr.vmem [resolvable:$true] %s239_s11 }
   0xc   : > { %s1759_s12 = smov 64   ;;  %s1760_s13 = smov 4  }
   0xd   : > { %p1520_p6 = pneg %p1849_p5  ;;  %s39_s14 = sadd.s32 1, %s1752_s25 }
   0xe   : > { %p41_p8 = scmp.ge.s32.totalorder %s39_s14, 2  ;;  %s48_s15 = sadd.s32 1, %s1744_s23 }
   0xf   : > { %s237_s8 = sshll.u32 %s2164_s4, 4  ;;  %p1521_p7 = pnand %p1520_p6, %p1834_p1  ;;  %s238_s8 = int_to_ptr.hbm [resolvable:$true] %s237_s8 }
  0x10   : > { %p55_p9 = scmp.ne.s32.totalorder %s1744_s23, %s1740_s22  ;;  %p56_p10 = scmp.eq.s32.totalorder %s1756_s26, 0 }
  0x11   : > { %1523 = dma.hbm_to_vmem [thread:$0]  (!%p1521_p7), %s238_s8, 1024, %s240_s11, [#allocation9], %s1759_s12, %s1759_s12, %s1760_s13  }
  0x12   : > { %s2174_s14 = smov (%p41_p8, %s39_s14), 0  ;;  %p1864_p11 = por %p56_p10, %p55_p9 }
  0x13   : > { %p1529_p12 = scmp.lt.s32.totalorder %s1756_s26, 2  ;;  %s43_s17 = ssub.s32 %s1752_s25, %s2174_s14 }
  0x14   : > { %s256_s18 = sand.u32 1, %s1744_s23   ;;  %p46_p13 = scmp.eq.s32.totalorder %s43_s17, 0 }
  0x15   : > { %s1380_s19 = sshll.u32 %s256_s18, 4  ;;  %s1488_s20 = sshll.u32 %s1752_s25, 4 }
  0x16   : > { %s1874_s21 = scalar_select %p46_p13, %s1744_s23, %s48_s15  }
  0x17   : > { %s267_s7 = scalar_lea.hbm %s2154_s0, %s1488_s20  ;;  %s260_s10 = scalar_lea.vmem [#allocation6], %s1380_s19 }
  0x18   : > { %s268_s8 = sshll.u32 %s267_s7, 4  ;;  %s270_s11 = sshll.u32 %s260_s10, 4  ;;  %s269_s8 = int_to_ptr.hbm [resolvable:$true] %s268_s8  ;;  %s271_s11 = int_to_ptr.vmem [resolvable:$true] %s270_s11 }
  0x19   : > { %p1525_p0 = pnand %p1529_p12, %p1864_p11  ;;  %s257_s12 = scalar_lea.sflag [#allocation7], %s256_s18 }
  0x1a   : > { %s1761_s13 = smov 128   ;;  %s1762_s4 = smov 8  }
  0x1b   : > { %1527 = dma.hbm_to_vmem [thread:$0]  (!%p1525_p0), %s269_s8, 256, %s271_s11, %s257_s12, %s1761_s13, %s1761_s13, %s1762_s4  }
  0x1c   : > { %321 = sbr.rel (%p1849_p5) target bundleno = 991 (0x3df), region = 44  ;;  %s323_s15 = sand.u32 (!%p1849_p5), 1, %s1740_s22  }
  0x1d   : > { %s1886_s17 = sshll.u32 (!%p1849_p5), %s323_s15, 4  ;;  %s324_s19 = scalar_lea.sflag (!%p1849_p5), [#allocation7], %s323_s15 }
  0x1e   : > { %s327_s20 = scalar_lea.vmem (!%p1849_p5), [#allocation6], %s1886_s17 }
  0x21   : > { %1727 = dma.done.wait (%p1842_p4), %s324_s19, 256  }
  0x22   : > { %1729 = vsyncadd (%p1842_p4), %s324_s19, 4294967040 }
  0x23   : > { %1731 = dma.done.wait (%p1834_p1), [#allocation9], 1024  }
  0x24   : > { %1733 = vsyncadd (%p1834_p1), [#allocation9], 4294966272  ;;  %p395_p2 = scmp.lt.s32.totalorder %s1748_s24, 1  ;;  %vm456_vm0 = vcmask 261120   ;;  %vm439_vm1 = vcmask 7168   ;;  %vm618_vm2 = vcmask 130048  }
  0x25   : > { %v1763_v12 = vmov -1e+30   ;;  %v1764_v29 = vmov 0   ;;  %v1765_v30 = vmov 0.0   ;;  %s1766_s10 = smov 64   ;;  %s1767_s11 = smov 96  }
  0x26   : > { %s2176_s24 = smov (!%p395_p2, %s1748_s24), 1  ;;  %440 = vst.msk [vmem:[#allocation2] sm:$0xff] %vm439_vm1, %v1763_v12  ;;  %1591 = vset.pattern.permute.xlu2 %v1764_v29  ;;  %1590 = vset.pattern.permute.xlu0 %v1764_v29  ;;  %s1768_s12 = smov 32   ;;  %vm1079_vm3 = vcmask 257024   ;;  %vm1090_vm4 = vcmask 519424   ;;  %vm1101_vm5 = vcmask 781824  }
  0x27   : > { %s1902_s4 = sshll.u32 %s2176_s24, 5  ;;  %441 = vst.msk [vmem:[#allocation2 + $0x8] sm:$0xff] %vm439_vm1, %v1763_v12  ;;  %1592 = vset.pattern.permute.xlu1 %v1764_v29  ;;  %vm1112_vm6 = vcmask 1044224   ;;  %s1492_s13 = sshll.u32 %s2176_s24, 4 }
  0x28   : > { %s412_s29 = scalar_lea.vmem %s2156_s2, %s1902_s4  ;;  %s402_s27 = scalar_lea.vmem %s2155_s1, %s1902_s4  ;;  %442 = vst.msk [vmem:[#allocation2 + $0x10] sm:$0xff] %vm439_vm1, %v1763_v12 }
  0x29   : > { %v1497_v0 = vld [vmem:[%s412_s29] sm:$0xff]  ;;  %v1499_v1 = vld [vmem:[%s412_s29 + $0x10] sm:$0xff]  ;;  %v1500_v2 = vld [vmem:[%s412_s29 + $0x18] sm:$0xff]  ;;  %443 = vst.msk [vmem:[#allocation2 + $0x18] sm:$0xff] %vm439_vm1, %v1763_v12  ;;  %s422_s8 = scalar_lea.vmem %s2157_s3, %s1902_s4  ;;  %s432_s16 = scalar_lea.vmem %s2160_s6, %s1492_s13 }
  0x2a   : > { %v504_v3 = vsel %vm456_vm0, %v1497_v0, 0  ;;  %v564_v4 = vsel %vm456_vm0, %v1499_v1, 0  ;;  %v594_v5 = vsel %vm456_vm0, %v1500_v2, 0  ;;  %v1498_v6 = vld [vmem:[%s412_s29 + $0x8] sm:$0xff]  ;;  %v1493_v8 = vld [vmem:[%s402_s27] sm:$0xff]  ;;  %v1495_v9 = vld [vmem:[%s402_s27 + $0x10] sm:$0xff] }
  0x2b   : > { %513 = vmatpush.bf16.xpose.msra.mxu1 %v504_v3  ;;  %573 = vmatpush.bf16.xpose.msra.mxu2 %v564_v4  ;;  %v534_v7 = vsel %vm456_vm0, %v1498_v6, 0  ;;  %v1496_v10 = vld [vmem:[%s402_s27 + $0x18] sm:$0xff]  ;;  %v1494_v11 = vld [vmem:[%s402_s27 + $0x8] sm:$0xff]  ;;  %444 = vst.msk [vmem:[#allocation2 + $0x20] sm:$0xff] %vm439_vm1, %v1763_v12 }
  0x2c   : > { %603 = vmatpush.bf16.xpose.msra.mxu3 %v594_v5  ;;  %445 = vst.msk [vmem:[#allocation2 + $0x28] sm:$0xff] %vm439_vm1, %v1763_v12 }
  0x2d   : > { %446 = vst.msk [vmem:[#allocation2 + $0x30] sm:$0xff] %vm439_vm1, %v1763_v12  ;;  %v1976_v31 = vld [vmem:[#allocation2] sm:$0xff] }
  0x2e   : > { %447 = vst.msk [vmem:[#allocation2 + $0x38] sm:$0xff] %vm439_vm1, %v1763_v12  ;;  %v1989_v38 = vld [vmem:[#allocation2 + $0x8] sm:$0xff]  ;;  %v1504_v12 = vld [vmem:[%s422_s8 + $0x18] sm:$0xff] }
  0x2f   : > { %459 = vst.msk [vmem:[#allocation4 + $0x10] sm:$0xff] %vm456_vm0, %v1765_v30  ;;  %v612_v50 = vld [vmem:[#allocation2 + $0x10] sm:$0xff] }
  0x30   : > { %448 = vst.msk [vmem:[#allocation3] sm:$0xff] %vm439_vm1, %v1765_v30  ;;  %v2035_v58 = vld [vmem:[#allocation2 + $0x18] sm:$0xff] }
  0x31   : > { %449 = vst.msk [vmem:[#allocation3 + $0x8] sm:$0xff] %vm439_vm1, %v1765_v30 }
  0x32   : > { %1402 = vmatmul.msk.bf16.vlgmr.msra.gmra.mxu1 %vm456_vm0, %v1493_v8  ;;  %1420 = vmatmul.msk.bf16.vlgmr.msra.gmra.mxu2 %vm456_vm0, %v1495_v9  ;;  %450 = vst.msk [vmem:[#allocation3 + $0x10] sm:$0xff] %vm439_vm1, %v1765_v30  ;;  %v1985_v35 = vld [vmem:[#allocation2 + $0x20] sm:$0xff]  ;;  %v1503_v9 = vld [vmem:[%s422_s8 + $0x10] sm:$0xff] }
  0x33   : > { %543 = vmatpush.bf16.xpose.msrb.mxu1 %v534_v7  ;;  %1429 = vmatmul.msk.bf16.vlgmr.msra.gmra.mxu3 %vm456_vm0, %v1496_v10  ;;  %451 = vst.msk [vmem:[#allocation3 + $0x18] sm:$0xff] %vm439_vm1, %v1765_v30  ;;  %v2014_v47 = vld [vmem:[#allocation2 + $0x28] sm:$0xff] }
  0x34   : > { %452 = vst.msk [vmem:[#allocation3 + $0x20] sm:$0xff] %vm439_vm1, %v1765_v30  ;;  %v1987_v36 = vld [vmem:[#allocation2 + $0x30] sm:$0xff]  ;;  %937 = vmatpush.bf16.msrb.mxu2 %v1503_v9  ;;  %965 = vmatpush.bf16.msrb.mxu3 %v1504_v12 }
  0x35   : > { %453 = vst.msk [vmem:[#allocation3 + $0x28] sm:$0xff] %vm439_vm1, %v1765_v30  ;;  %v2016_v48 = vld [vmem:[#allocation2 + $0x38] sm:$0xff] }
  0x36   : > { %454 = vst.msk [vmem:[#allocation3 + $0x30] sm:$0xff] %vm439_vm1, %v1765_v30 }
  0x37   : > { %455 = vst.msk [vmem:[#allocation3 + $0x38] sm:$0xff] %vm439_vm1, %v1765_v30 }
  0x38   : > { %457 = vst.msk [vmem:[#allocation4] sm:$0xff] %vm456_vm0, %v1765_v30 }
  0x39   : > { %458 = vst.msk [vmem:[#allocation4 + $0x8] sm:$0xff] %vm456_vm0, %v1765_v30 }
  0x3a   : > { %460 = vst.msk [vmem:[#allocation4 + $0x18] sm:$0xff] %vm456_vm0, %v1765_v30 }
  0x3b   : > { %461 = vst.msk [vmem:[#allocation4 + $0x20] sm:$0xff] %vm456_vm0, %v1765_v30 }
  0x3c   : > { %462 = vst.msk [vmem:[#allocation4 + $0x28] sm:$0xff] %vm456_vm0, %v1765_v30 }
  0x3d   : > { %463 = vst.msk [vmem:[#allocation4 + $0x30] sm:$0xff] %vm456_vm0, %v1765_v30 }
  0x3e   : > { %464 = vst.msk [vmem:[#allocation4 + $0x38] sm:$0xff] %vm456_vm0, %v1765_v30 }
  0x42   : > { %1411 = vmatmul.msk.bf16.vlgmr.msrb.gmra.mxu1 %vm456_vm0, %v1494_v11 }
  0xaf   : > { %v1925_v13 = vpop.f32.mrf.mxu1 }
  0xb0   : > { %v619_v14 = vsel %vm618_vm2, %v1925_v13, -inf }
  0xb1   : > { %620 = vmax.xlane.f32.xlu2 %v619_v14 }
  0xb5   : > { %v1932_v15 = vpop.f32.mrf.mxu2 }
  0xb6   : > { %v1934_v16 = vpop.f32.mrf.mxu3  ;;  %v631_v17 = vsel %vm618_vm2, %v1932_v15, -inf }
  0xb7   : > { %v637_v18 = vsel %vm618_vm2, %v1934_v16, -inf  ;;  %632 = vmax.xlane.f32.xlu0 %v631_v17  ;;  %v1940_v19 = vpop.f32.mrf.mxu1  ;;  %v1502_v17 = vld [vmem:[%s422_s8 + $0x8] sm:$0xff] }
  0xb8   : > { %638 = vmax.xlane.f32.xlu1 %v637_v18  ;;  %v622_v20 = vsel %vm618_vm2, %v1940_v19, -inf  ;;  %909 = vmatpush.bf16.msra.mxu1 %v1502_v17 }
  0xb9   : > { %623 = vmax.xlane.f32.xlu2 %v622_v20 }
  0xbd   : > { %v1944_v21 = vpop.f32.mrf.mxu2 }
  0xbe   : > { %v1946_v22 = vpop.f32.mrf.mxu3  ;;  %v634_v23 = vsel %vm618_vm2, %v1944_v21, -inf }
  0xbf   : > { %v640_v24 = vsel %vm618_vm2, %v1946_v22, -inf  ;;  %635 = vmax.xlane.f32.xlu0 %v634_v23  ;;  %v1952_v25 = vpop.f32.mrf.mxu1 }
  0xc0   : > { %641 = vmax.xlane.f32.xlu1 %v640_v24  ;;  %v625_v26 = vsel %vm618_vm2, %v1952_v25, -inf }
  0xc1   : > { %626 = vmax.xlane.f32.xlu2 %v625_v26 }
  0xc7   : > { %v1956_v27 = vpop.f32.mrf.mxu1 }
  0xc8   : > { %v628_v28 = vsel %vm618_vm2, %v1956_v27, -inf }
  0xc9   : > { %629 = vmax.xlane.f32.xlu2 %v628_v28  ;;  %v1501_v28 = vld [vmem:[%s422_s8] sm:$0xff] }
  0xca   : > { %881 = vmatpush.bf16.msra.mxu0 %v1501_v28 }
 0x124   : > { %v621_v32 = vpop.xlane.xlu2 %620 }
 0x125   : > { %v1979_v33 = vmax.f32 %v1976_v31, %v621_v32 }
 0x127   : > { %v651_v34 = vsub.f32 %v1976_v31, %v1979_v33  ;;  %988 = vst.msk [vmem:[#allocation2] sm:$0xff] %vm439_vm1, %v1979_v33 }
 0x12a   : > { %v633_v37 = vpop.xlane.xlu0 %632 }
 0x12b   : > { %v639_v39 = vpop.xlane.xlu1 %638  ;;  %v1992_v40 = vmax.f32 %v1985_v35, %v633_v37 }
 0x12c   : > { %v1995_v41 = vmax.f32 %v1987_v36, %v639_v39  ;;  %v624_v42 = vpop.xlane.xlu2 %623 }
 0x12d   : > { %v655_v43 = vsub.f32 %v1985_v35, %v1992_v40  ;;  %992 = vst.msk [vmem:[#allocation2 + $0x20] sm:$0xff] %vm439_vm1, %v1992_v40  ;;  %v2002_v44 = vmax.f32 %v1989_v38, %v624_v42  ;;  %697 = vperm.xlu0 %1590, %v1992_v40  }
 0x12e   : > { %v657_v45 = vsub.f32 %v1987_v36, %v1995_v41  ;;  %994 = vst.msk [vmem:[#allocation2 + $0x30] sm:$0xff] %vm439_vm1, %v1995_v41  ;;  %707 = vperm.xlu2 %1591, %v1995_v41   ;;  %v739_v36 = vld [vmem:[#allocation3] sm:$0xff] }
 0x12f   : > { %v652_v46 = vsub.f32 %v1989_v38, %v2002_v44  ;;  %989 = vst.msk [vmem:[#allocation2 + $0x8] sm:$0xff] %vm439_vm1, %v2002_v44 }
 0x132   : > { %v636_v49 = vpop.xlane.xlu0 %635 }
 0x133   : > { %v642_v51 = vpop.xlane.xlu1 %641  ;;  %v2019_v52 = vmax.f32 %v2014_v47, %v636_v49 }
 0x134   : > { %v2022_v53 = vmax.f32 %v2016_v48, %v642_v51  ;;  %v627_v54 = vpop.xlane.xlu2 %626 }
 0x135   : > { %v656_v55 = vsub.f32 %v2014_v47, %v2019_v52  ;;  %993 = vst.msk [vmem:[#allocation2 + $0x28] sm:$0xff] %vm439_vm1, %v2019_v52  ;;  %v645_v56 = vmax.f32 %v612_v50, %v627_v54  ;;  %702 = vperm.xlu1 %1592, %v2019_v52  }
 0x136   : > { %v658_v57 = vsub.f32 %v2016_v48, %v2022_v53  ;;  %995 = vst.msk [vmem:[#allocation2 + $0x38] sm:$0xff] %vm439_vm1, %v2022_v53  ;;  %677 = vperm.xlu2 %1591, %v1979_v33   ;;  %v671_v48 = vmul.f32 1.442695, %v657_v45 }
 0x137   : > { %990 = vst.msk [vmem:[#allocation2 + $0x10] sm:$0xff] %vm439_vm1, %v645_v56  ;;  %v653_v62 = vsub.f32 %v612_v50, %v645_v56 }
 0x138   : > { %v673_v47 = vmul.f32 1.442695, %v658_v57 }
 0x139   : > { %v663_v63 = vmul.f32 1.442695, %v653_v62 }
 0x13b   : > { %1594 = vpow2.f32 %v663_v63 }
 0x13c   : > { %v630_v59 = vpop.xlane.xlu2 %629 }
 0x13d   : > { %v2038_v60 = vmax.f32 %v2035_v58, %v630_v59  ;;  %712 = vperm.xlu1 %1592, %v2022_v53  }
 0x13f   : > { %v654_v61 = vsub.f32 %v2035_v58, %v2038_v60  ;;  %991 = vst.msk [vmem:[#allocation2 + $0x18] sm:$0xff] %vm439_vm1, %v2038_v60  ;;  %692 = vperm.xlu0 %1590, %v2038_v60  }
 0x141   : > { %v2047_v0 = vpop.eup %1594 }
 0x145   : > { %687 = vperm.xlu1 %1592, %v645_v56  }
 0x14d   : > { %682 = vperm.xlu1 %1592, %v2002_v44  }
 0x155   : > { %816 = vperm.xlu1 %1592, %v2047_v0  }
 0x188   : > { %v708_v1 = vpop.permute.xlu2 %707 }
 0x189   : > { %v721_v2 = vsub.f32 %v1934_v16, %v708_v1 }
 0x18b   : > { %v735_v3 = vmul.f32 1.442695, %v721_v2 }
 0x18d   : > { %1596 = vpow2.f32 %v735_v3 }
 0x190   : > { %v678_v4 = vpop.permute.xlu2 %677 }
 0x191   : > { %v715_v5 = vsub.f32 %v1925_v13, %v678_v4 }
 0x193   : > { %v1597_v6 = vpop.eup %1596  ;;  %v723_v7 = vmul.f32 1.442695, %v715_v5 }
 0x194   : > { %v773_v8 = vsel %vm618_vm2, %v1597_v6, 0.0 }
 0x195   : > { %1598 = vpow2.f32 %v723_v7  ;;  %774 = vadd.xlane.f32.xlu0 %v773_v8 }
 0x19b   : > { %v2057_v10 = vpop.eup %1598 }
 0x19c   : > { %v755_v11 = vsel %vm618_vm2, %v2057_v10, 0.0 }
 0x19d   : > { %756 = vadd.xlane.f32.xlu2 %v755_v11 }
 0x19f   : > { %v698_v13 = vpop.permute.xlu0 %697 }
 0x1a0   : > { %v719_v14 = vsub.f32 %v1932_v15, %v698_v13 }
 0x1a2   : > { %v731_v16 = vmul.f32 1.442695, %v719_v14 }
 0x1a4   : > { %1600 = vpow2.f32 %v731_v16 }
 0x1a7   : > { %v703_v18 = vpop.permute.xlu1 %702 }
 0x1a8   : > { %v720_v20 = vsub.f32 %v1944_v21, %v703_v18  ;;  %v852_v18 = vpack.c.bf16 %v2057_v10, %v2057_v10  ;;  %v659_v10 = vmul.f32 1.442695, %v651_v34 }
 0x1aa   : > { %v1601_v23 = vpop.eup %1600  ;;  %v733_v24 = vmul.f32 1.442695, %v720_v20  ;;  %v862_v28 = vunpack.c.l.b16 %v852_v18 }
 0x1ab   : > { %v767_v26 = vsel %vm618_vm2, %v1601_v23, 0.0  ;;  %v856_v32 = vpack.c.bf16 %v1601_v23, %v1601_v23  ;;  %v665_v23 = vmul.f32 1.442695, %v654_v61  ;;  %v667_v61 = vmul.f32 1.442695, %v655_v43 }
 0x1ac   : > { %1602 = vpow2.f32 %v733_v24  ;;  %768 = vadd.xlane.f32.xlu1 %v767_v26 }
 0x1ad   : > { %v918_v51 = vunpack.c.l.b16 %v856_v32  ;;  %v745_v32 = vld [vmem:[#allocation3 + $0x30] sm:$0xff] }
 0x1af   : > { %v713_v29 = vpop.permute.xlu1 %712 }
 0x1b0   : > { %v722_v30 = vsub.f32 %v1946_v22, %v713_v29  ;;  %v858_v22 = vpack.c.bf16 %v1597_v6, %v1597_v6 }
 0x1b1   : > { %v693_v15 = vpop.permute.xlu0 %692 }
 0x1b2   : > { %v1603_v37 = vpop.eup %1602  ;;  %v737_v39 = vmul.f32 1.442695, %v722_v30  ;;  %v718_v42 = vsub.f32 %v1956_v27, %v693_v15  ;;  %v946_v4 = vunpack.c.l.b16 %v858_v22 }
 0x1b3   : > { %v857_v49 = vpack.c.bf16 %v1603_v37, %v1603_v37  ;;  %v770_v21 = vsel %vm618_vm2, %v1603_v37, 0.0 }
 0x1b4   : > { %1604 = vpow2.f32 %v737_v39  ;;  %v729_v50 = vmul.f32 1.442695, %v718_v42  ;;  %771 = vadd.xlane.f32.xlu2 %v770_v21  ;;  %v743_v42 = vld [vmem:[#allocation3 + $0x20] sm:$0xff] }
 0x1b5   : > { %v919_v54 = vunpack.c.l.b16 %v857_v49  ;;  %v744_v49 = vld [vmem:[#allocation3 + $0x28] sm:$0xff] }
 0x1b6   : > { %1606 = vpow2.f32 %v729_v50 }
 0x1b7   : > { %v688_v56 = vpop.permute.xlu1 %687  ;;  %v920_v59 = vpack.c.b16 %v919_v54, %v918_v51 }
 0x1b8   : > { %v717_v62 = vsub.f32 %v1952_v25, %v688_v56  ;;  %v746_v56 = vld [vmem:[#allocation3 + $0x38] sm:$0xff] }
 0x1b9   : > { %1444 = vmatmul.msk.bf16.vlgmr.msrb.gmra.mxu2 %vm618_vm2, %v920_v59  ;;  %v742_v59 = vld [vmem:[#allocation3 + $0x18] sm:$0xff] }
 0x1ba   : > { %v1605_v63 = vpop.eup %1604  ;;  %v727_v1 = vmul.f32 1.442695, %v717_v62 }
 0x1bb   : > { %v859_v2 = vpack.c.bf16 %v1605_v63, %v1605_v63  ;;  %v776_v27 = vsel %vm618_vm2, %v1605_v63, 0.0 }
 0x1bc   : > { %v1607_v3 = vpop.eup %1606  ;;  %1608 = vpow2.f32 %v727_v1  ;;  %777 = vadd.xlane.f32.xlu1 %v776_v27  ;;  %v661_v27 = vmul.f32 1.442695, %v652_v46 }
 0x1bd   : > { %v947_v5 = vunpack.c.l.b16 %v859_v2  ;;  %v764_v7 = vsel %vm618_vm2, %v1607_v3, 0.0  ;;  %v855_v6 = vpack.c.bf16 %v1607_v3, %v1607_v3 }
 0x1be   : > { %765 = vadd.xlane.f32.xlu2 %v764_v7 }
 0x1bf   : > { %v683_v8 = vpop.permute.xlu1 %682  ;;  %v948_v9 = vpack.c.b16 %v947_v5, %v946_v4  ;;  %v891_v14 = vunpack.c.l.b16 %v855_v6 }
 0x1c0   : > { %v716_v25 = vsub.f32 %v1940_v19, %v683_v8  ;;  %v669_v19 = vmul.f32 1.442695, %v656_v55  ;;  %v740_v8 = vld [vmem:[#allocation3 + $0x8] sm:$0xff] }
 0x1c1   : > { %1449 = vmatmul.msk.bf16.vlgmr.msrb.gmra.mxu3 %vm618_vm2, %v948_v9 }
 0x1c2   : > { %v1609_v11 = vpop.eup %1608  ;;  %v725_v12 = vmul.f32 1.442695, %v716_v25 }
 0x1c3   : > { %v854_v13 = vpack.c.bf16 %v1609_v11, %v1609_v11  ;;  %v761_v52 = vsel %vm618_vm2, %v1609_v11, 0.0 }
 0x1c4   : > { %1610 = vpow2.f32 %v725_v12 }
 0x1c5   : > { %v890_v16 = vunpack.c.l.b16 %v854_v13  ;;  %1612 = vpow2.f32 %v669_v19  ;;  %v801_v19 = vld [vmem:[#allocation4 + $0x28] sm:$0xff] }
 0x1c6   : > { %1614 = vpow2.f32 %v665_v23 }
 0x1c7   : > { %v892_v17 = vpack.c.b16 %v891_v14, %v890_v16  ;;  %1616 = vpow2.f32 %v673_v47  ;;  %v817_v39 = vpop.permute.xlu1 %816  ;;  %v798_v16 = vld [vmem:[#allocation4 + $0x10] sm:$0xff]  ;;  %v803_v47 = vld [vmem:[#allocation4 + $0x38] sm:$0xff] }
 0x1c8   : > { %1618 = vpow2.f32 %v667_v61 }
 0x1c9   : > { %1439 = vmatmul.msk.bf16.vlgmr.msra.gmra.mxu1 %vm618_vm2, %v892_v17  ;;  %1620 = vpow2.f32 %v671_v48  ;;  %v741_v17 = vld [vmem:[#allocation3 + $0x10] sm:$0xff]  ;;  %v799_v48 = vld [vmem:[#allocation4 + $0x18] sm:$0xff] }
 0x1ca   : > { %v1611_v20 = vpop.eup %1610  ;;  %1622 = vpow2.f32 %v659_v10 }
 0x1cb   : > { %v758_v24 = vsel %vm618_vm2, %v1611_v20, 0.0  ;;  %v853_v26 = vpack.c.bf16 %v1611_v20, %v1611_v20  ;;  %v1613_v55 = vpop.eup %1612  ;;  %v846_v20 = vmul.f32 %v817_v39, %v798_v16 }
 0x1cc   : > { %759 = vadd.xlane.f32.xlu0 %v758_v24  ;;  %v1615_v58 = vpop.eup %1614  ;;  %v752_v21 = vmul.f32 %v1613_v55, %v744_v49  ;;  %v749_v24 = vmul.f32 %v2047_v0, %v741_v17 }
 0x1cd   : > { %v863_v29 = vunpack.c.l.b16 %v853_v26  ;;  %v1617_v60 = vpop.eup %1616  ;;  %v750_v2 = vmul.f32 %v1615_v58, %v742_v59 }
 0x1ce   : > { %v1619_v53 = vpop.eup %1618  ;;  %v754_v62 = vmul.f32 %v1617_v60, %v746_v56 }
 0x1cf   : > { %v864_v30 = vpack.c.b16 %v863_v29, %v862_v28  ;;  %v1621_v57 = vpop.eup %1620  ;;  %v751_v31 = vmul.f32 %v1619_v53, %v743_v42 }
 0x1d0   : > { %v753_v15 = vmul.f32 %v1621_v57, %v745_v32  ;;  %v2098_v43 = vpop.eup %1622 }
 0x1d1   : > { %1434 = vmatmul.msk.bf16.vlgmr.msra.gmra.mxu0 %vm618_vm2, %v864_v30  ;;  %v747_v41 = vmul.f32 %v2098_v43, %v739_v36 }
 0x1d4   : > { %762 = vadd.xlane.f32.xlu0 %v761_v52 }
 0x1d5   : > { %831 = vperm.xlu1 %1592, %v1613_v55  }
 0x1d6   : > { %821 = vperm.xlu2 %1591, %v1615_v58  }
 0x1de   : > { %841 = vperm.xlu2 %1591, %v1617_v60  }
 0x1e8   : > { %826 = vperm.xlu0 %1590, %v1619_v53  }
 0x1f0   : > { %836 = vperm.xlu0 %1590, %v1621_v57  }
 0x208   : > { %v775_v35 = vpop.xlane.xlu0 %774 }
 0x209   : > { %v785_v40 = vadd.f32 %v775_v35, %v753_v15 }
 0x20b   : > { %794 = vst.msk [vmem:[#allocation3 + $0x30] sm:$0xff] %vm439_vm1, %v785_v40 }
 0x210   : > { %v757_v45 = vpop.xlane.xlu2 %756 }
 0x211   : > { %v779_v37 = vadd.f32 %v757_v45, %v747_v41  ;;  %v800_v45 = vld [vmem:[#allocation4 + $0x20] sm:$0xff] }
 0x212   : > { %v1013_v13 = vld [vmem:[#allocation3 + $0x30] sm:$0xff] }
 0x213   : > { %788 = vst.msk [vmem:[#allocation3] sm:$0xff] %vm439_vm1, %v779_v37 }
 0x21a   : > { %v1007_v38 = vld [vmem:[#allocation3] sm:$0xff] }
 0x21f   : > { %v769_v33 = vpop.xlane.xlu1 %768 }
 0x220   : > { %v783_v34 = vadd.f32 %v769_v33, %v751_v31  ;;  %v802_v33 = vld [vmem:[#allocation4 + $0x30] sm:$0xff] }
 0x222   : > { %792 = vst.msk [vmem:[#allocation3 + $0x20] sm:$0xff] %vm439_vm1, %v783_v34 }
 0x227   : > { %v772_v50 = vpop.xlane.xlu2 %771 }
 0x228   : > { %v784_v51 = vadd.f32 %v772_v50, %v752_v21 }
 0x229   : > { %v1011_v54 = vld [vmem:[#allocation3 + $0x20] sm:$0xff] }
 0x22a   : > { %793 = vst.msk [vmem:[#allocation3 + $0x28] sm:$0xff] %vm439_vm1, %v784_v51  ;;  %1624 = vrcp.f32 %v1011_v54 }
 0x22b   : > { %1626 = vpow2.f32 %v661_v27 }
 0x22f   : > { %v778_v22 = vpop.xlane.xlu1 %777 }
 0x230   : > { %v1625_v63 = vpop.eup %1624  ;;  %v786_v1 = vadd.f32 %v778_v22, %v754_v62 }
 0x231   : > { %1045 = vperm.xlu2 %1591, %v1625_v63   ;;  %v766_v3 = vpop.xlane.xlu2 %765  ;;  %v1627_v7 = vpop.eup %1626  ;;  %v1012_v36 = vld [vmem:[#allocation3 + $0x28] sm:$0xff] }
 0x232   : > { %795 = vst.msk [vmem:[#allocation3 + $0x38] sm:$0xff] %vm439_vm1, %v786_v1  ;;  %v782_v4 = vadd.f32 %v766_v3, %v750_v2  ;;  %v748_v6 = vmul.f32 %v1627_v7, %v740_v8 }
 0x234   : > { %791 = vst.msk [vmem:[#allocation3 + $0x18] sm:$0xff] %vm439_vm1, %v782_v4 }
 0x239   : > { %v1014_v5 = vld [vmem:[#allocation3 + $0x38] sm:$0xff]  ;;  %v822_v25 = vpop.permute.xlu2 %821 }
 0x23a   : > { %1628 = vrcp.f32 %v1014_v5  ;;  %v847_v10 = vmul.f32 %v822_v25, %v799_v48  ;;  %v1513_v48 = vld [vmem:[#allocation8 + $0x38] sm:$0xff] }
 0x23b   : > { %v1010_v9 = vld [vmem:[#allocation3 + $0x18] sm:$0xff]  ;;  %1187 = vmatpush.bf16.msrb.mxu0 %v1513_v48 }
 0x23c   : > { %1630 = vrcp.f32 %v1010_v9  ;;  %v939_v11 = vpop.f32.mrf.mxu2 }
 0x23d   : > { %1632 = vrcp.f32 %v1007_v38 }
 0x23e   : > { %1634 = vrcp.f32 %v1013_v13 }
 0x23f   : > { %v760_v12 = vpop.xlane.xlu0 %759 }
 0x240   : > { %v1629_v44 = vpop.eup %1628  ;;  %v780_v46 = vadd.f32 %v760_v12, %v748_v6  ;;  %v797_v6 = vld [vmem:[#allocation4 + $0x8] sm:$0xff] }
 0x241   : > { %1060 = vperm.xlu2 %1591, %v1629_v44   ;;  %v842_v52 = vpop.permute.xlu2 %841 }
 0x242   : > { %v1631_v14 = vpop.eup %1630  ;;  %789 = vst.msk [vmem:[#allocation3 + $0x8] sm:$0xff] %vm439_vm1, %v780_v46  ;;  %v851_v57 = vmul.f32 %v842_v52, %v803_v47 }
 0x243   : > { %1040 = vperm.xlu0 %1590, %v1631_v14   ;;  %v1633_v30 = vpop.eup %1632 }
 0x244   : > { %v967_v18 = vpop.f32.mrf.mxu3  ;;  %v941_v60 = vpop.f32.mrf.mxu2 }
 0x245   : > { %v1635_v61 = vpop.eup %1634 }
 0x246   : > { %v911_v23 = vpop.f32.mrf.mxu1 }
 0x247   : > { %v974_v26 = vadd.f32 %v911_v23, %v846_v20  ;;  %v763_v28 = vpop.xlane.xlu0 %762  ;;  %v832_v29 = vpop.permute.xlu1 %831  ;;  %v796_v23 = vld [vmem:[#allocation4] sm:$0xff] }
 0x248   : > { %v781_v55 = vadd.f32 %v763_v28, %v749_v24  ;;  %v849_v58 = vmul.f32 %v832_v29, %v801_v19 }
 0x249   : > { %982 = vst.msk [vmem:[#allocation4 + $0x10] sm:$0xff] %vm456_vm0, %v974_v26  ;;  %1025 = vperm.xlu2 %1591, %v1633_v30   ;;  %v1008_v50 = vld [vmem:[#allocation3 + $0x8] sm:$0xff] }
 0x24a   : > { %790 = vst.msk [vmem:[#allocation3 + $0x10] sm:$0xff] %vm439_vm1, %v781_v55  ;;  %v977_v53 = vadd.f32 %v941_v60, %v849_v58 }
 0x24b   : > { %1055 = vperm.xlu0 %1590, %v1635_v61  }
 0x24c   : > { %985 = vst.msk [vmem:[#allocation4 + $0x28] sm:$0xff] %vm456_vm0, %v977_v53  ;;  %v969_v0 = vpop.f32.mrf.mxu3  ;;  %v1512_v53 = vld [vmem:[#allocation8 + $0x30] sm:$0xff] }
 0x24d   : > { %v979_v32 = vadd.f32 %v969_v0, %v851_v57  ;;  %1188 = vmatpush.bf16.msrb.mxu0 %v1512_v53  ;;  %v1511_v57 = vld [vmem:[#allocation8 + $0x28] sm:$0xff] }
 0x24e   : > { %v913_v15 = vpop.f32.mrf.mxu1  ;;  %v883_v5 = vpop.f32.mrf.mxu0 }
 0x24f   : > { %987 = vst.msk [vmem:[#allocation4 + $0x38] sm:$0xff] %vm456_vm0, %v979_v32  ;;  %v975_v35 = vadd.f32 %v913_v15, %v847_v10  ;;  %v1510_v10 = vld [vmem:[#allocation8 + $0x20] sm:$0xff]  ;;  %v1509_v32 = vld [vmem:[#allocation8 + $0x18] sm:$0xff]  ;;  %v1508_v15 = vld [vmem:[#allocation8 + $0x10] sm:$0xff] }
 0x250   : > { %v1001_v46 = vld [vmem:[#allocation4 + $0x10] sm:$0xff] }
 0x251   : > { %983 = vst.msk [vmem:[#allocation4 + $0x18] sm:$0xff] %vm456_vm0, %v975_v35  ;;  %v1009_v40 = vld [vmem:[#allocation3 + $0x10] sm:$0xff]  ;;  %1189 = vmatpush.bf16.msrb.mxu0 %v1511_v57 }
 0x252   : > { %1636 = vrcp.f32 %v1009_v40  ;;  %v1507_v35 = vld [vmem:[#allocation8 + $0x8] sm:$0xff]  ;;  %v1506_v40 = vld [vmem:[#allocation8] sm:$0xff] }
 0x253   : > { %811 = vperm.xlu0 %1590, %v1627_v7   ;;  %1638 = vrcp.f32 %v1012_v36  ;;  %v1004_v17 = vld [vmem:[#allocation4 + $0x28] sm:$0xff] }
 0x254   : > { %1640 = vrcp.f32 %v1008_v50  ;;  %v1202_v50 = vld [vmem:[%s327_s20 + $0x8] sm:$0xff] }
 0x255   : > { %1190 = vmatpush.bf16.msrb.mxu0 %v1510_v10 }
 0x256   : > { %v1006_v22 = vld [vmem:[#allocation4 + $0x38] sm:$0xff]  ;;  %v885_v38 = vpop.f32.mrf.mxu0 }
 0x258   : > { %v1637_v41 = vpop.eup %1636  ;;  %v1002_v3 = vld [vmem:[#allocation4 + $0x18] sm:$0xff] }
 0x259   : > { %1035 = vperm.xlu1 %1592, %v1637_v41   ;;  %v1639_v31 = vpop.eup %1638  ;;  %1191 = vmatpush.bf16.msrb.mxu0 %v1509_v32 }
 0x25a   : > { %v827_v37 = vpop.permute.xlu0 %826  ;;  %v1641_v51 = vpop.eup %1640 }
 0x25b   : > { %v848_v39 = vmul.f32 %v827_v37, %v800_v45 }
 0x25d   : > { %v976_v42 = vadd.f32 %v939_v11, %v848_v39  ;;  %1192 = vmatpush.bf16.msrb.mxu0 %v1508_v15 }
 0x25f   : > { %984 = vst.msk [vmem:[#allocation4 + $0x20] sm:$0xff] %vm456_vm0, %v976_v42 }
 0x261   : > { %1050 = vperm.xlu1 %1592, %v1639_v31   ;;  %1193 = vmatpush.bf16.msrb.mxu0 %v1507_v35  ;;  %v1201_v31 = vld [vmem:[%s327_s20] sm:$0xff] }
 0x262   : > { %v837_v34 = vpop.permute.xlu0 %836 }
 0x263   : > { %v850_v49 = vmul.f32 %v837_v34, %v802_v33  ;;  %v1593_v33 = vld [vmem:[%s2159_s5] ss:$0 sm:$0xff] }
 0x265   : > { %v978_v21 = vadd.f32 %v967_v18, %v850_v49  ;;  %1194 = vmatpush.bf16.msrb.mxu0 %v1506_v40 }
 0x266   : > { %v1003_v54 = vld [vmem:[#allocation4 + $0x20] sm:$0xff] }
 0x267   : > { %986 = vst.msk [vmem:[#allocation4 + $0x30] sm:$0xff] %vm456_vm0, %v978_v21 }
 0x269   : > { %806 = vperm.xlu1 %1592, %v2098_v43  }
 0x26e   : > { %v1005_v7 = vld [vmem:[#allocation4 + $0x30] sm:$0xff] }
 0x271   : > { %1030 = vperm.xlu1 %1592, %v1641_v51  }
 0x28b   : > { %v1046_v56 = vpop.permute.xlu2 %1045 }
 0x28c   : > { %v1067_v59 = vmul.f32 %v1046_v56, %v1003_v54 }
 0x28e   : > { %v1075_v62 = vpack.c.bf16 %v1067_v59, %v1067_v59 }
 0x290   : > { %1095 = vrot.lane.b32.xlu1 %v1075_v62, %s1766_s10 }
 0x29b   : > { %v1061_v63 = vpop.permute.xlu2 %1060 }
 0x29c   : > { %v1070_v1 = vmul.f32 %v1061_v63, %v1006_v22 }
 0x29e   : > { %v1078_v2 = vpack.c.bf16 %v1070_v1, %v1070_v1 }
 0x2a0   : > { %1108 = vrot.lane.b32.xlu1 %v1078_v2, %s1767_s11 }
 0x2a3   : > { %v1026_v55 = vpop.permute.xlu2 %1025 }
 0x2b5   : > { %v1041_v27 = vpop.permute.xlu0 %1040 }
 0x2b6   : > { %v1066_v4 = vmul.f32 %v1041_v27, %v1002_v3 }
 0x2b8   : > { %v1074_v43 = vpack.c.bf16 %v1066_v4, %v1066_v4 }
 0x2ba   : > { %1086 = vrot.lane.b32.xlu2 %v1074_v43, %s1768_s12 }
 0x2bd   : > { %v1056_v8 = vpop.permute.xlu0 %1055 }
 0x2be   : > { %v1069_v9 = vmul.f32 %v1056_v8, %v1005_v7 }
 0x2c0   : > { %v1077_v25 = vpack.c.bf16 %v1069_v9, %v1069_v9 }
 0x2c2   : > { %1106 = vrot.lane.b32.xlu2 %v1077_v25, %s1767_s11 }
 0x2c5   : > { %v812_v11 = vpop.permute.xlu0 %811 }
 0x2c6   : > { %v845_v12 = vmul.f32 %v812_v11, %v797_v6 }
 0x2c8   : > { %v973_v44 = vadd.f32 %v885_v38, %v845_v12 }
 0x2ca   : > { %981 = vst.msk [vmem:[#allocation4 + $0x8] sm:$0xff] %vm456_vm0, %v973_v44 }
 0x2cb   : > { %v1036_v13 = vpop.permute.xlu1 %1035 }
 0x2cc   : > { %v1065_v14 = vmul.f32 %v1036_v13, %v1001_v46 }
 0x2ce   : > { %v1073_v16 = vpack.c.bf16 %v1065_v14, %v1065_v14 }
 0x2d0   : > { %1084 = vrot.lane.b32.xlu0 %v1073_v16, %s1768_s12 }
 0x2d1   : > { %v1000_v29 = vld [vmem:[#allocation4 + $0x8] sm:$0xff] }
 0x2d3   : > { %v1051_v18 = vpop.permute.xlu1 %1050 }
 0x2d4   : > { %v1068_v20 = vmul.f32 %v1051_v18, %v1004_v17 }
 0x2d6   : > { %v1076_v19 = vpack.c.bf16 %v1068_v20, %v1068_v20 }
 0x2d8   : > { %1097 = vrot.lane.b32.xlu0 %v1076_v19, %s1766_s10 }
 0x2db   : > { %v807_v24 = vpop.permute.xlu1 %806 }
 0x2dc   : > { %v844_v26 = vmul.f32 %v807_v24, %v796_v23 }
 0x2de   : > { %v972_v28 = vadd.f32 %v883_v5, %v844_v26 }
 0x2e0   : > { %980 = vst.msk [vmem:[#allocation4] sm:$0xff] %vm456_vm0, %v972_v28 }
 0x2e3   : > { %v1031_v30 = vpop.permute.xlu1 %1030 }
 0x2e4   : > { %v1064_v47 = vmul.f32 %v1031_v30, %v1000_v29 }
 0x2e6   : > { %v1072_v52 = vpack.c.bf16 %v1064_v47, %v1064_v47 }
 0x2e7   : > { %v999_v58 = vld [vmem:[#allocation4] sm:$0xff] }
 0x2e8   : > { %1081 = vst.msk [vmem:[#allocation5 + $0x4] sm:$0xf] %vm1079_vm3, %v1072_v52  ;;  %v1063_v60 = vmul.f32 %v1026_v55, %v999_v58 }
 0x2ea   : > { %v1071_v61 = vpack.c.bf16 %v1063_v60, %v1063_v60 }
 0x2ec   : > { %1080 = vst.msk [vmem:[#allocation5] sm:$0xf] %vm1079_vm3, %v1071_v61 }
 0x302   : > { %v1096_v41 = vpop.permute.xlu1 %1095 }
 0x312   : > { %v1109_v39 = vpop.permute.xlu1 %1108 }
 0x314   : > { %v1087_v0 = vpop.permute.xlu2 %1086 }
 0x315   : > { %1092 = vst.msk [vmem:[#allocation5 + $0x4] sm:$0xf] %vm1090_vm4, %v1087_v0 }
 0x31c   : > { %v1107_v45 = vpop.permute.xlu2 %1106 }
 0x342   : > { %v1085_v36 = vpop.permute.xlu0 %1084 }
 0x343   : > { %1091 = vst.msk [vmem:[#allocation5] sm:$0xf] %vm1090_vm4, %v1085_v36 }
 0x344   : > { %1102 = vst.msk [vmem:[#allocation5] sm:$0xf] %vm1101_vm5, %v1096_v41 }
 0x345   : > { %1113 = vst.msk [vmem:[#allocation5] sm:$0xf] %vm1112_vm6, %v1107_v45 }
 0x34a   : > { %v1098_v37 = vpop.permute.xlu0 %1097 }
 0x34b   : > { %1103 = vst.msk [vmem:[#allocation5 + $0x4] sm:$0xf] %vm1101_vm5, %v1098_v37 }
 0x34c   : > { %1114 = vst.msk [vmem:[#allocation5 + $0x4] sm:$0xf] %vm1112_vm6, %v1109_v39 }
 0x353   : > { %v1505_v42 = vld [vmem:[#allocation5] sm:$0xff] }
 0x354   : > { %1195 = vmatmul.bf16.vlgmr.msrb.gmra.mxu0 %v1505_v42 }
 0x3d1   : > { %v1196_v34 = vpop.f32.mrf.mxu0 }
 0x3d2   : > { %v1203_v49 = vadd.f32 %v1201_v31, %v1196_v34 }
 0x3d4   : > { %v1209_v21 = vadd.f32 %v1593_v33, %v1203_v49 }
 0x3d6   : > { %1211 = vst [vmem:[%s432_s16] sm:$0xff] %v1209_v21 }
 0x3d9   : > { %v1198_v51 = vpop.f32.mrf.mxu0 }
 0x3da   : > { %v1204_v54 = vadd.f32 %v1202_v50, %v1198_v51 }
 0x3dc   : > { %v1210_v56 = vadd.f32 %v1593_v33, %v1204_v54 }
 0x3de   : > { %1212 = vst [vmem:[%s432_s16 + $0x8] sm:$0xff] %v1210_v56 }
 0x3df PF: > { %s20_s26 = sadd.s32 1, %s1756_s26   ;;  %s2167_s24 = smov %s1874_s21 }
 0x3e0   : > { %p17_p1 = scmp.ge.s32.totalorder %s20_s26, 4   ;;  %s2168_s21 = smov %s1740_s22 }
 0x3e1   : > { %s2169_s22 = smov %s1744_s23  ;;  %s2170_s23 = smov %s2167_s24 }
 0x3e2   : > { %s2171_s24 = smov %s1752_s25  ;;  %s2172_s25 = smov %s2174_s14 }
 0x3e3   :  { %19 = sbr.rel (!%p17_p1) target bundleno = 7 (0x7), region = 105 }
 0x3e8   :  { %1243 = vsyncpa [#allocation7], 1 }
 0x3e9   :  { %1245 = vsyncpa [#allocation7 + $0x1], 1 }
 0x3ea   :  { %1246 = vsyncpa [#allocation9], 1 }

// kernel: encoder_block.3
= control target key start
LH: loop header
LB: loop body
LE: loop exit
PB: predicated region body
PF: predicated region fallthrough
CT: control target
= control target key end

     0   :  { %12 = vsyncpa [#allocation4], 0  ;;  %s1682_s0 = inlined_call_operand.vmem [shape: f32[2], index: 0, kind: input, shape index: {}]   ;;  %s1683_s1 = inlined_call_operand.hbm [shape: f32[2,16,128], index: 1, kind: input, shape index: {}]   ;;  %s1684_s2 = inlined_call_operand.hbm [shape: bf16[128,384], index: 2, kind: input, shape index: {}]   ;;  %s1685_s3 = inlined_call_operand.hbm [shape: f32[1,384], index: 3, kind: input, shape index: {}]   ;;  %s1686_s4 = inlined_call_operand.vmem [shape: bf16[2,4,16,32], index: 4, kind: output, shape index: {0}]   ;;  %s1687_s5 = inlined_call_operand.vmem [shape: bf16[2,4,16,32], index: 5, kind: output, shape index: {1}]   ;;  %s1688_s6 = inlined_call_operand.vmem [shape: bf16[2,4,16,32], index: 6, kind: output, shape index: {2}]  }
   0x1   :  { %13 = vsyncpa [#allocation3], 0 }
   0x2   :  { %15 = vsyncpa [#allocation3 + $0x1], 0 }
   0x3   :  { %16 = vsyncpa [#allocation7], 0  ;;  %s1477_s21 = smov 0   ;;  %s1479_s22 = smov 0  }
   0x4   :  { %s1481_s23 = smov 0   ;;  %s1483_s24 = smov 0  }
   0x5   :  { %s1485_s25 = smov 0   ;;  %s1487_s26 = smov 0  }
   0x6 LB: > { %s996_s27 = sadd.s32 4294967295, %s1429_s26   ;;  %p77_p0 = scmp.ne.s32.totalorder %s1413_s22, %s1409_s21  ;;  %s1429_s26 = sphi %s1487_s26, %s22_s26   ;;  %s1425_s25 = sphi %s1485_s25, %s1696_s25   ;;  %s1421_s24 = sphi %s1483_s24, %s1695_s24   ;;  %s1417_s23 = sphi %s1481_s23, %s1694_s23   ;;  %s1413_s22 = sphi %s1479_s22, %s1693_s22   ;;  %s1409_s21 = sphi %s1477_s21, %s1692_s21  }
   0x7   : > { %p1507_p1 = scmp.eq.s32.totalorder %s996_s27, 0  ;;  %p998_p2 = scmp.ge.s32.totalorder %s1429_s26, 1 }
   0x8   : > { %p214_p3 = scmp.lt.s32.totalorder %s1429_s26, 3  ;;  %s235_s8 = sshll.u32 %s1684_s2, 4  ;;  %s236_s8 = int_to_ptr.hbm [resolvable:$true] %s235_s8 }
   0x9   : > { %p1515_p4 = por %p1507_p1, %p77_p0  ;;  %s1431_s10 = smov [#allocation6]  }
   0xa   : > { %p1522_p5 = pnand %p998_p2, %p214_p3  ;;  %s237_s11 = sshll.u32 %s1431_s10, 4  ;;  %s238_s11 = int_to_ptr.vmem [resolvable:$true] %s237_s11 }
   0xb   : > { %s226_s14 = sshll.u32 %s1682_s0, 4  ;;  %s1432_s15 = smov 192   ;;  %s227_s14 = int_to_ptr.vmem [resolvable:$true] %s226_s14 }
   0xc   : > { %p1176_p6 = pneg %p1522_p5  ;;  %s1433_s16 = smov 12  }
   0xd   : > { %s1434_s17 = smov [#allocation2]   ;;  %s250_s20 = sshll.u32 %s1685_s3, 4  ;;  %s251_s20 = int_to_ptr.hbm [resolvable:$true] %s250_s20 }
   0xe   : > { %p1177_p7 = pnand %p1176_p6, %p1507_p1  ;;  %s1435_s21 = smov [#allocation8]  }
   0xf   : > { %s252_s27 = sshll.u32 %s1435_s21, 4  ;;  %s64_s30 = sadd.s32 1, %s1417_s23  ;;  %s253_s27 = int_to_ptr.vmem [resolvable:$true] %s252_s27 }
  0x10   : > { %1182 = dma.hbm_to_vmem [thread:$0]  (!%p1177_p7), %s236_s8, 3072, %s238_s11, [#allocation7], %s1432_s15, %s1432_s15, %s1433_s16  }
  0x11   : > { %1179 = dma.vmem_to_smem (!%p1177_p7), %s227_s14, 16, %s1434_s17, [#allocation4]  }
  0x12   : > { %1185 = dma.hbm_to_vmem [thread:$0]  (!%p1177_p7), %s251_s20, 48, %s253_s27, [#allocation7]  }
  0x13   : > { %s34_s7 = sadd.s32 1, %s1425_s25  ;;  %p71_p8 = scmp.ne.s32.totalorder %s1417_s23, %s1413_s22 }
  0x14   : > { %p36_p9 = scmp.ge.s32.totalorder %s34_s7, 2  ;;  %p72_p10 = scmp.eq.s32.totalorder %s1429_s26, 0 }
  0x15   : > { %p1193_p11 = scmp.lt.s32.totalorder %s1429_s26, 2  ;;  %s263_s8 = sand.u32 1, %s1417_s23  }
  0x16   : > { %s1698_s7 = smov (%p36_p9, %s34_s7), 0  ;;  %p73_p12 = por %p72_p10, %p71_p8 }
  0x17   : > { %s59_s10 = ssub.s32 %s1425_s25, %s1698_s7  ;;  %s1003_s11 = sshll.u32 %s263_s8, 4 }
  0x18   : > { %p62_p13 = scmp.eq.s32.totalorder %s59_s10, 0  ;;  %s1134_s12 = sshll.u32 %s1425_s25, 4 }
  0x19   : > { %s267_s13 = scalar_lea.vmem [#allocation5], %s1003_s11  ;;  %s274_s18 = scalar_lea.hbm %s1683_s1, %s1134_s12 }
  0x1a   : > { %s277_s14 = sshll.u32 %s267_s13, 4  ;;  %s275_s19 = sshll.u32 %s274_s18, 4  ;;  %s278_s14 = int_to_ptr.vmem [resolvable:$true] %s277_s14  ;;  %s276_s19 = int_to_ptr.hbm [resolvable:$true] %s275_s19 }
  0x1b   : > { %s1549_s15 = scalar_select %p62_p13, %s1417_s23, %s64_s30  }
  0x1c   : > { %p1187_p0 = pnand %p1193_p11, %p73_p12  ;;  %s264_s20 = scalar_lea.sflag [#allocation3], %s263_s8 }
  0x1d   : > { %s1436_s21 = smov 128   ;;  %s1437_s27 = smov 8  }
  0x1e   : > { %1189 = dma.hbm_to_vmem [thread:$0]  (!%p1187_p0), %s276_s19, 256, %s278_s14, %s264_s20, %s1436_s21, %s1436_s21, %s1437_s27  }
  0x1f   : > { %289 = sbr.rel (%p1522_p5) target bundleno = 618 (0x26a), region = 36 }
  0x24   : > { %1396 = dma.done.wait (%p1507_p1), [#allocation4], 16  }
  0x25   : > { %1398 = vsyncadd (%p1507_p1), [#allocation4], 4294967280  ;;  %s296_s30 = sand.u32 1, %s1413_s22  }
  0x26   : > { %s1008_s10 = sshll.u32 %s296_s30, 4  ;;  %s297_s11 = scalar_lea.sflag [#allocation3], %s296_s30 }
  0x27   : > { %s300_s12 = scalar_lea.vmem [#allocation5], %s1008_s10 }
  0x28   : > { %1400 = dma.done.wait (%p1515_p4), %s297_s11, 256  }
  0x29   : > { %1402 = vsyncadd (%p1515_p4), %s297_s11, 4294967040 }
  0x2a   : > { %1404 = dma.done.wait (%p1507_p1), [#allocation7], 3120  }
  0x2b   : > { %1406 = vsyncadd (%p1507_p1), [#allocation7], 4294964176 }
  0x2c   : > { %316 = sfence }
  0x2d   : > { %v394_v0 = vld [vmem:[%s300_s12] sm:$0xff]  ;;  %v395_v1 = vld [vmem:[%s300_s12 + $0x8] sm:$0xff]  ;;  %v1438_v2 = vmov 128.0   ;;  %s447_s28 = sld [smem:[#allocation2]]  ;;  %p365_p1 = scmp.lt.s32.totalorder %s1421_s24, 1  ;;  %vm672_vm5 = vcmask 257024  }
  0x2e   : > { %396 = vadd.xlane.f32.xlu0 %v394_v0  ;;  %1256 = vrcp.f32 %v1438_v2  ;;  %v1104_v17 = vld [vmem:[#allocation6 + $0xa8] sm:$0xf]  ;;  %v1160_v18 = vld [vmem:[#allocation6 + $0xb0] sm:$0xf0]  ;;  %v1159_v19 = vld [vmem:[#allocation6 + $0xac] sm:$0xf] }
  0x2f   : > { %v1105_v20 = vor.u32 %v1160_v18, %v1104_v17  ;;  %v1106_v21 = vld [vmem:[#allocation6 + $0xb4] sm:$0xf0]  ;;  %v1112_v22 = vld [vmem:[#allocation6 + $0xb0] sm:$0xf]  ;;  %v1161_v23 = vld [vmem:[#allocation6 + $0xb8] sm:$0xf0] }
  0x30   : > { %v1109_v24 = vor.u32 %v1159_v19, %v1106_v21  ;;  %v1113_v25 = vor.u32 %v1161_v23, %v1112_v22  ;;  %v1092_v26 = vld [vmem:[#allocation6 + $0x90] sm:$0xf]  ;;  %v1157_v27 = vld [vmem:[#allocation6 + $0x98] sm:$0xf0]  ;;  %v1156_v28 = vld [vmem:[#allocation6 + $0x94] sm:$0xf] }
  0x31   : > { %626 = vmatpush.bf16.msra.mxu0 %v1105_v20  ;;  %v1093_v29 = vor.u32 %v1157_v27, %v1092_v26  ;;  %v1094_v30 = vld [vmem:[#allocation6 + $0x9c] sm:$0xf0]  ;;  %v1100_v31 = vld [vmem:[#allocation6 + $0x98] sm:$0xf]  ;;  %v1158_v32 = vld [vmem:[#allocation6 + $0xa0] sm:$0xf0] }
  0x32   : > { %640 = vmatpush.bf16.msra.mxu1 %v1109_v24  ;;  %654 = vmatpush.bf16.msra.mxu2 %v1113_v25  ;;  %v1097_v33 = vor.u32 %v1156_v28, %v1094_v30  ;;  %v1101_v34 = vor.u32 %v1158_v32, %v1100_v31  ;;  %v1080_v35 = vld [vmem:[#allocation6 + $0x78] sm:$0xf]  ;;  %v1154_v36 = vld [vmem:[#allocation6 + $0x80] sm:$0xf0]  ;;  %v1153_v37 = vld [vmem:[#allocation6 + $0x7c] sm:$0xf] }
  0x33   : > { %v1081_v38 = vor.u32 %v1154_v36, %v1080_v35  ;;  %v1082_v39 = vld [vmem:[#allocation6 + $0x84] sm:$0xf0]  ;;  %v1088_v40 = vld [vmem:[#allocation6 + $0x80] sm:$0xf]  ;;  %v1155_v41 = vld [vmem:[#allocation6 + $0x88] sm:$0xf0] }
  0x34   : > { %v1257_v3 = vpop.eup %1256  ;;  %v1085_v42 = vor.u32 %v1153_v37, %v1082_v39  ;;  %v1089_v43 = vor.u32 %v1155_v41, %v1088_v40  ;;  %v1068_v44 = vld [vmem:[#allocation6 + $0x60] sm:$0xf]  ;;  %v1151_v45 = vld [vmem:[#allocation6 + $0x68] sm:$0xf0]  ;;  %v1150_v46 = vld [vmem:[#allocation6 + $0x64] sm:$0xf] }
  0x35   : > { %v401_v4 = vmul.f32 128.0, %v1257_v3  ;;  %vm405_vm0 = vweird.f32 %v1257_v3  ;;  %627 = vmatpush.bf16.msra.mxu0 %v1093_v29  ;;  %v1069_v47 = vor.u32 %v1151_v45, %v1068_v44  ;;  %v1070_v48 = vld [vmem:[#allocation6 + $0x6c] sm:$0xf0]  ;;  %v1076_v49 = vld [vmem:[#allocation6 + $0x68] sm:$0xf]  ;;  %s1017_s29 = sld [smem:[#allocation2 + $0x1]] }
  0x36   : > { %398 = vadd.xlane.f32.xlu0 %v395_v1  ;;  %641 = vmatpush.bf16.msra.mxu1 %v1097_v33  ;;  %v1152_v50 = vld [vmem:[#allocation6 + $0x70] sm:$0xf0]  ;;  %v1073_v51 = vor.u32 %v1150_v46, %v1070_v48  ;;  %v1056_v53 = vld [vmem:[#allocation6 + $0x48] sm:$0xf]  ;;  %v1147_v55 = vld [vmem:[#allocation6 + $0x4c] sm:$0xf] }
  0x37   : > { %v402_v5 = vsub.f32 1.0, %v401_v4  ;;  %655 = vmatpush.bf16.msra.mxu2 %v1101_v34  ;;  %v1077_v52 = vor.u32 %v1152_v50, %v1076_v49  ;;  %v1148_v54 = vld [vmem:[#allocation6 + $0x50] sm:$0xf0]  ;;  %v1058_v56 = vld [vmem:[#allocation6 + $0x54] sm:$0xf0]  ;;  %s1700_s24 = smov (!%p365_p1, %s1421_s24), 1 }
  0x38   : > { %v1064_v57 = vld [vmem:[#allocation6 + $0x50] sm:$0xf]  ;;  %v1149_v58 = vld [vmem:[#allocation6 + $0x58] sm:$0xf0]  ;;  %v1057_v59 = vor.u32 %v1148_v54, %v1056_v53  ;;  %v1061_v60 = vor.u32 %v1147_v55, %v1058_v56  ;;  %v1046_v2 = vld [vmem:[#allocation6 + $0x3c] sm:$0xf0]  ;;  %v450_v55 = vstv %s447_s28 }
  0x39   : > { %v403_v6 = vmul.f32 %v1257_v3, %v402_v5  ;;  %628 = vmatpush.bf16.msra.mxu0 %v1081_v38  ;;  %v1065_v61 = vor.u32 %v1149_v58, %v1064_v57  ;;  %v1044_v62 = vld [vmem:[#allocation6 + $0x30] sm:$0xf]  ;;  %v1145_v63 = vld [vmem:[#allocation6 + $0x38] sm:$0xf0]  ;;  %v1146_v4 = vld [vmem:[#allocation6 + $0x40] sm:$0xf0] }
  0x3a   : > { %642 = vmatpush.bf16.msra.mxu1 %v1085_v42  ;;  %v1020_v20 = vld [vmem:[#allocation6] sm:$0xf]  ;;  %v1139_v21 = vld [vmem:[#allocation6 + $0x8] sm:$0xf0]  ;;  %v1138_v22 = vld [vmem:[#allocation6 + $0x4] sm:$0xf] }
  0x3b   : > { %v404_v7 = vadd.f32 %v1257_v3, %v403_v6  ;;  %656 = vmatpush.bf16.msra.mxu2 %v1089_v43  ;;  %v1045_v6 = vor.u32 %v1145_v63, %v1044_v62  ;;  %v1022_v24 = vld [vmem:[#allocation6 + $0xc] sm:$0xf0]  ;;  %v1028_v25 = vld [vmem:[#allocation6 + $0x8] sm:$0xf]  ;;  %v1140_v26 = vld [vmem:[#allocation6 + $0x10] sm:$0xf0]  ;;  %v1021_v30 = vor.u32 %v1139_v21, %v1020_v20 }
  0x3c   : > { %v1025_v31 = vor.u32 %v1138_v22, %v1022_v24  ;;  %v1029_v32 = vor.u32 %v1140_v26, %v1028_v25  ;;  %s1135_s9 = sshll.u32 %s1700_s24, 5  ;;  %s1439_s24 = smov 64  }
  0x3d   : > { %v406_v8 = vsel %vm405_vm0, %v1257_v3, %v404_v7  ;;  %629 = vmatpush.bf16.msra.mxu0 %v1069_v47  ;;  %v1052_v3 = vld [vmem:[#allocation6 + $0x38] sm:$0xf]  ;;  %s1586_s14 = scalar_lea.vmem %s1687_s5, %s1135_s9  ;;  %s1591_s18 = scalar_lea.vmem %s1686_s4, %s1135_s9 }
  0x3e   : > { %643 = vmatpush.bf16.msra.mxu1 %v1073_v51  ;;  %s1440_s19 = smov 96   ;;  %s1441_s20 = smov 32  }
  0x3f   : > { %657 = vmatpush.bf16.msra.mxu2 %v1077_v52  ;;  %s1603_s30 = scalar_lea.vmem %s1688_s6, %s1135_s9 }
  0x41   : > { %630 = vmatpush.bf16.msra.mxu0 %v1057_v59  ;;  %v454_v59 = vstv %s1017_s29 }
  0x42   : > { %644 = vmatpush.bf16.msra.mxu1 %v1061_v60 }
  0x43   : > { %658 = vmatpush.bf16.msra.mxu2 %v1065_v61 }
  0x45   : > { %631 = vmatpush.bf16.msra.mxu0 %v1045_v6 }
  0xa1   : > { %v397_v9 = vpop.xlane.xlu0 %396 }
  0xa2   : > { %v407_v10 = vmul.f32 %v406_v8, %v397_v9  ;;  %v1032_v9 = vld [vmem:[#allocation6 + $0x18] sm:$0xf] }
  0xa4   : > { %v1571_v11 = vsub.f32 %v394_v0, %v407_v10  ;;  %v1144_v0 = vld [vmem:[#allocation6 + $0x34] sm:$0xf]  ;;  %v1142_v10 = vld [vmem:[#allocation6 + $0x20] sm:$0xf0] }
  0xa5   : > { %v1049_v7 = vor.u32 %v1144_v0, %v1046_v2  ;;  %v1033_v17 = vor.u32 %v1142_v10, %v1032_v9  ;;  %v490_v0 = vld [vmem:[#allocation8] sm:$0x7] }
  0xa6   : > { %v411_v12 = vmul.f32 %v1571_v11, %v1571_v11  ;;  %v493_v2 = vperm.slane %v490_v0, 1 }
  0xa7   : > { %645 = vmatpush.bf16.msra.mxu1 %v1049_v7  ;;  %632 = vmatpush.bf16.msra.mxu0 %v1033_v17  ;;  %v494_v7 = vperm.slane %v490_v0, 2 }
  0xa8   : > { %413 = vadd.xlane.f32.xlu1 %v411_v12  ;;  %v1141_v12 = vld [vmem:[#allocation6 + $0x1c] sm:$0xf] }
  0xa9   : > { %v399_v13 = vpop.xlane.xlu0 %398 }
  0xaa   : > { %v408_v14 = vmul.f32 %v406_v8, %v399_v13  ;;  %v1053_v8 = vor.u32 %v1146_v4, %v1052_v3  ;;  %v1034_v13 = vld [vmem:[#allocation6 + $0x24] sm:$0xf0] }
  0xab   : > { %v1037_v18 = vor.u32 %v1141_v12, %v1034_v13  ;;  %633 = vmatpush.bf16.msra.mxu0 %v1021_v30 }
  0xac   : > { %v1575_v15 = vsub.f32 %v395_v1, %v408_v14  ;;  %v1040_v14 = vld [vmem:[#allocation6 + $0x20] sm:$0xf]  ;;  %659 = vmatpush.bf16.msra.mxu2 %v1053_v8 }
  0xad   : > { %646 = vmatpush.bf16.msra.mxu1 %v1037_v18 }
  0xae   : > { %v412_v16 = vmul.f32 %v1575_v15, %v1575_v15 }
  0xb0   : > { %415 = vadd.xlane.f32.xlu1 %v412_v16  ;;  %v1143_v16 = vld [vmem:[#allocation6 + $0x28] sm:$0xf0] }
  0xb1   : > { %v1041_v19 = vor.u32 %v1143_v16, %v1040_v14  ;;  %647 = vmatpush.bf16.msra.mxu1 %v1025_v31 }
  0xb3   : > { %660 = vmatpush.bf16.msra.mxu2 %v1041_v19 }
  0xb7   : > { %661 = vmatpush.bf16.msra.mxu2 %v1029_v32 }
 0x11b   : > { %v414_v1 = vpop.xlane.xlu1 %413 }
 0x11c   : > { %v417_v5 = vmul.f32 0.007874016, %v414_v1  ;;  %v492_v1 = vperm.slane %v490_v0, 0 }
 0x11e   : > { %1258 = vrsqrt.f32 %v417_v5  ;;  %vm426_vm1 = vcmp.eq.f32.partialorder %v417_v5, inf  ;;  %v429_v41 = vand.u32 2147483648, %v417_v5  ;;  %vm428_vm2 = vcmp.eq.f32.partialorder %v417_v5, 0.0 }
 0x123   : > { %v416_v23 = vpop.xlane.xlu1 %415 }
 0x124   : > { %v1259_v27 = vpop.eup %1258  ;;  %v418_v28 = vmul.f32 0.007874016, %v416_v23 }
 0x125   : > { %v420_v29 = vmul.f32 %v1259_v27, %v417_v5 }
 0x126   : > { %1260 = vrsqrt.f32 %v418_v28  ;;  %vm438_vm3 = vcmp.eq.f32.partialorder %v418_v28, inf  ;;  %v441_v49 = vand.u32 2147483648, %v418_v28  ;;  %vm440_vm4 = vcmp.eq.f32.partialorder %v418_v28, 0.0 }
 0x127   : > { %v421_v33 = vmul.f32 %v1259_v27, %v420_v29 }
 0x129   : > { %v422_v34 = vmul.f32 0.5, %v421_v33 }
 0x12b   : > { %v423_v35 = vsub.f32 1.5, %v422_v34 }
 0x12c   : > { %v1261_v36 = vpop.eup %1260 }
 0x12d   : > { %v432_v37 = vmul.f32 %v1261_v36, %v418_v28  ;;  %v424_v38 = vmul.f32 %v1259_v27, %v423_v35 }
 0x12f   : > { %v433_v39 = vmul.f32 %v1261_v36, %v432_v37  ;;  %v425_v40 = vmul.f32 %v424_v38, %v417_v5 }
 0x131   : > { %v434_v42 = vmul.f32 0.5, %v433_v39  ;;  %v427_v43 = vsel %vm426_vm1, %v417_v5, %v425_v40 }
 0x132   : > { %v430_v44 = vsel %vm428_vm2, %v429_v41, %v427_v43 }
 0x133   : > { %v435_v45 = vsub.f32 1.5, %v434_v42  ;;  %v443_v46 = vadd.f32 1e-06, %v430_v44 }
 0x135   : > { %v436_v47 = vmul.f32 %v1261_v36, %v435_v45  ;;  %1262 = vrcp.f32 %v443_v46 }
 0x137   : > { %v437_v48 = vmul.f32 %v436_v47, %v418_v28 }
 0x139   : > { %v439_v50 = vsel %vm438_vm3, %v418_v28, %v437_v48 }
 0x13a   : > { %v442_v51 = vsel %vm440_vm4, %v441_v49, %v439_v50 }
 0x13b   : > { %v444_v52 = vadd.f32 1e-06, %v442_v51  ;;  %v1263_v53 = vpop.eup %1262 }
 0x13c   : > { %v448_v54 = vmul.f32 %v1263_v53, %v1571_v11 }
 0x13d   : > { %1264 = vrcp.f32 %v444_v52 }
 0x13e   : > { %v451_v58 = vmul.f32 %v450_v55, %v448_v54 }
 0x140   : > { %v455_v61 = vadd.f32 %v454_v59, %v451_v58 }
 0x143   : > { %v1265_v56 = vpop.eup %1264 }
 0x144   : > { %v449_v57 = vmul.f32 %v1265_v56, %v1575_v15 }
 0x146   : > { %v452_v60 = vmul.f32 %v450_v55, %v449_v57 }
 0x148   : > { %v456_v62 = vadd.f32 %v454_v59, %v452_v60 }
 0x14a   : > { %v457_v63 = vpack.c.bf16 %v456_v62, %v455_v61 }
 0x14c   : > { %634 = vmatmul.bf16.vlgmr.msra.gmra.mxu0 %v457_v63  ;;  %648 = vmatmul.bf16.vlgmr.msra.gmra.mxu1 %v457_v63 }
 0x14d   : > { %662 = vmatmul.bf16.vlgmr.msra.gmra.mxu2 %v457_v63 }
 0x1c9   : > { %v635_v11 = vpop.f32.mrf.mxu0  ;;  %v649_v3 = vpop.f32.mrf.mxu1 }
 0x1ca   : > { %v636_v4 = vadd.f32 %v635_v11, %v492_v1  ;;  %v650_v15 = vadd.f32 %v649_v3, %v493_v2 }
 0x1cc   : > { %v668_v5 = vmul.f32 0.17677669, %v636_v4  ;;  %v675_v6 = vpack.c.bf16 %v650_v15, %v650_v15 }
 0x1ce   : > { %v670_v8 = vpack.c.bf16 %v668_v5, %v668_v5  ;;  %677 = vst.msk [vmem:[%s1586_s14] sm:$0xf] %vm672_vm5, %v675_v6  ;;  %725 = vrot.lane.b32.xlu2 %v675_v6, %s1439_s24  ;;  %696 = vrot.lane.b32.xlu0 %v675_v6, %s1440_s19 }
 0x1d0   : > { %673 = vst.msk [vmem:[%s1591_s18] sm:$0xf] %vm672_vm5, %v670_v8  ;;  %v663_v9 = vpop.f32.mrf.mxu2  ;;  %743 = vrot.lane.b32.xlu1 %v670_v8, %s1441_s20 }
 0x1d1   : > { %v664_v10 = vadd.f32 %v663_v9, %v494_v7  ;;  %v637_v12 = vpop.f32.mrf.mxu0  ;;  %v651_v13 = vpop.f32.mrf.mxu1 }
 0x1d2   : > { %v638_v14 = vadd.f32 %v637_v12, %v492_v1  ;;  %v652_v16 = vadd.f32 %v651_v13, %v493_v2 }
 0x1d3   : > { %v679_v17 = vpack.c.bf16 %v664_v10, %v664_v10 }
 0x1d4   : > { %v669_v18 = vmul.f32 0.17677669, %v638_v14  ;;  %v676_v19 = vpack.c.bf16 %v652_v16, %v652_v16 }
 0x1d5   : > { %681 = vst.msk [vmem:[%s1603_s30] sm:$0xf] %vm672_vm5, %v679_v17 }
 0x1d6   : > { %v671_v20 = vpack.c.bf16 %v669_v18, %v669_v18  ;;  %678 = vst.msk [vmem:[%s1586_s14 + $0x4] sm:$0xf] %vm672_vm5, %v676_v19  ;;  %752 = vrot.lane.b32.xlu2 %v675_v6, %s1441_s20  ;;  %734 = vrot.lane.b32.xlu0 %v679_v17, %s1439_s24 }
 0x1d8   : > { %674 = vst.msk [vmem:[%s1591_s18 + $0x4] sm:$0xf] %vm672_vm5, %v671_v20  ;;  %v665_v21 = vpop.f32.mrf.mxu2  ;;  %698 = vrot.lane.b32.xlu1 %v676_v19, %s1440_s19 }
 0x1d9   : > { %v666_v22 = vadd.f32 %v665_v21, %v494_v7 }
 0x1db   : > { %v680_v23 = vpack.c.bf16 %v666_v22, %v666_v22 }
 0x1dd   : > { %682 = vst.msk [vmem:[%s1603_s30 + $0x4] sm:$0xf] %vm672_vm5, %v680_v23 }
 0x1de   : > { %718 = vrot.lane.b32.xlu0 %v671_v20, %s1439_s24  ;;  %685 = vrot.lane.b32.xlu2 %v670_v8, %s1440_s19 }
 0x1e0   : > { %727 = vrot.lane.b32.xlu1 %v676_v19, %s1439_s24 }
 0x1e6   : > { %745 = vrot.lane.b32.xlu0 %v671_v20, %s1441_s20  ;;  %716 = vrot.lane.b32.xlu2 %v670_v8, %s1439_s24 }
 0x1e8   : > { %754 = vrot.lane.b32.xlu1 %v676_v19, %s1441_s20 }
 0x1ee   : > { %761 = vrot.lane.b32.xlu0 %v679_v17, %s1441_s20  ;;  %707 = vrot.lane.b32.xlu2 %v679_v17, %s1440_s19 }
 0x1f6   : > { %687 = vrot.lane.b32.xlu2 %v671_v20, %s1440_s19 }
 0x1fe   : > { %709 = vrot.lane.b32.xlu2 %v680_v23, %s1440_s19 }
 0x206   : > { %736 = vrot.lane.b32.xlu2 %v680_v23, %s1439_s24 }
 0x20e   : > { %763 = vrot.lane.b32.xlu2 %v680_v23, %s1441_s20 }
 0x228   : > { %v726_v24 = vpop.permute.xlu2 %725 }
 0x229   : > { %1122 = vst.msk [vmem:[%s1586_s14 + $0x10] sm:$0xf] %vm672_vm5, %v726_v24 }
 0x230   : > { %v753_v25 = vpop.permute.xlu2 %752 }
 0x231   : > { %1128 = vst.msk [vmem:[%s1586_s14 + $0x18] sm:$0xf] %vm672_vm5, %v753_v25 }
 0x238   : > { %v686_v26 = vpop.permute.xlu2 %685 }
 0x239   : > { %1114 = vst.msk [vmem:[%s1591_s18 + $0x8] sm:$0xf] %vm672_vm5, %v686_v26 }
 0x240   : > { %v697_v27 = vpop.permute.xlu0 %696  ;;  %v717_v28 = vpop.permute.xlu2 %716 }
 0x241   : > { %1116 = vst.msk [vmem:[%s1586_s14 + $0x8] sm:$0xf] %vm672_vm5, %v697_v27 }
 0x242   : > { %1120 = vst.msk [vmem:[%s1591_s18 + $0x10] sm:$0xf] %vm672_vm5, %v717_v28  ;;  %v744_v29 = vpop.permute.xlu1 %743 }
 0x243   : > { %1126 = vst.msk [vmem:[%s1591_s18 + $0x18] sm:$0xf] %vm672_vm5, %v744_v29 }
 0x248   : > { %v735_v30 = vpop.permute.xlu0 %734  ;;  %v708_v31 = vpop.permute.xlu2 %707 }
 0x249   : > { %1124 = vst.msk [vmem:[%s1603_s30 + $0x10] sm:$0xf] %vm672_vm5, %v735_v30 }
 0x24a   : > { %1118 = vst.msk [vmem:[%s1603_s30 + $0x8] sm:$0xf] %vm672_vm5, %v708_v31  ;;  %v699_v32 = vpop.permute.xlu1 %698 }
 0x24b   : > { %1117 = vst.msk [vmem:[%s1586_s14 + $0xc] sm:$0xf] %vm672_vm5, %v699_v32 }
 0x250   : > { %v719_v33 = vpop.permute.xlu0 %718  ;;  %v688_v34 = vpop.permute.xlu2 %687 }
 0x251   : > { %1121 = vst.msk [vmem:[%s1591_s18 + $0x14] sm:$0xf] %vm672_vm5, %v719_v33 }
 0x252   : > { %1115 = vst.msk [vmem:[%s1591_s18 + $0xc] sm:$0xf] %vm672_vm5, %v688_v34  ;;  %v728_v35 = vpop.permute.xlu1 %727 }
 0x253   : > { %1123 = vst.msk [vmem:[%s1586_s14 + $0x14] sm:$0xf] %vm672_vm5, %v728_v35 }
 0x258   : > { %v746_v36 = vpop.permute.xlu0 %745  ;;  %v710_v37 = vpop.permute.xlu2 %709 }
 0x259   : > { %1127 = vst.msk [vmem:[%s1591_s18 + $0x1c] sm:$0xf] %vm672_vm5, %v746_v36 }
 0x25a   : > { %1119 = vst.msk [vmem:[%s1603_s30 + $0xc] sm:$0xf] %vm672_vm5, %v710_v37  ;;  %v755_v38 = vpop.permute.xlu1 %754 }
 0x25b   : > { %1129 = vst.msk [vmem:[%s1586_s14 + $0x1c] sm:$0xf] %vm672_vm5, %v755_v38 }
 0x260   : > { %v762_v39 = vpop.permute.xlu0 %761  ;;  %v737_v40 = vpop.permute.xlu2 %736 }
 0x261   : > { %1130 = vst.msk [vmem:[%s1603_s30 + $0x18] sm:$0xf] %vm672_vm5, %v762_v39 }
 0x262   : > { %1125 = vst.msk [vmem:[%s1603_s30 + $0x14] sm:$0xf] %vm672_vm5, %v737_v40 }
 0x268   : > { %v764_v41 = vpop.permute.xlu2 %763 }
 0x269   : > { %1131 = vst.msk [vmem:[%s1603_s30 + $0x1c] sm:$0xf] %vm672_vm5, %v764_v41 }
 0x26a PF: > { %s22_s26 = sadd.s32 1, %s1429_s26   ;;  %s1692_s21 = smov %s1413_s22 }
 0x26b   : > { %p19_p2 = scmp.ge.s32.totalorder %s22_s26, 4   ;;  %s1693_s22 = smov %s1417_s23 }
 0x26c   : > { %s1694_s23 = smov %s1549_s15  ;;  %s1695_s24 = smov %s1425_s25 }
 0x26d   : > { %s1696_s25 = smov %s1698_s7  ;;  %21 = sbr.rel (!%p19_p2) target bundleno = 6 (0x6), region = 122 }
 0x272   :  { %850 = vsyncpa [#allocation3], 1 }
 0x273   :  { %852 = vsyncpa [#allocation3 + $0x1], 1 }
 0x274   :  { %853 = vsyncpa [#allocation7], 1 }
 0x275   :  { %854 = vsyncpa [#allocation4], 1 }
 0x276   :  { %856 = vsyncpa [#allocation4 + $0x1], 1 }

// kernel: encoder_block.5
= control target key start
LH: loop header
LB: loop body
LE: loop exit
PB: predicated region body
PF: predicated region fallthrough
CT: control target
= control target key end

     0   :  { %11 = vsyncpa [#allocation7], 0  ;;  %s2563_s0 = inlined_call_operand.vmem [shape: f32[2], index: 0, kind: input, shape index: {}]   ;;  %s2564_s1 = inlined_call_operand.vmem [shape: f32[32,128], index: 1, kind: input, shape index: {}]   ;;  %s2565_s2 = inlined_call_operand.hbm [shape: bf16[128,1024], index: 2, kind: input, shape index: {}]   ;;  %s2566_s3 = inlined_call_operand.hbm [shape: f32[1,1024], index: 3, kind: input, shape index: {}]   ;;  %s2567_s4 = inlined_call_operand.hbm [shape: bf16[1024,128], index: 4, kind: input, shape index: {}]   ;;  %s2568_s5 = inlined_call_operand.vmem [shape: f32[1,128], index: 5, kind: input, shape index: {}]   ;;  %s2569_s6 = inlined_call_operand.hbm [shape: f32[32,128], index: 6, kind: output, shape index: {}]  }
   0x1   :  { %12 = vsyncpa [#allocation5], 0 }
   0x2   :  { %13 = vsyncpa [#allocation10], 0  ;;  %s44_s23 = sshll.u32 %s2566_s3, 4  ;;  %s45_s23 = int_to_ptr.hbm [resolvable:$true] %s44_s23 }
   0x3   :  { %14 = vsyncpa [#allocation6], 0  ;;  %s2360_s24 = smov [#allocation9]   ;;  %s20_s28 = sshll.u32 %s2563_s0, 4  ;;  %s21_s28 = int_to_ptr.vmem [resolvable:$true] %s20_s28 }
   0x4   :  { %s46_s25 = sshll.u32 %s2360_s24, 4  ;;  %s2361_s29 = smov [#allocation4]   ;;  %s47_s25 = int_to_ptr.vmem [resolvable:$true] %s46_s25 }
   0x5   :  { %49 = dma.hbm_to_vmem [thread:$0]  %s45_s23, 128, %s47_s25, [#allocation10]  }
   0x6   :  { %23 = dma.vmem_to_smem %s21_s28, 16, %s2361_s29, [#allocation7]  }
   0x7   :  { %s30_s8 = sshll.u32 %s2565_s2, 4  ;;  %s2362_s9 = smov [#allocation8]   ;;  %s31_s8 = int_to_ptr.hbm [resolvable:$true] %s30_s8 }
   0x8   :  { %s32_s3 = sshll.u32 %s2362_s9, 4  ;;  %s54_s12 = sshll.u32 %s2567_s4, 4  ;;  %s33_s3 = int_to_ptr.vmem [resolvable:$true] %s32_s3  ;;  %s55_s12 = int_to_ptr.hbm [resolvable:$true] %s54_s12 }
   0x9   :  { %s2363_s13 = smov 512   ;;  %s2364_s14 = smov 32  }
   0xa   :  { %38 = dma.hbm_to_vmem [thread:$0]  %s31_s8, 8192, %s33_s3, [#allocation5], %s2363_s13, %s2363_s13, %s2364_s14  }
   0xb   :  { %s2365_s0 = smov [#allocation11]   ;;  %s2366_s16 = smov 64  }
   0xc   :  { %s56_s15 = sshll.u32 %s2365_s0, 4  ;;  %s2367_s17 = smov 4   ;;  %s57_s15 = int_to_ptr.vmem [resolvable:$true] %s56_s15 }
   0xd   :  { %62 = dma.hbm_to_vmem [thread:$0]  %s55_s12, 8192, %s57_s15, [#allocation10], %s2366_s16, %s2366_s16, %s2367_s17  }
   0xe   :  { %2352 = dma.done.wait [#allocation7], 16  }
   0xf   :  { %2353 = vsyncadd [#allocation7], 4294967280 }
  0x10   :  { %2354 = dma.done.wait [#allocation5], 8192  }
  0x11   :  { %2355 = vsyncadd [#allocation5], 4294959104 }
  0x12   :  { %2356 = dma.done.wait [#allocation10], 8320  }
  0x13   :  { %2357 = vsyncadd [#allocation10], 4294958976 }
  0x14   :  { %81 = sfence }
  0x15   :  { %v88_v0 = vld [vmem:[%s2564_s1 + $0x10] sm:$0xff]  ;;  %v86_v1 = vld [vmem:[%s2564_s1] sm:$0xff]  ;;  %v89_v2 = vld [vmem:[%s2564_s1 + $0x18] sm:$0xff]  ;;  %v2368_v4 = vmov 128.0   ;;  %s2494_s24 = sld [smem:[#allocation4]]  ;;  %s2369_s10 = smov [#allocation12]  }
  0x16   :  { %94 = vadd.xlane.f32.xlu1 %v88_v0  ;;  %90 = vadd.xlane.f32.xlu0 %v86_v1  ;;  %v87_v3 = vld [vmem:[%s2564_s1 + $0x8] sm:$0xff]  ;;  %2222 = vrcp.f32 %v2368_v4  ;;  %v1782_v27 = vld [vmem:[#allocation8 + $0x1c0] sm:$0xf]  ;;  %v2126_v29 = vld [vmem:[#allocation8 + $0x1c4] sm:$0xf]  ;;  %s2498_s25 = sld [smem:[#allocation4 + $0x1]] }
  0x17   :  { %v2130_v28 = vld [vmem:[#allocation8 + $0x1dc] sm:$0xf0]  ;;  %v1784_v31 = vld [vmem:[#allocation8 + $0x1e0] sm:$0xf0]  ;;  %v1790_v32 = vld [vmem:[#allocation8 + $0x1c8] sm:$0xf] }
  0x18   :  { %v1783_v30 = vor.u32 %v2130_v28, %v1782_v27  ;;  %v2131_v33 = vld [vmem:[#allocation8 + $0x1e4] sm:$0xf0]  ;;  %v1787_v34 = vor.u32 %v2126_v29, %v1784_v31  ;;  %v2127_v36 = vld [vmem:[#allocation8 + $0x1cc] sm:$0xf]  ;;  %v1750_v39 = vld [vmem:[#allocation8 + $0x180] sm:$0xf] }
  0x19   :  { %v1791_v35 = vor.u32 %v2131_v33, %v1790_v32  ;;  %v1792_v37 = vld [vmem:[#allocation8 + $0x1e8] sm:$0xf0]  ;;  %v2122_v40 = vld [vmem:[#allocation8 + $0x19c] sm:$0xf0]  ;;  %v2118_v41 = vld [vmem:[#allocation8 + $0x184] sm:$0xf] }
  0x1a   :  { %639 = vmatpush.bf16.msra.mxu0 %v1783_v30  ;;  %v1795_v38 = vor.u32 %v2127_v36, %v1792_v37  ;;  %658 = vmatpush.bf16.msra.mxu1 %v1787_v34  ;;  %v1751_v42 = vor.u32 %v2122_v40, %v1750_v39  ;;  %v1752_v43 = vld [vmem:[#allocation8 + $0x1a0] sm:$0xf0]  ;;  %v1758_v44 = vld [vmem:[#allocation8 + $0x188] sm:$0xf]  ;;  %v2119_v49 = vld [vmem:[#allocation8 + $0x18c] sm:$0xf] }
  0x1b   :  { %677 = vmatpush.bf16.msra.mxu2 %v1791_v35  ;;  %v2123_v45 = vld [vmem:[#allocation8 + $0x1a4] sm:$0xf0]  ;;  %v1755_v47 = vor.u32 %v2118_v41, %v1752_v43  ;;  %v1760_v50 = vld [vmem:[#allocation8 + $0x1a8] sm:$0xf0]  ;;  %v1718_v55 = vld [vmem:[#allocation8 + $0x140] sm:$0xf] }
  0x1c   :  { %v2223_v5 = vpop.eup %2222  ;;  %696 = vmatpush.bf16.msra.mxu3 %v1795_v38  ;;  %v1759_v48 = vor.u32 %v2123_v45, %v1758_v44  ;;  %v1763_v53 = vor.u32 %v2119_v49, %v1760_v50  ;;  %v2114_v56 = vld [vmem:[#allocation8 + $0x15c] sm:$0xf0]  ;;  %v2110_v57 = vld [vmem:[#allocation8 + $0x144] sm:$0xf]  ;;  %v1726_v61 = vld [vmem:[#allocation8 + $0x148] sm:$0xf] }
  0x1d   :  { %v99_v6 = vmul.f32 128.0, %v2223_v5  ;;  %vm103_vm0 = vweird.f32 %v2223_v5  ;;  %v1720_v58 = vld [vmem:[#allocation8 + $0x160] sm:$0xf0]  ;;  %v1719_v59 = vor.u32 %v2114_v56, %v1718_v55  ;;  %v2115_v62 = vld [vmem:[#allocation8 + $0x164] sm:$0xf0]  ;;  %s1530_s11 = sshll.u32 %s2369_s10, 4  ;;  %s1531_s11 = int_to_ptr.vmem [resolvable:$true] %s1530_s11 }
  0x1e   :  { %96 = vadd.xlane.f32.xlu1 %v89_v2  ;;  %92 = vadd.xlane.f32.xlu0 %v87_v3  ;;  %v1723_v60 = vor.u32 %v2110_v57, %v1720_v58  ;;  %v2111_v63 = vld [vmem:[#allocation8 + $0x14c] sm:$0xf]  ;;  %v2098_v27 = vld [vmem:[#allocation8 + $0xdc] sm:$0xf0]  ;;  %v2094_v29 = vld [vmem:[#allocation8 + $0xc4] sm:$0xf] }
  0x1f   :  { %v100_v7 = vsub.f32 1.0, %v99_v6  ;;  %640 = vmatpush.bf16.msra.mxu0 %v1751_v42  ;;  %659 = vmatpush.bf16.msra.mxu1 %v1755_v47  ;;  %v2102_v6 = vld [vmem:[#allocation8 + $0x104] sm:$0xf]  ;;  %v1662_v32 = vld [vmem:[#allocation8 + $0xc8] sm:$0xf]  ;;  %s1532_s14 = sshll.u32 %s2569_s6, 4  ;;  %s1533_s14 = int_to_ptr.hbm [resolvable:$true] %s1532_s14 }
  0x20   :  { %678 = vmatpush.bf16.msra.mxu2 %v1759_v48  ;;  %697 = vmatpush.bf16.msra.mxu3 %v1763_v53  ;;  %v1656_v30 = vld [vmem:[#allocation8 + $0xe0] sm:$0xf0]  ;;  %v2099_v33 = vld [vmem:[#allocation8 + $0xe4] sm:$0xf0]  ;;  %v2095_v37 = vld [vmem:[#allocation8 + $0xcc] sm:$0xf] }
  0x21   :  { %v101_v8 = vmul.f32 %v2223_v5, %v100_v7  ;;  %v1688_v7 = vld [vmem:[#allocation8 + $0x120] sm:$0xf0]  ;;  %v1664_v38 = vld [vmem:[#allocation8 + $0xe8] sm:$0xf0]  ;;  %v1659_v40 = vor.u32 %v2094_v29, %v1656_v30  ;;  %v1663_v41 = vor.u32 %v2099_v33, %v1662_v32  ;;  %v1622_v43 = vld [vmem:[#allocation8 + $0x80] sm:$0xf] }
  0x22   :  { %v1667_v42 = vor.u32 %v2095_v37, %v1664_v38  ;;  %v2090_v44 = vld [vmem:[#allocation8 + $0x9c] sm:$0xf0]  ;;  %v2086_v47 = vld [vmem:[#allocation8 + $0x84] sm:$0xf]  ;;  %v1630_v53 = vld [vmem:[#allocation8 + $0x88] sm:$0xf] }
  0x23   :  { %v102_v9 = vadd.f32 %v2223_v5, %v101_v8  ;;  %641 = vmatpush.bf16.msra.mxu0 %v1719_v59  ;;  %660 = vmatpush.bf16.msra.mxu1 %v1723_v60  ;;  %v1694_v8 = vld [vmem:[#allocation8 + $0x108] sm:$0xf]  ;;  %v1624_v48 = vld [vmem:[#allocation8 + $0xa0] sm:$0xf0]  ;;  %v2087_v60 = vld [vmem:[#allocation8 + $0x8c] sm:$0xf] }
  0x24   :  { %v2091_v55 = vld [vmem:[#allocation8 + $0xa4] sm:$0xf0]  ;;  %v1560_v29 = vld [vmem:[#allocation8 + $0x20] sm:$0xf0]  ;;  %s2370_s0 = smov 128   ;;  %s2371_s15 = smov 8  }
  0x25   :  { %v104_v10 = vsel %vm103_vm0, %v2223_v5, %v102_v9  ;;  %v1631_v59 = vor.u32 %v2091_v55, %v1630_v53  ;;  %v1566_v33 = vld [vmem:[#allocation8 + $0x8] sm:$0xf]  ;;  %v1798_v53 = vld [vmem:[#allocation8 + $0x1d0] sm:$0xf] }
  0x26   :  { %v2132_v55 = vld [vmem:[#allocation8 + $0x1ec] sm:$0xf0] }
  0x89   :  { %v95_v11 = vpop.xlane.xlu1 %94  ;;  %v91_v13 = vpop.xlane.xlu0 %90 }
  0x8a   :  { %v107_v12 = vmul.f32 %v104_v10, %v95_v11  ;;  %v105_v14 = vmul.f32 %v104_v10, %v91_v13  ;;  %v2107_v11 = vld [vmem:[#allocation8 + $0x124] sm:$0xf0]  ;;  %v1696_v13 = vld [vmem:[#allocation8 + $0x128] sm:$0xf0] }
  0x8c   :  { %v2431_v15 = vsub.f32 %v88_v0, %v107_v12  ;;  %v2433_v16 = vsub.f32 %v86_v1, %v105_v14  ;;  %v1727_v0 = vor.u32 %v2115_v62, %v1726_v61  ;;  %v1728_v1 = vld [vmem:[#allocation8 + $0x168] sm:$0xf0] }
  0x8d   :  { %v1731_v4 = vor.u32 %v2111_v63, %v1728_v1  ;;  %v2103_v12 = vld [vmem:[#allocation8 + $0x10c] sm:$0xf] }
  0x8e   :  { %v115_v17 = vmul.f32 %v2431_v15, %v2431_v15  ;;  %v113_v18 = vmul.f32 %v2433_v16, %v2433_v16  ;;  %679 = vmatpush.bf16.msra.mxu2 %v1727_v0  ;;  %v1632_v61 = vld [vmem:[#allocation8 + $0xa8] sm:$0xf0] }
  0x8f   :  { %698 = vmatpush.bf16.msra.mxu3 %v1731_v4  ;;  %v1635_v1 = vor.u32 %v2087_v60, %v1632_v61  ;;  %v2078_v4 = vld [vmem:[#allocation8 + $0x44] sm:$0xf]  ;;  %v1799_v61 = vor.u32 %v2132_v55, %v1798_v53 }
  0x90   :  { %121 = vadd.xlane.f32.xlu0 %v115_v17  ;;  %117 = vadd.xlane.f32.xlu2 %v113_v18 }
  0x91   :  { %v97_v19 = vpop.xlane.xlu1 %96  ;;  %v93_v21 = vpop.xlane.xlu0 %92 }
  0x92   :  { %v108_v20 = vmul.f32 %v104_v10, %v97_v19  ;;  %v106_v22 = vmul.f32 %v104_v10, %v93_v21  ;;  %v1691_v10 = vor.u32 %v2102_v6, %v1688_v7  ;;  %v1695_v19 = vor.u32 %v2107_v11, %v1694_v8  ;;  %v1592_v8 = vld [vmem:[#allocation8 + $0x60] sm:$0xf0] }
  0x94   :  { %v2439_v23 = vsub.f32 %v89_v2, %v108_v20  ;;  %v2441_v24 = vsub.f32 %v87_v3, %v106_v22  ;;  %v1686_v2 = vld [vmem:[#allocation8 + $0x100] sm:$0xf]  ;;  %v1699_v20 = vor.u32 %v2103_v12, %v1696_v13  ;;  %661 = vmatpush.bf16.msra.mxu1 %v1691_v10  ;;  %680 = vmatpush.bf16.msra.mxu2 %v1695_v19  ;;  %v2083_v10 = vld [vmem:[#allocation8 + $0x64] sm:$0xf0] }
  0x95   :  { %v2106_v3 = vld [vmem:[#allocation8 + $0x11c] sm:$0xf0]  ;;  %v1595_v13 = vor.u32 %v2078_v4, %v1592_v8  ;;  %v1766_v4 = vld [vmem:[#allocation8 + $0x190] sm:$0xf] }
  0x96   :  { %v116_v25 = vmul.f32 %v2439_v23, %v2439_v23  ;;  %v114_v26 = vmul.f32 %v2441_v24, %v2441_v24  ;;  %v1687_v5 = vor.u32 %v2106_v3, %v1686_v2  ;;  %699 = vmatpush.bf16.msra.mxu3 %v1699_v20  ;;  %v1590_v2 = vld [vmem:[#allocation8 + $0x40] sm:$0xf] }
  0x97   :  { %v2082_v3 = vld [vmem:[#allocation8 + $0x5c] sm:$0xf0] }
  0x98   :  { %123 = vadd.xlane.f32.xlu1 %v116_v25  ;;  %119 = vadd.xlane.f32.xlu2 %v114_v26  ;;  %v1654_v26 = vld [vmem:[#allocation8 + $0xc0] sm:$0xf]  ;;  %v1591_v7 = vor.u32 %v2082_v3, %v1590_v2  ;;  %v2125_v3 = vld [vmem:[#allocation8 + $0x1b4] sm:$0xf0] }
  0x99   :  { %642 = vmatpush.bf16.msra.mxu0 %v1687_v5  ;;  %v1655_v36 = vor.u32 %v2098_v27, %v1654_v26  ;;  %662 = vmatpush.bf16.msra.mxu1 %v1659_v40  ;;  %v1558_v19 = vld [vmem:[#allocation8] sm:$0xf]  ;;  %v2071_v40 = vld [vmem:[#allocation8 + $0xc] sm:$0xf] }
  0x9a   :  { %681 = vmatpush.bf16.msra.mxu2 %v1663_v41  ;;  %700 = vmatpush.bf16.msra.mxu3 %v1667_v42  ;;  %v2074_v27 = vld [vmem:[#allocation8 + $0x1c] sm:$0xf0]  ;;  %v1568_v41 = vld [vmem:[#allocation8 + $0x28] sm:$0xf0] }
  0x9b   :  { %v1559_v32 = vor.u32 %v2074_v27, %v1558_v19  ;;  %v1742_v19 = vld [vmem:[#allocation8 + $0x158] sm:$0xf]  ;;  %v1734_v27 = vld [vmem:[#allocation8 + $0x150] sm:$0xf] }
  0x9d   :  { %643 = vmatpush.bf16.msra.mxu0 %v1655_v36 }
  0x9e   :  { %682 = vmatpush.bf16.msra.mxu2 %v1631_v59  ;;  %701 = vmatpush.bf16.msra.mxu3 %v1635_v1  ;;  %v1800_v59 = vld [vmem:[#allocation8 + $0x1f0] sm:$0xf0]  ;;  %v1774_v1 = vld [vmem:[#allocation8 + $0x198] sm:$0xf] }
 0x103   :  { %v122_v46 = vpop.xlane.xlu0 %121  ;;  %v118_v51 = vpop.xlane.xlu2 %117 }
 0x104   :  { %v2447_v52 = vmul.f32 0.007874016, %v122_v46  ;;  %v2449_v54 = vmul.f32 0.007874016, %v118_v51  ;;  %v1623_v46 = vor.u32 %v2090_v44, %v1622_v43  ;;  %v1627_v51 = vor.u32 %v2086_v47, %v1624_v48 }
 0x105   :  { %v1571_v47 = vor.u32 %v2071_v40, %v1568_v41  ;;  %v1702_v40 = vld [vmem:[#allocation8 + $0x110] sm:$0xf] }
 0x106   :  { %2224 = vrsqrt.f32 %v2447_v52  ;;  %vm160_vm1 = vcmp.eq.f32.partialorder %v2447_v52, inf  ;;  %v163_v35 = vand.u32 2147483648, %v2447_v52  ;;  %vm136_vm2 = vcmp.eq.f32.partialorder %v2449_v54, inf  ;;  %644 = vmatpush.bf16.msra.mxu0 %v1623_v46  ;;  %663 = vmatpush.bf16.msra.mxu1 %v1627_v51  ;;  %v2133_v51 = vld [vmem:[#allocation8 + $0x1f4] sm:$0xf0] }
 0x107   :  { %2226 = vrsqrt.f32 %v2449_v54  ;;  %vm162_vm3 = vcmp.eq.f32.partialorder %v2447_v52, 0.0  ;;  %vm138_vm4 = vcmp.eq.f32.partialorder %v2449_v54, 0.0  ;;  %v139_v49 = vand.u32 2147483648, %v2449_v54  ;;  %v2108_v41 = vld [vmem:[#allocation8 + $0x12c] sm:$0xf0] }
 0x10a   :  { %645 = vmatpush.bf16.msra.mxu0 %v1591_v7  ;;  %664 = vmatpush.bf16.msra.mxu1 %v1595_v13  ;;  %v1775_v7 = vor.u32 %v2125_v3, %v1774_v1  ;;  %v2096_v1 = vld [vmem:[#allocation8 + $0xd4] sm:$0xf] }
 0x10b   :  { %v124_v9 = vpop.xlane.xlu1 %123  ;;  %v120_v18 = vpop.xlane.xlu2 %119 }
 0x10c   :  { %v2225_v14 = vpop.eup %2224  ;;  %v2453_v17 = vmul.f32 0.007874016, %v124_v9  ;;  %v2456_v25 = vmul.f32 0.007874016, %v120_v18  ;;  %v1598_v9 = vld [vmem:[#allocation8 + $0x48] sm:$0xf] }
 0x10d   :  { %v2227_v21 = vpop.eup %2226  ;;  %v154_v22 = vmul.f32 %v2225_v14, %v2447_v52  ;;  %v1600_v18 = vld [vmem:[#allocation8 + $0x68] sm:$0xf0] }
 0x10e   :  { %v130_v28 = vmul.f32 %v2227_v21, %v2449_v54  ;;  %2228 = vrsqrt.f32 %v2453_v17  ;;  %v175_v58 = vand.u32 2147483648, %v2453_v17  ;;  %vm172_vm5 = vcmp.eq.f32.partialorder %v2453_v17, inf  ;;  %646 = vmatpush.bf16.msra.mxu0 %v1559_v32 }
 0x10f   :  { %v155_v31 = vmul.f32 %v2225_v14, %v154_v22  ;;  %2230 = vrsqrt.f32 %v2456_v25  ;;  %v1599_v22 = vor.u32 %v2083_v10, %v1598_v9  ;;  %vm174_vm6 = vcmp.eq.f32.partialorder %v2453_v17, 0.0  ;;  %v2120_v9 = vld [vmem:[#allocation8 + $0x194] sm:$0xf] }
 0x110   :  { %v131_v34 = vmul.f32 %v2227_v21, %v130_v28  ;;  %v2070_v28 = vld [vmem:[#allocation8 + $0x4] sm:$0xf]  ;;  %vm148_vm7 = vcmp.eq.f32.partialorder %v2456_v25, inf  ;;  %vm150_vm8 = vcmp.eq.f32.partialorder %v2456_v25, 0.0  ;;  %v151_v46 = vand.u32 2147483648, %v2456_v25 }
 0x111   :  { %v156_v39 = vmul.f32 0.5, %v155_v31  ;;  %683 = vmatpush.bf16.msra.mxu2 %v1599_v22  ;;  %v1768_v10 = vld [vmem:[#allocation8 + $0x1b0] sm:$0xf0] }
 0x112   :  { %v132_v45 = vmul.f32 0.5, %v131_v34  ;;  %v2075_v34 = vld [vmem:[#allocation8 + $0x24] sm:$0xf0]  ;;  %715 = vmatpush.bf16.msrb.mxu0 %v1799_v61  ;;  %v1670_v61 = vld [vmem:[#allocation8 + $0xd0] sm:$0xf] }
 0x113   :  { %v157_v50 = vsub.f32 1.5, %v156_v39  ;;  %v1563_v39 = vor.u32 %v2070_v28, %v1560_v29  ;;  %v2116_v28 = vld [vmem:[#allocation8 + $0x16c] sm:$0xf0] }
 0x114   :  { %v2467_v56 = vpop.eup %2228  ;;  %v133_v57 = vsub.f32 1.5, %v132_v45  ;;  %v1567_v45 = vor.u32 %v2075_v34, %v1566_v33  ;;  %v1735_v33 = vor.u32 %v2116_v28, %v1734_v27  ;;  %v1648_v27 = vld [vmem:[#allocation8 + $0xb8] sm:$0xf0]  ;;  %v1614_v28 = vld [vmem:[#allocation8 + $0x58] sm:$0xf] }
 0x115   :  { %v2470_v62 = vpop.eup %2230  ;;  %v158_v63 = vmul.f32 %v2225_v14, %v157_v50  ;;  %v166_v0 = vmul.f32 %v2467_v56, %v2453_v17  ;;  %v2079_v14 = vld [vmem:[#allocation8 + $0x4c] sm:$0xf]  ;;  %v1806_v50 = vld [vmem:[#allocation8 + $0x1d8] sm:$0xf]  ;;  %665 = vmatpush.bf16.msra.mxu1 %v1563_v39 }
 0x116   :  { %v134_v5 = vmul.f32 %v2227_v21, %v133_v57  ;;  %v142_v6 = vmul.f32 %v2470_v62, %v2456_v25  ;;  %v1603_v26 = vor.u32 %v2079_v14, %v1600_v18  ;;  %v2128_v57 = vld [vmem:[#allocation8 + $0x1d4] sm:$0xf]  ;;  %684 = vmatpush.bf16.msra.mxu2 %v1567_v45  ;;  %v1771_v14 = vor.u32 %v2120_v9, %v1768_v10  ;;  %v1776_v18 = vld [vmem:[#allocation8 + $0x1b8] sm:$0xf0]  ;;  %v2109_v39 = vld [vmem:[#allocation8 + $0x134] sm:$0xf0] }
 0x117   :  { %v159_v11 = vmul.f32 %v158_v63, %v2447_v52  ;;  %v167_v12 = vmul.f32 %v2467_v56, %v166_v0  ;;  %v1803_v63 = vor.u32 %v2128_v57, %v1800_v59  ;;  %v2129_v0 = vld [vmem:[#allocation8 + $0x1dc] sm:$0xf]  ;;  %v1678_v59 = vld [vmem:[#allocation8 + $0xd8] sm:$0xf] }
 0x118   :  { %v135_v20 = vmul.f32 %v134_v5, %v2449_v54  ;;  %v143_v21 = vmul.f32 %v2470_v62, %v142_v6  ;;  %702 = vmatpush.bf16.msra.mxu3 %v1603_v26  ;;  %v2124_v5 = vld [vmem:[#allocation8 + $0x1ac] sm:$0xf0]  ;;  %v2093_v10 = vld [vmem:[#allocation8 + $0xb4] sm:$0xf0] }
 0x119   :  { %v161_v30 = vsel %vm160_vm1, %v2447_v52, %v159_v11  ;;  %v168_v31 = vmul.f32 0.5, %v167_v12  ;;  %734 = vmatpush.bf16.msrb.mxu1 %v1803_v63  ;;  %v1767_v8 = vor.u32 %v2124_v5, %v1766_v4  ;;  %v2121_v11 = vld [vmem:[#allocation8 + $0x19c] sm:$0xf] }
 0x11a   :  { %v137_v36 = vsel %vm136_vm2, %v2449_v54, %v135_v20  ;;  %v164_v37 = vsel %vm162_vm3, %v163_v35, %v161_v30  ;;  %v144_v38 = vmul.f32 0.5, %v143_v21  ;;  %v2117_v20 = vld [vmem:[#allocation8 + $0x174] sm:$0xf0]  ;;  %v1779_v26 = vor.u32 %v2121_v11, %v1776_v18  ;;  %v2097_v5 = vld [vmem:[#allocation8 + $0xdc] sm:$0xf] }
 0x11b   :  { %v140_v42 = vsel %vm138_vm4, %v139_v49, %v137_v36  ;;  %v179_v43 = vadd.f32 1e-06, %v164_v37  ;;  %v169_v44 = vsub.f32 1.5, %v168_v31  ;;  %v1807_v49 = vor.u32 %v2133_v51, %v1806_v50  ;;  %v1736_v31 = vld [vmem:[#allocation8 + $0x170] sm:$0xf0]  ;;  %716 = vmatpush.bf16.msrb.mxu0 %v1767_v8 }
 0x11c   :  { %v177_v52 = vadd.f32 1e-06, %v140_v42  ;;  %v145_v35 = vsub.f32 1.5, %v144_v38  ;;  %703 = vmatpush.bf16.msra.mxu3 %v1571_v47  ;;  %v2113_v36 = vld [vmem:[#allocation8 + $0x15c] sm:$0xf]  ;;  %v190_v47 = vstv %s2494_s24 }
 0x11d   :  { %v170_v48 = vmul.f32 %v2467_v56, %v169_v44  ;;  %2232 = vrcp.f32 %v179_v43  ;;  %v1808_v56 = vld [vmem:[#allocation8 + $0x1f8] sm:$0xf0]  ;;  %753 = vmatpush.bf16.msrb.mxu2 %v1807_v49  ;;  %735 = vmatpush.bf16.msrb.mxu1 %v1771_v14  ;;  %v2104_v42 = vld [vmem:[#allocation8 + $0x114] sm:$0xf]  ;;  %v1638_v11 = vld [vmem:[#allocation8 + $0x90] sm:$0xf] }
 0x11e   :  { %v146_v54 = vmul.f32 %v2470_v62, %v145_v35  ;;  %2234 = vrcp.f32 %v177_v52  ;;  %v1811_v62 = vor.u32 %v2129_v0, %v1808_v56  ;;  %v1744_v37 = vld [vmem:[#allocation8 + $0x178] sm:$0xf0]  ;;  %v1704_v43 = vld [vmem:[#allocation8 + $0x130] sm:$0xf0]  ;;  %v2100_v56 = vld [vmem:[#allocation8 + $0xec] sm:$0xf0] }
 0x11f   :  { %v171_v60 = vmul.f32 %v170_v48, %v2453_v17  ;;  %v1747_v38 = vor.u32 %v2113_v36, %v1744_v37  ;;  %v2105_v44 = vld [vmem:[#allocation8 + $0x11c] sm:$0xf]  ;;  %717 = vmatpush.bf16.msrb.mxu0 %v1735_v33  ;;  %v1703_v48 = vor.u32 %v2108_v41, %v1702_v40  ;;  %v1707_v50 = vor.u32 %v2104_v42, %v1704_v43  ;;  %v2077_v41 = vld [vmem:[#allocation8 + $0x34] sm:$0xf0]  ;;  %v1574_v42 = vld [vmem:[#allocation8 + $0x10] sm:$0xf] }
 0x120   :  { %v147_v2 = vmul.f32 %v146_v54, %v2456_v25  ;;  %772 = vmatpush.bf16.msrb.mxu3 %v1811_v62  ;;  %v1671_v3 = vor.u32 %v2100_v56, %v1670_v61  ;;  %v2081_v36 = vld [vmem:[#allocation8 + $0x5c] sm:$0xf]  ;;  %v2076_v43 = vld [vmem:[#allocation8 + $0x2c] sm:$0xf0] }
 0x121   :  { %v173_v6 = vsel %vm172_vm5, %v2453_v17, %v171_v60  ;;  %754 = vmatpush.bf16.msrb.mxu2 %v1775_v7  ;;  %v1743_v17 = vor.u32 %v2117_v20, %v1742_v19  ;;  %v2101_v60 = vld [vmem:[#allocation8 + $0xf4] sm:$0xf0]  ;;  %v2088_v19 = vld [vmem:[#allocation8 + $0x94] sm:$0xf] }
 0x122   :  { %v176_v12 = vsel %vm174_vm6, %v175_v58, %v173_v6  ;;  %v149_v13 = vsel %vm148_vm7, %v2456_v25, %v147_v2  ;;  %v2112_v58 = vld [vmem:[#allocation8 + $0x154] sm:$0xf]  ;;  %v1710_v25 = vld [vmem:[#allocation8 + $0x118] sm:$0xf]  ;;  %v1679_v0 = vor.u32 %v2101_v60, %v1678_v59 }
 0x123   :  { %v180_v21 = vadd.f32 1e-06, %v176_v12  ;;  %v152_v22 = vsel %vm150_vm8, %v151_v46, %v149_v13  ;;  %v2233_v29 = vpop.eup %2232  ;;  %v1739_v34 = vor.u32 %v2112_v58, %v1736_v31  ;;  %v1711_v35 = vor.u32 %v2109_v39, %v1710_v25  ;;  %v1712_v46 = vld [vmem:[#allocation8 + $0x138] sm:$0xf0]  ;;  %718 = vmatpush.bf16.msrb.mxu0 %v1703_v48  ;;  %v1672_v2 = vld [vmem:[#allocation8 + $0xf0] sm:$0xf0] }
 0x124   :  { %v178_v30 = vadd.f32 1e-06, %v152_v22  ;;  %v2235_v32 = vpop.eup %2234  ;;  %773 = vmatpush.bf16.msrb.mxu3 %v1779_v26  ;;  %v188_v52 = vmul.f32 %v2233_v29, %v2431_v15  ;;  %v1715_v51 = vor.u32 %v2105_v44, %v1712_v46  ;;  %v1675_v4 = vor.u32 %v2096_v1, %v1672_v2  ;;  %v1646_v6 = vld [vmem:[#allocation8 + $0x98] sm:$0xf]  ;;  %v2092_v12 = vld [vmem:[#allocation8 + $0xac] sm:$0xf0] }
 0x125   :  { %2236 = vrcp.f32 %v180_v21  ;;  %v186_v45 = vmul.f32 %v2235_v32, %v2433_v16  ;;  %755 = vmatpush.bf16.msrb.mxu2 %v1743_v17  ;;  %736 = vmatpush.bf16.msrb.mxu1 %v1739_v34  ;;  %v196_v16 = vstv %s2498_s25  ;;  %v1647_v14 = vor.u32 %v2093_v10, %v1646_v6  ;;  %v1640_v20 = vld [vmem:[#allocation8 + $0xb0] sm:$0xf0]  ;;  %v2089_v21 = vld [vmem:[#allocation8 + $0x9c] sm:$0xf]  ;;  %v2085_v29 = vld [vmem:[#allocation8 + $0x74] sm:$0xf0] }
 0x126   :  { %2238 = vrcp.f32 %v178_v30  ;;  %v193_v55 = vmul.f32 %v190_v47, %v188_v52  ;;  %v1639_v18 = vor.u32 %v2092_v12, %v1638_v11  ;;  %v1643_v26 = vor.u32 %v2088_v19, %v1640_v20  ;;  %v1606_v58 = vld [vmem:[#allocation8 + $0x50] sm:$0xf]  ;;  %v2080_v32 = vld [vmem:[#allocation8 + $0x54] sm:$0xf]  ;;  %v1582_v39 = vld [vmem:[#allocation8 + $0x18] sm:$0xf] }
 0x127   :  { %v191_v49 = vmul.f32 %v190_v47, %v186_v45  ;;  %719 = vmatpush.bf16.msrb.mxu0 %v1671_v3  ;;  %v1651_v17 = vor.u32 %v2089_v21, %v1648_v27  ;;  %v2084_v31 = vld [vmem:[#allocation8 + $0x6c] sm:$0xf0]  ;;  %v1615_v33 = vor.u32 %v2085_v29, %v1614_v28  ;;  %v1608_v34 = vld [vmem:[#allocation8 + $0x70] sm:$0xf0]  ;;  %v1583_v52 = vor.u32 %v2077_v41, %v1582_v39  ;;  %v1584_v48 = vld [vmem:[#allocation8 + $0x38] sm:$0xf0] }
 0x128   :  { %774 = vmatpush.bf16.msrb.mxu3 %v1747_v38  ;;  %v199_v8 = vadd.f32 %v196_v16, %v193_v55  ;;  %v1607_v37 = vor.u32 %v2084_v31, %v1606_v58  ;;  %v1611_v25 = vor.u32 %v2080_v32, %v1608_v34  ;;  %v1616_v38 = vld [vmem:[#allocation8 + $0x78] sm:$0xf0]  ;;  %v2072_v44 = vld [vmem:[#allocation8 + $0x14] sm:$0xf]  ;;  %v2157_v55 = vld [vmem:[#allocation11 + $0xb8] sm:$0xff] }
 0x129   :  { %756 = vmatpush.bf16.msrb.mxu2 %v1711_v35  ;;  %737 = vmatpush.bf16.msrb.mxu1 %v1707_v50  ;;  %v197_v7 = vadd.f32 %v196_v16, %v191_v49  ;;  %v1619_v40 = vor.u32 %v2081_v36, %v1616_v38  ;;  %v1576_v45 = vld [vmem:[#allocation8 + $0x30] sm:$0xf0]  ;;  %v1575_v35 = vor.u32 %v2076_v43, %v1574_v42  ;;  %v2149_v49 = vld [vmem:[#allocation11 + $0x78] sm:$0xff]  ;;  %v2156_v59 = vld [vmem:[#allocation11 + $0xb0] sm:$0xff] }
 0x12a   :  { %v1579_v46 = vor.u32 %v2072_v44, %v1576_v45  ;;  %v2164_v60 = vld [vmem:[#allocation11 + $0xf0] sm:$0xff]  ;;  %v2139_v61 = vld [vmem:[#allocation11 + $0x28] sm:$0xff]  ;;  %v2138_v1 = vld [vmem:[#allocation11 + $0x20] sm:$0xff] }
 0x12b   :  { %v2237_v53 = vpop.eup %2236  ;;  %720 = vmatpush.bf16.msrb.mxu0 %v1639_v18  ;;  %v2163_v56 = vld [vmem:[#allocation11 + $0xe8] sm:$0xff]  ;;  %v2146_v2 = vld [vmem:[#allocation11 + $0x60] sm:$0xff]  ;;  %v2145_v3 = vld [vmem:[#allocation11 + $0x58] sm:$0xff] }
 0x12c   :  { %v2239_v54 = vpop.eup %2238  ;;  %v189_v57 = vmul.f32 %v2237_v53, %v2439_v23  ;;  %775 = vmatpush.bf16.msrb.mxu3 %v1715_v51  ;;  %v1680_v23 = vld [vmem:[#allocation8 + $0xf8] sm:$0xf0]  ;;  %v2134_v12 = vld [vmem:[#allocation11] sm:$0xff]  ;;  %v2159_v18 = vld [vmem:[#allocation11 + $0xc8] sm:$0xff] }
 0x12d   :  { %v187_v15 = vmul.f32 %v2239_v54, %v2441_v24  ;;  %757 = vmatpush.bf16.msrb.mxu2 %v1679_v0  ;;  %v1683_v9 = vor.u32 %v2097_v5, %v1680_v23  ;;  %738 = vmatpush.bf16.msrb.mxu1 %v1675_v4  ;;  %v2141_v54 = vld [vmem:[#allocation11 + $0x38] sm:$0xff]  ;;  %v2155_v0 = vld [vmem:[#allocation11 + $0xa8] sm:$0xff]  ;;  %v2154_v4 = vld [vmem:[#allocation11 + $0xa0] sm:$0xff] }
 0x12e   :  { %v194_v63 = vmul.f32 %v190_v47, %v189_v57  ;;  %v2165_v57 = vld [vmem:[#allocation11 + $0xf8] sm:$0xff]  ;;  %v2162_v5 = vld [vmem:[#allocation11 + $0xe0] sm:$0xff]  ;;  %v2136_v23 = vld [vmem:[#allocation11 + $0x10] sm:$0xff] }
 0x12f   :  { %v192_v62 = vmul.f32 %v190_v47, %v187_v15  ;;  %721 = vmatpush.bf16.msrb.mxu0 %v1607_v37  ;;  %v2073_v47 = vld [vmem:[#allocation8 + $0x1c] sm:$0xf]  ;;  %v2173_v19 = vld [vmem:[#allocation11 + $0x138] sm:$0xff]  ;;  %v2150_v21 = vld [vmem:[#allocation11 + $0x80] sm:$0xff] }
 0x130   :  { %v200_v24 = vadd.f32 %v196_v16, %v194_v63  ;;  %776 = vmatpush.bf16.msrb.mxu3 %v1683_v9  ;;  %v1587_v51 = vor.u32 %v2073_v47, %v1584_v48  ;;  %v2148_v15 = vld [vmem:[#allocation11 + $0x70] sm:$0xff]  ;;  %v2147_v63 = vld [vmem:[#allocation11 + $0x68] sm:$0xff]  ;;  %v2181_v20 = vld [vmem:[#allocation11 + $0x178] sm:$0xff] }
 0x131   :  { %v198_v13 = vadd.f32 %v196_v16, %v192_v62  ;;  %758 = vmatpush.bf16.msrb.mxu2 %v1647_v14  ;;  %739 = vmatpush.bf16.msrb.mxu1 %v1643_v26  ;;  %v2140_v16 = vld [vmem:[#allocation11 + $0x30] sm:$0xff]  ;;  %v2137_v62 = vld [vmem:[#allocation11 + $0x18] sm:$0xff]  ;;  %v2143_v9 = vld [vmem:[#allocation11 + $0x48] sm:$0xff] }
 0x132   :  { %v2206_v22 = vpack.c.bf16 %v200_v24, %v199_v8  ;;  %v2144_v6 = vld [vmem:[#allocation11 + $0x50] sm:$0xff]  ;;  %v2161_v8 = vld [vmem:[#allocation11 + $0xd8] sm:$0xff]  ;;  %v2135_v24 = vld [vmem:[#allocation11 + $0x8] sm:$0xff] }
 0x133   :  { %v2201_v30 = vpack.c.bf16 %v198_v13, %v197_v7  ;;  %722 = vmatpush.bf16.msrb.mxu0 %v1575_v35  ;;  %v2153_v7 = vld [vmem:[#allocation11 + $0x98] sm:$0xff]  ;;  %v2152_v10 = vld [vmem:[#allocation11 + $0x90] sm:$0xff]  ;;  %v2142_v13 = vld [vmem:[#allocation11 + $0x40] sm:$0xff] }
 0x134   :  { %2208 = vst [vmem:[#allocation2 + $0x8] sm:$0xff] %v2206_v22   ;;  %777 = vmatpush.bf16.msrb.mxu3 %v1651_v17  ;;  %v2160_v11 = vld [vmem:[#allocation11 + $0xd0] sm:$0xff]  ;;  %v2151_v14 = vld [vmem:[#allocation11 + $0x88] sm:$0xff]  ;;  %v2158_v22 = vld [vmem:[#allocation11 + $0xc0] sm:$0xff] }
 0x135   :  { %2202 = vst [vmem:[#allocation2] sm:$0xff] %v2201_v30   ;;  %759 = vmatpush.bf16.msrb.mxu2 %v1615_v33  ;;  %740 = vmatpush.bf16.msrb.mxu1 %v1611_v25  ;;  %v2172_v26 = vld [vmem:[#allocation11 + $0x130] sm:$0xff]  ;;  %v2189_v28 = vld [vmem:[#allocation11 + $0x1b8] sm:$0xff]  ;;  %v2171_v30 = vld [vmem:[#allocation11 + $0x128] sm:$0xff] }
 0x136   :  { %v2180_v27 = vld [vmem:[#allocation11 + $0x170] sm:$0xff]  ;;  %v2197_v29 = vld [vmem:[#allocation11 + $0x1f8] sm:$0xff]  ;;  %v2179_v17 = vld [vmem:[#allocation11 + $0x168] sm:$0xff] }
 0x137   :  { %v2188_v58 = vld [vmem:[#allocation11 + $0x1b0] sm:$0xff]  ;;  %v2170_v32 = vld [vmem:[#allocation11 + $0x120] sm:$0xff]  ;;  %v2187_v34 = vld [vmem:[#allocation11 + $0x1a8] sm:$0xff] }
 0x138   :  { %778 = vmatpush.bf16.msrb.mxu3 %v1619_v40  ;;  %v2196_v31 = vld [vmem:[#allocation11 + $0x1f0] sm:$0xff]  ;;  %v2178_v33 = vld [vmem:[#allocation11 + $0x160] sm:$0xff]  ;;  %v2195_v36 = vld [vmem:[#allocation11 + $0x1e8] sm:$0xff] }
 0x139   :  { %760 = vmatpush.bf16.msrb.mxu2 %v1583_v52  ;;  %741 = vmatpush.bf16.msrb.mxu1 %v1579_v46  ;;  %v2169_v37 = vld [vmem:[#allocation11 + $0x118] sm:$0xff]  ;;  %v2186_v41 = vld [vmem:[#allocation11 + $0x1a0] sm:$0xff]  ;;  %v2168_v45 = vld [vmem:[#allocation11 + $0x110] sm:$0xff] }
 0x13a   :  { %v2177_v25 = vld [vmem:[#allocation11 + $0x158] sm:$0xff]  ;;  %v2194_v42 = vld [vmem:[#allocation11 + $0x1e0] sm:$0xff]  ;;  %v2176_v52 = vld [vmem:[#allocation11 + $0x150] sm:$0xff] }
 0x13b   :  { %v2069_v53 = vld [vmem:[#allocation2 + $0x8] sm:$0xff]  ;;  %v2523_v38 = vld [vmem:[#allocation9] sm:$0xff] }
 0x13c   :  { %v2068_v50 = vld [vmem:[#allocation2] sm:$0xff]  ;;  %779 = vmatpush.bf16.msrb.mxu3 %v1587_v51  ;;  %v2526_v43 = vperm.slane %v2523_v38, 0  ;;  %v2529_v44 = vperm.slane %v2523_v38, 1  ;;  %v2185_v35 = vld [vmem:[#allocation11 + $0x198] sm:$0xff] }
 0x13d   :  { %647 = vmatmul.bf16.vlgmr.msra.gmra.mxu0 %v2068_v50  ;;  %666 = vmatmul.bf16.vlgmr.msra.gmra.mxu1 %v2068_v50  ;;  %v2193_v46 = vld [vmem:[#allocation11 + $0x1d8] sm:$0xff] }
 0x13e   :  { %685 = vmatmul.bf16.vlgmr.msra.gmra.mxu2 %v2068_v50  ;;  %704 = vmatmul.bf16.vlgmr.msra.gmra.mxu3 %v2068_v50 }
 0x13f   :  { %1355 = vmatpush.bf16.msra.mxu0 %v2141_v54  ;;  %1374 = vmatpush.bf16.msra.mxu1 %v2149_v49  ;;  %v2175_v54 = vld [vmem:[#allocation11 + $0x148] sm:$0xff] }
 0x140   :  { %1393 = vmatpush.bf16.msra.mxu2 %v2157_v55  ;;  %1412 = vmatpush.bf16.msra.mxu3 %v2165_v57 }
 0x143   :  { %1356 = vmatpush.bf16.msra.mxu0 %v2140_v16  ;;  %1375 = vmatpush.bf16.msra.mxu1 %v2148_v15  ;;  %v2184_v15 = vld [vmem:[#allocation11 + $0x190] sm:$0xff] }
 0x144   :  { %1394 = vmatpush.bf16.msra.mxu2 %v2156_v59  ;;  %1413 = vmatpush.bf16.msra.mxu3 %v2164_v60  ;;  %v2192_v59 = vld [vmem:[#allocation11 + $0x1d0] sm:$0xff]  ;;  %v293_v60 = vperm.slane %v2523_v38, 2 }
 0x147   :  { %1357 = vmatpush.bf16.msra.mxu0 %v2139_v61  ;;  %1376 = vmatpush.bf16.msra.mxu1 %v2147_v63  ;;  %v294_v61 = vperm.slane %v2523_v38, 3 }
 0x148   :  { %1395 = vmatpush.bf16.msra.mxu2 %v2155_v0  ;;  %1414 = vmatpush.bf16.msra.mxu3 %v2163_v56 }
 0x14b   :  { %1358 = vmatpush.bf16.msra.mxu0 %v2138_v1  ;;  %1377 = vmatpush.bf16.msra.mxu1 %v2146_v2  ;;  %v2166_v2 = vld [vmem:[#allocation11 + $0x100] sm:$0xff] }
 0x14c   :  { %1396 = vmatpush.bf16.msra.mxu2 %v2154_v4  ;;  %1415 = vmatpush.bf16.msra.mxu3 %v2162_v5  ;;  %v2183_v5 = vld [vmem:[#allocation11 + $0x188] sm:$0xff] }
 0x14d   :  { %652 = vmatmul.bf16.gmra.mxu0 %v2069_v53  ;;  %671 = vmatmul.bf16.gmra.mxu1 %v2069_v53 }
 0x14e   :  { %690 = vmatmul.bf16.gmra.mxu2 %v2069_v53  ;;  %709 = vmatmul.bf16.gmra.mxu3 %v2069_v53 }
 0x14f   :  { %1359 = vmatpush.bf16.msra.mxu0 %v2137_v62  ;;  %1378 = vmatpush.bf16.msra.mxu1 %v2145_v3  ;;  %v2174_v62 = vld [vmem:[#allocation11 + $0x140] sm:$0xff] }
 0x150   :  { %1397 = vmatpush.bf16.msra.mxu2 %v2153_v7  ;;  %1416 = vmatpush.bf16.msra.mxu3 %v2161_v8 }
 0x153   :  { %1360 = vmatpush.bf16.msra.mxu0 %v2136_v23  ;;  %1379 = vmatpush.bf16.msra.mxu1 %v2144_v6  ;;  %v2191_v23 = vld [vmem:[#allocation11 + $0x1c8] sm:$0xff] }
 0x154   :  { %1398 = vmatpush.bf16.msra.mxu2 %v2152_v10  ;;  %1417 = vmatpush.bf16.msra.mxu3 %v2160_v11 }
 0x157   :  { %1361 = vmatpush.bf16.msra.mxu0 %v2135_v24  ;;  %1380 = vmatpush.bf16.msra.mxu1 %v2143_v9 }
 0x158   :  { %1399 = vmatpush.bf16.msra.mxu2 %v2151_v14  ;;  %1418 = vmatpush.bf16.msra.mxu3 %v2159_v18  ;;  %v2190_v14 = vld [vmem:[#allocation11 + $0x1c0] sm:$0xff] }
 0x15b   :  { %1362 = vmatpush.bf16.msra.mxu0 %v2134_v12  ;;  %1381 = vmatpush.bf16.msra.mxu1 %v2142_v13  ;;  %v2182_v13 = vld [vmem:[#allocation11 + $0x180] sm:$0xff] }
 0x15c   :  { %1400 = vmatpush.bf16.msra.mxu2 %v2150_v21  ;;  %1419 = vmatpush.bf16.msra.mxu3 %v2158_v22 }
 0x15d   :  { %723 = vmatmul.bf16.vlgmr.msrb.gmra.mxu0 %v2068_v50  ;;  %742 = vmatmul.bf16.vlgmr.msrb.gmra.mxu1 %v2068_v50 }
 0x15e   :  { %761 = vmatmul.bf16.vlgmr.msrb.gmra.mxu2 %v2068_v50  ;;  %780 = vmatmul.bf16.vlgmr.msrb.gmra.mxu3 %v2068_v50 }
 0x15f   :  { %1431 = vmatpush.bf16.msrb.mxu0 %v2173_v19  ;;  %1450 = vmatpush.bf16.msrb.mxu1 %v2181_v20 }
 0x160   :  { %1469 = vmatpush.bf16.msrb.mxu2 %v2189_v28  ;;  %1488 = vmatpush.bf16.msrb.mxu3 %v2197_v29 }
 0x163   :  { %1432 = vmatpush.bf16.msrb.mxu0 %v2172_v26  ;;  %1451 = vmatpush.bf16.msrb.mxu1 %v2180_v27 }
 0x164   :  { %1470 = vmatpush.bf16.msrb.mxu2 %v2188_v58  ;;  %1489 = vmatpush.bf16.msrb.mxu3 %v2196_v31 }
 0x167   :  { %1433 = vmatpush.bf16.msrb.mxu0 %v2171_v30  ;;  %1452 = vmatpush.bf16.msrb.mxu1 %v2179_v17 }
 0x168   :  { %1471 = vmatpush.bf16.msrb.mxu2 %v2187_v34  ;;  %1490 = vmatpush.bf16.msrb.mxu3 %v2195_v36 }
 0x16b   :  { %1434 = vmatpush.bf16.msrb.mxu0 %v2170_v32  ;;  %1453 = vmatpush.bf16.msrb.mxu1 %v2178_v33 }
 0x16c   :  { %1472 = vmatpush.bf16.msrb.mxu2 %v2186_v41  ;;  %1491 = vmatpush.bf16.msrb.mxu3 %v2194_v42 }
 0x16d   :  { %728 = vmatmul.bf16.gmra.mxu0 %v2069_v53  ;;  %747 = vmatmul.bf16.gmra.mxu1 %v2069_v53 }
 0x16e   :  { %766 = vmatmul.bf16.gmra.mxu2 %v2069_v53  ;;  %785 = vmatmul.bf16.gmra.mxu3 %v2069_v53  ;;  %v2167_v53 = vld [vmem:[#allocation11 + $0x108] sm:$0xff] }
 0x16f   :  { %1435 = vmatpush.bf16.msrb.mxu0 %v2169_v37  ;;  %1454 = vmatpush.bf16.msrb.mxu1 %v2177_v25 }
 0x170   :  { %1473 = vmatpush.bf16.msrb.mxu2 %v2185_v35  ;;  %1492 = vmatpush.bf16.msrb.mxu3 %v2193_v46 }
 0x173   :  { %1436 = vmatpush.bf16.msrb.mxu0 %v2168_v45  ;;  %1455 = vmatpush.bf16.msrb.mxu1 %v2176_v52 }
 0x174   :  { %1474 = vmatpush.bf16.msrb.mxu2 %v2184_v15  ;;  %1493 = vmatpush.bf16.msrb.mxu3 %v2192_v59 }
 0x177   :  { %1437 = vmatpush.bf16.msrb.mxu0 %v2167_v53  ;;  %1456 = vmatpush.bf16.msrb.mxu1 %v2175_v54  ;;  %v296_v53 = vperm.slane %v2523_v38, 5 }
 0x178   :  { %1475 = vmatpush.bf16.msrb.mxu2 %v2183_v5  ;;  %1494 = vmatpush.bf16.msrb.mxu3 %v2191_v23 }
 0x17b   :  { %1438 = vmatpush.bf16.msrb.mxu0 %v2166_v2  ;;  %1457 = vmatpush.bf16.msrb.mxu1 %v2174_v62 }
 0x17c   :  { %1476 = vmatpush.bf16.msrb.mxu2 %v2182_v13  ;;  %1495 = vmatpush.bf16.msrb.mxu3 %v2190_v14 }
 0x1ba   :  { %v648_v39 = vpop.f32.mrf.mxu0  ;;  %v667_v40 = vpop.f32.mrf.mxu1 }
 0x1bb   :  { %v649_v47 = vadd.f32 %v648_v39, %v2526_v43  ;;  %v668_v48 = vadd.f32 %v667_v40, %v2529_v44 }
 0x1bd   :  { %v791_v63 = vmax.f32 %v649_v47, 0.0  ;;  %v792_v0 = vmax.f32 %v668_v48, 0.0 }
 0x1c1   :  { %v686_v50 = vpop.f32.mrf.mxu2  ;;  %v705_v51 = vpop.f32.mrf.mxu3 }
 0x1c2   :  { %v650_v49 = vpop.f32.mrf.mxu0  ;;  %v669_v55 = vpop.f32.mrf.mxu1  ;;  %v687_v6 = vadd.f32 %v686_v50, %v293_v60  ;;  %v706_v7 = vadd.f32 %v705_v51, %v294_v61  ;;  %v295_v51 = vperm.slane %v2523_v38, 4 }
 0x1c3   :  { %v651_v57 = vadd.f32 %v650_v49, %v2526_v43  ;;  %v670_v16 = vadd.f32 %v669_v55, %v2529_v44 }
 0x1c4   :  { %v793_v18 = vmax.f32 %v687_v6, 0.0  ;;  %v794_v19 = vmax.f32 %v706_v7, 0.0 }
 0x1c5   :  { %v799_v56 = vmax.f32 %v651_v57, 0.0  ;;  %v800_v1 = vmax.f32 %v670_v16, 0.0 }
 0x1c7   :  { %v827_v3 = vpack.c.bf16 %v799_v56, %v791_v63  ;;  %v828_v4 = vpack.c.bf16 %v800_v1, %v792_v0  ;;  %v297_v0 = vperm.slane %v2523_v38, 6  ;;  %v298_v56 = vperm.slane %v2523_v38, 7 }
 0x1c9   :  { %v688_v8 = vpop.f32.mrf.mxu2  ;;  %v707_v24 = vpop.f32.mrf.mxu3  ;;  %1363 = vmatmul.bf16.vlgmr.msra.gmra.mxu0 %v827_v3  ;;  %1382 = vmatmul.bf16.vlgmr.msra.gmra.mxu1 %v828_v4 }
 0x1ca   :  { %v689_v9 = vadd.f32 %v688_v8, %v293_v60  ;;  %v708_v10 = vadd.f32 %v707_v24, %v294_v61  ;;  %v653_v11 = vpop.f32.mrf.mxu0  ;;  %v672_v12 = vpop.f32.mrf.mxu1 }
 0x1cb   :  { %v654_v27 = vadd.f32 %v653_v11, %v2526_v43  ;;  %v673_v28 = vadd.f32 %v672_v12, %v2529_v44 }
 0x1cc   :  { %v801_v20 = vmax.f32 %v689_v9, 0.0  ;;  %v802_v21 = vmax.f32 %v708_v10, 0.0 }
 0x1cd   :  { %v807_v33 = vmax.f32 %v654_v27, 0.0  ;;  %v808_v34 = vmax.f32 %v673_v28, 0.0 }
 0x1ce   :  { %v829_v22 = vpack.c.bf16 %v801_v20, %v793_v18  ;;  %v830_v26 = vpack.c.bf16 %v802_v21, %v794_v19 }
 0x1d0   :  { %1401 = vmatmul.bf16.vlgmr.msra.gmra.mxu2 %v829_v22  ;;  %1420 = vmatmul.bf16.vlgmr.msra.gmra.mxu3 %v830_v26 }
 0x1d1   :  { %v691_v29 = vpop.f32.mrf.mxu2  ;;  %v710_v30 = vpop.f32.mrf.mxu3 }
 0x1d2   :  { %v655_v17 = vpop.f32.mrf.mxu0  ;;  %v674_v58 = vpop.f32.mrf.mxu1  ;;  %v692_v40 = vadd.f32 %v691_v29, %v293_v60  ;;  %v711_v41 = vadd.f32 %v710_v30, %v294_v61 }
 0x1d3   :  { %v656_v31 = vadd.f32 %v655_v17, %v2526_v43  ;;  %v675_v32 = vadd.f32 %v674_v58, %v2529_v44 }
 0x1d4   :  { %v809_v48 = vmax.f32 %v692_v40, 0.0  ;;  %v810_v43 = vmax.f32 %v711_v41, 0.0 }
 0x1d5   :  { %v815_v36 = vmax.f32 %v656_v31, 0.0  ;;  %v816_v37 = vmax.f32 %v675_v32, 0.0 }
 0x1d7   :  { %v835_v25 = vpack.c.bf16 %v815_v36, %v807_v33  ;;  %v836_v39 = vpack.c.bf16 %v816_v37, %v808_v34 }
 0x1d9   :  { %v693_v42 = vpop.f32.mrf.mxu2  ;;  %v712_v45 = vpop.f32.mrf.mxu3  ;;  %1368 = vmatmul.bf16.gmra.mxu0 %v835_v25  ;;  %1387 = vmatmul.bf16.gmra.mxu1 %v836_v39 }
 0x1da   :  { %v694_v52 = vadd.f32 %v693_v42, %v293_v60  ;;  %v713_v35 = vadd.f32 %v712_v45, %v294_v61  ;;  %v724_v46 = vpop.f32.mrf.mxu0  ;;  %v743_v47 = vpop.f32.mrf.mxu1 }
 0x1db   :  { %v725_v55 = vadd.f32 %v724_v46, %v295_v51  ;;  %v744_v57 = vadd.f32 %v743_v47, %v296_v53 }
 0x1dc   :  { %v817_v50 = vmax.f32 %v694_v52, 0.0  ;;  %v818_v44 = vmax.f32 %v713_v35, 0.0 }
 0x1dd   :  { %v795_v1 = vmax.f32 %v725_v55, 0.0  ;;  %v796_v2 = vmax.f32 %v744_v57, 0.0 }
 0x1de   :  { %v837_v54 = vpack.c.bf16 %v817_v50, %v809_v48  ;;  %v838_v49 = vpack.c.bf16 %v818_v44, %v810_v43 }
 0x1e0   :  { %1406 = vmatmul.bf16.gmra.mxu2 %v837_v54  ;;  %1425 = vmatmul.bf16.gmra.mxu3 %v838_v49 }
 0x1e1   :  { %v762_v16 = vpop.f32.mrf.mxu2  ;;  %v781_v15 = vpop.f32.mrf.mxu3 }
 0x1e2   :  { %v726_v59 = vpop.f32.mrf.mxu0  ;;  %v745_v60 = vpop.f32.mrf.mxu1  ;;  %v763_v23 = vadd.f32 %v762_v16, %v297_v0  ;;  %v782_v6 = vadd.f32 %v781_v15, %v298_v56 }
 0x1e3   :  { %v727_v61 = vadd.f32 %v726_v59, %v295_v51  ;;  %v746_v63 = vadd.f32 %v745_v60, %v296_v53 }
 0x1e4   :  { %v797_v12 = vmax.f32 %v763_v23, 0.0  ;;  %v798_v13 = vmax.f32 %v782_v6, 0.0  ;;  %v2221_v23 = vld [vmem:[%s2568_s5] ss:$0 sm:$0xff] }
 0x1e5   :  { %v803_v62 = vmax.f32 %v727_v61, 0.0  ;;  %v804_v3 = vmax.f32 %v746_v63, 0.0 }
 0x1e7   :  { %v831_v4 = vpack.c.bf16 %v803_v62, %v795_v1  ;;  %v832_v5 = vpack.c.bf16 %v804_v3, %v796_v2 }
 0x1e9   :  { %v764_v7 = vpop.f32.mrf.mxu2  ;;  %v783_v8 = vpop.f32.mrf.mxu3  ;;  %1439 = vmatmul.bf16.vlgmr.msrb.gmra.mxu0 %v831_v4  ;;  %1458 = vmatmul.bf16.vlgmr.msrb.gmra.mxu1 %v832_v5 }
 0x1ea   :  { %v765_v24 = vadd.f32 %v764_v7, %v297_v0  ;;  %v784_v9 = vadd.f32 %v783_v8, %v298_v56  ;;  %v729_v10 = vpop.f32.mrf.mxu0  ;;  %v748_v11 = vpop.f32.mrf.mxu1 }
 0x1eb   :  { %v730_v20 = vadd.f32 %v729_v10, %v295_v51  ;;  %v749_v21 = vadd.f32 %v748_v11, %v296_v53 }
 0x1ec   :  { %v805_v14 = vmax.f32 %v765_v24, 0.0  ;;  %v806_v38 = vmax.f32 %v784_v9, 0.0  ;;  %v2240_v9 = vld [vmem:[%s2564_s1] sm:$0xff] }
 0x1ed   :  { %v811_v17 = vmax.f32 %v730_v20, 0.0  ;;  %v812_v58 = vmax.f32 %v749_v21, 0.0  ;;  %v213_v10 = vadd.f32 %v2240_v9, %v2221_v23 }
 0x1ee   :  { %v833_v18 = vpack.c.bf16 %v805_v14, %v797_v12  ;;  %v834_v19 = vpack.c.bf16 %v806_v38, %v798_v13 }
 0x1f0   :  { %1477 = vmatmul.bf16.vlgmr.msrb.gmra.mxu2 %v833_v18  ;;  %1496 = vmatmul.bf16.vlgmr.msrb.gmra.mxu3 %v834_v19 }
 0x1f1   :  { %v767_v22 = vpop.f32.mrf.mxu2  ;;  %v786_v26 = vpop.f32.mrf.mxu3 }
 0x1f2   :  { %v731_v27 = vpop.f32.mrf.mxu0  ;;  %v750_v28 = vpop.f32.mrf.mxu1  ;;  %v768_v36 = vadd.f32 %v767_v22, %v297_v0  ;;  %v787_v37 = vadd.f32 %v786_v26, %v298_v56 }
 0x1f3   :  { %v732_v29 = vadd.f32 %v731_v27, %v295_v51  ;;  %v751_v30 = vadd.f32 %v750_v28, %v296_v53  ;;  %v2241_v28 = vld [vmem:[%s2564_s1 + $0x8] sm:$0xff] }
 0x1f4   :  { %v813_v42 = vmax.f32 %v768_v36, 0.0  ;;  %v814_v45 = vmax.f32 %v787_v37, 0.0 }
 0x1f5   :  { %v819_v31 = vmax.f32 %v732_v29, 0.0  ;;  %v820_v32 = vmax.f32 %v751_v30, 0.0  ;;  %v214_v29 = vadd.f32 %v2241_v28, %v2221_v23 }
 0x1f7   :  { %v839_v33 = vpack.c.bf16 %v819_v31, %v811_v17  ;;  %v840_v34 = vpack.c.bf16 %v820_v32, %v812_v58 }
 0x1f9   :  { %v769_v25 = vpop.f32.mrf.mxu2  ;;  %v788_v39 = vpop.f32.mrf.mxu3  ;;  %1444 = vmatmul.bf16.gmra.mxu0 %v839_v33  ;;  %1463 = vmatmul.bf16.gmra.mxu1 %v840_v34 }
 0x1fa   :  { %v770_v40 = vadd.f32 %v769_v25, %v297_v0  ;;  %v789_v41 = vadd.f32 %v788_v39, %v298_v56 }
 0x1fc   :  { %v821_v52 = vmax.f32 %v770_v40, 0.0  ;;  %v822_v35 = vmax.f32 %v789_v41, 0.0  ;;  %v2242_v41 = vld [vmem:[%s2564_s1 + $0x10] sm:$0xff] }
 0x1fe   :  { %v841_v46 = vpack.c.bf16 %v821_v52, %v813_v42  ;;  %v842_v47 = vpack.c.bf16 %v822_v35, %v814_v45  ;;  %v215_v42 = vadd.f32 %v2242_v41, %v2221_v23 }
 0x200   :  { %1482 = vmatmul.bf16.gmra.mxu2 %v841_v46  ;;  %1501 = vmatmul.bf16.gmra.mxu3 %v842_v47 }
 0x246   :  { %v1364_v48 = vpop.f32.mrf.mxu0  ;;  %v1383_v43 = vpop.f32.mrf.mxu1 }
 0x247   :  { %v1384_v61 = vadd.f32 %v1383_v43, %v1364_v48 }
 0x24e   :  { %v1366_v50 = vpop.f32.mrf.mxu0  ;;  %v1385_v44 = vpop.f32.mrf.mxu1 }
 0x24f   :  { %v1386_v3 = vadd.f32 %v1385_v44, %v1366_v50  ;;  %v2243_v44 = vld [vmem:[%s2564_s1 + $0x18] sm:$0xff] }
 0x253   :  { %v1402_v51 = vpop.f32.mrf.mxu2  ;;  %v1421_v53 = vpop.f32.mrf.mxu3 }
 0x254   :  { %v1403_v0 = vadd.f32 %v1402_v51, %v1384_v61  ;;  %v216_v51 = vadd.f32 %v2243_v44, %v2221_v23 }
 0x256   :  { %v1369_v54 = vpop.f32.mrf.mxu0  ;;  %v1388_v49 = vpop.f32.mrf.mxu1  ;;  %v1422_v62 = vadd.f32 %v1421_v53, %v1403_v0 }
 0x257   :  { %v1389_v14 = vadd.f32 %v1388_v49, %v1369_v54 }
 0x25b   :  { %v1404_v55 = vpop.f32.mrf.mxu2  ;;  %v1423_v57 = vpop.f32.mrf.mxu3 }
 0x25c   :  { %v1405_v6 = vadd.f32 %v1404_v55, %v1386_v3 }
 0x25e   :  { %v1371_v16 = vpop.f32.mrf.mxu0  ;;  %v1390_v15 = vpop.f32.mrf.mxu1  ;;  %v1424_v11 = vadd.f32 %v1423_v57, %v1405_v6 }
 0x25f   :  { %v1391_v58 = vadd.f32 %v1390_v15, %v1371_v16 }
 0x263   :  { %v1407_v59 = vpop.f32.mrf.mxu2  ;;  %v1426_v60 = vpop.f32.mrf.mxu3 }
 0x264   :  { %v1408_v19 = vadd.f32 %v1407_v59, %v1389_v14 }
 0x266   :  { %v1440_v63 = vpop.f32.mrf.mxu0  ;;  %v1459_v56 = vpop.f32.mrf.mxu1  ;;  %v1427_v30 = vadd.f32 %v1426_v60, %v1408_v19 }
 0x267   :  { %v1441_v4 = vadd.f32 %v1440_v63, %v1422_v62 }
 0x269   :  { %v1460_v7 = vadd.f32 %v1459_v56, %v1441_v4 }
 0x26b   :  { %v1409_v1 = vpop.f32.mrf.mxu2  ;;  %v1428_v2 = vpop.f32.mrf.mxu3 }
 0x26c   :  { %v1410_v34 = vadd.f32 %v1409_v1, %v1391_v58 }
 0x26e   :  { %v1442_v5 = vpop.f32.mrf.mxu0  ;;  %v1461_v13 = vpop.f32.mrf.mxu1  ;;  %v1429_v45 = vadd.f32 %v1428_v2, %v1410_v34 }
 0x26f   :  { %v1443_v38 = vadd.f32 %v1442_v5, %v1424_v11 }
 0x271   :  { %v1462_v22 = vadd.f32 %v1461_v13, %v1443_v38 }
 0x273   :  { %v1478_v8 = vpop.f32.mrf.mxu2  ;;  %v1497_v24 = vpop.f32.mrf.mxu3 }
 0x274   :  { %v1479_v12 = vadd.f32 %v1478_v8, %v1460_v7 }
 0x276   :  { %v1498_v18 = vadd.f32 %v1497_v24, %v1479_v12  ;;  %v1445_v21 = vpop.f32.mrf.mxu0  ;;  %v1464_v33 = vpop.f32.mrf.mxu1 }
 0x277   :  { %v1446_v31 = vadd.f32 %v1445_v21, %v1427_v30 }
 0x278   :  { %v1507_v20 = vadd.f32 %v1498_v18, %v213_v10 }
 0x279   :  { %v1465_v37 = vadd.f32 %v1464_v33, %v1446_v31 }
 0x27a   :  { %1522 = vst [vmem:[#allocation12] sm:$0xff] %v1507_v20 }
 0x27b   :  { %v1480_v26 = vpop.f32.mrf.mxu2  ;;  %v1499_v27 = vpop.f32.mrf.mxu3 }
 0x27c   :  { %v1481_v17 = vadd.f32 %v1480_v26, %v1462_v22 }
 0x27e   :  { %v1500_v32 = vadd.f32 %v1499_v27, %v1481_v17  ;;  %v1447_v25 = vpop.f32.mrf.mxu0  ;;  %v1466_v48 = vpop.f32.mrf.mxu1 }
 0x27f   :  { %v1448_v35 = vadd.f32 %v1447_v25, %v1429_v45 }
 0x280   :  { %v1508_v36 = vadd.f32 %v1500_v32, %v214_v29 }
 0x281   :  { %v1467_v43 = vadd.f32 %v1466_v48, %v1448_v35 }
 0x282   :  { %1523 = vst [vmem:[#allocation12 + $0x8] sm:$0xff] %v1508_v36 }
 0x283   :  { %v1483_v39 = vpop.f32.mrf.mxu2  ;;  %v1502_v40 = vpop.f32.mrf.mxu3 }
 0x284   :  { %v1484_v52 = vadd.f32 %v1483_v39, %v1465_v37 }
 0x286   :  { %v1503_v46 = vadd.f32 %v1502_v40, %v1484_v52 }
 0x288   :  { %v1509_v47 = vadd.f32 %v1503_v46, %v215_v42 }
 0x28a   :  { %1524 = vst [vmem:[#allocation12 + $0x10] sm:$0xff] %v1509_v47 }
 0x28b   :  { %v1485_v50 = vpop.f32.mrf.mxu2  ;;  %v1504_v54 = vpop.f32.mrf.mxu3 }
 0x28c   :  { %v1486_v53 = vadd.f32 %v1485_v50, %v1467_v43 }
 0x28e   :  { %v1505_v49 = vadd.f32 %v1504_v54, %v1486_v53 }
 0x290   :  { %v1510_v55 = vadd.f32 %v1505_v49, %v216_v51 }
 0x292   :  { %1525 = vst [vmem:[#allocation12 + $0x18] sm:$0xff] %v1510_v55 }
 0x293   :  { %1538 = dma.vmem_to_hbm [thread:$0]  %s1531_s11, 512, %s1533_s14, [#allocation6], %s2370_s0, %s2370_s0, %s2371_s15  }
 0x294   :  { %2358 = dma.done.wait [#allocation6], 512  }
 0x295   :  { %2359 = vsyncadd [#allocation6], 4294966784 }
 0x296   :  { %1543 = vsyncpa [#allocation5], 1 }
 0x297   :  { %1544 = vsyncpa [#allocation10], 1 }
 0x298   :  { %1545 = vsyncpa [#allocation6], 1 }
 0x299   :  { %1546 = vsyncpa [#allocation7], 1 }

</bundles_post_ra>
